<compile_context>
chip_gen: v6e
topology: v6e:2x2x1
jax: 0.10.0
libtpu: 0.0.40
codegen_flags: <defaults>
</compile_context>

<pallas_src>
import functools

import jax
import jax.numpy as jnp
from jax.experimental import pallas as pl
from jax.experimental.pallas import tpu as pltpu


# ---------------------------------------------------------------------------
# Kernel 1: core TuckERT contraction -> z (B, de), bf16.
# Grid: (nk,) over blocks of W rows (K = dr*de reduction axis, "arbitrary").
# The whole batch stays resident so BatchNorm batch statistics are exact.
# ---------------------------------------------------------------------------
def tuckert_core_kernel(e1_ref, r_ref, t_ref, w2_ref, gamma_ref, beta_ref,
                        z_ref, xr_s, y_acc, *, de, dt, tr, nk):
    k = pl.program_id(0)

    @pl.when(k == 0)
    def _init():
        e1 = e1_ref[...]                                        # (B, de) f32
        # nn.BatchNorm1d(de), training semantics: batch mean, biased var, eps=1e-5.
        mean = jnp.mean(e1, axis=0, keepdims=True)
        var = jnp.mean((e1 - mean) ** 2, axis=0, keepdims=True)
        x = (e1 - mean) * jax.lax.rsqrt(var + 1e-5)
        x = x * gamma_ref[...] + beta_ref[...]                  # (B, de) f32
        # input/hidden dropouts have p=0.0 -> identity.

        r = r_ref[...]                                          # (B, dr) f32
        # Per-row outer product xr[b, j*de+i] = r[b,j]*x[b,i], stored per
        # K-block (block kk uses r columns kk*tr .. kk*tr+tr-1), bf16 for MXU.
        for kk in range(nk):
            cols = [r[:, kk * tr + j:kk * tr + j + 1] * x for j in range(tr)]
            xr_s[kk] = jnp.concatenate(cols, axis=1).astype(jnp.bfloat16)

        y_acc[...] = jnp.zeros_like(y_acc)

    # y += xr_block @ W_block   (bf16 x bf16 -> f32 accumulate on the MXU)
    y_acc[...] += jnp.dot(xr_s[k], w2_ref[...],
                          preferred_element_type=jnp.float32)

    @pl.when(k == nk - 1)
    def _finalize():
        t = t_ref[...]                                          # (B, dt) f32
        y = y_acc[...]                                          # (B, dt*de) f32
        # z[b, k] = sum_l t[b,l] * y[b, l*de + k]  (columns grouped by l, so
        # each slice is a contiguous, static de-wide lane block).
        z = jnp.zeros((y.shape[0], de), jnp.float32)
        for l in range(dt):
            z = z + t[:, l:l + 1] * y[:, l * de:(l + 1) * de]
        z_ref[...] = z.astype(z_ref.dtype)


# ---------------------------------------------------------------------------
# Kernel 2: scoring  pred_tile = sigmoid(z @ E_tile^T).
# Grid: (ne_pad // ne_tile,) over 128-row entity tiles ("parallel").
# ---------------------------------------------------------------------------
def tuckert_score_kernel(z_ref, e_ref, out_ref):
    logits = jax.lax.dot_general(
        z_ref[...], e_ref[...],
        dimension_numbers=(((1,), (1,)), ((), ())),   # contract de with de
        preferred_element_type=jnp.float32)           # (B, ne_tile) f32
    out_ref[...] = jax.nn.sigmoid(logits)


def tuckert_forward(e1_idx, r_idx, t_idx, params, *,
                    k_block_rows=256, ne_tile=128):
    E, R, T, W = params["E"], params["R"], params["T"], params["W"]
    gamma, beta = params["gamma"], params["beta"]
    ne, de = E.shape
    dr = R.shape[1]
    dt = T.shape[1]
    B = e1_idx.shape[0]

    # ---- glue: embedding row gathers (tiny next to W / E traffic) ---------
    # TODO(synk): at production sizes these gathers could move in-kernel via
    # PrefetchScalarGridSpec scalar-prefetched indices + manual DMA.
    e1 = E[e1_idx].astype(jnp.float32)          # (B, de)
    r = R[r_idx].astype(jnp.float32)            # (B, dr)
    t = T[t_idx].astype(jnp.float32)            # (B, dt)

    # ---- W layout: w2[j*de+i, l*de+k] = W[j, i, k, l], bf16 MXU operand ----
    w2 = jnp.transpose(W, (0, 1, 3, 2)).reshape(dr * de, dt * de)
    w2 = w2.astype(jnp.bfloat16)

    # K-reduction tiling over W rows, in units of whole r-columns (tr*de rows).
    K = dr * de
    if k_block_rows % de == 0 and K % k_block_rows == 0:
        tk = k_block_rows
    else:
        tk = K
    tr = tk // de
    nk = K // tk

    gamma2 = gamma.reshape(1, de).astype(jnp.float32)
    beta2 = beta.reshape(1, de).astype(jnp.float32)

    kernel1 = functools.partial(tuckert_core_kernel, de=de, dt=dt, tr=tr, nk=nk)
    z = pl.pallas_call(
        kernel1,
        out_shape=jax.ShapeDtypeStruct((B, de), jnp.bfloat16),
        grid_spec=pltpu.PrefetchScalarGridSpec(
            num_scalar_prefetch=0,
            grid=(nk,),
            in_specs=[
                pl.BlockSpec((B, de), lambda k: (0, 0)),        # e1 (resident)
                pl.BlockSpec((B, dr), lambda k: (0, 0)),        # r  (resident)
                pl.BlockSpec((B, dt), lambda k: (0, 0)),        # t  (resident)
                pl.BlockSpec((tk, dt * de), lambda k: (k, 0)),  # W row block
                pl.BlockSpec((1, de), lambda k: (0, 0)),        # gamma
                pl.BlockSpec((1, de), lambda k: (0, 0)),        # beta
            ],
            out_specs=pl.BlockSpec((B, de), lambda k: (0, 0)),
            scratch_shapes=[
                pltpu.VMEM((nk, B, tk), jnp.bfloat16),          # xr K-blocks
                pltpu.VMEM((B, dt * de), jnp.float32),          # y accumulator
            ],
        ),
        compiler_params=pltpu.CompilerParams(
            dimension_semantics=("arbitrary",)),
    )(e1, r, t, w2, gamma2, beta2)

    # ---- final scoring against E, lane-dense 128-wide entity tiles --------
    ne_pad = pl.cdiv(ne, ne_tile) * ne_tile
    e_bf = E.astype(jnp.bfloat16)
    e_pad = jnp.pad(e_bf, ((0, ne_pad - ne), (0, 0)))

    out = pl.pallas_call(
        tuckert_score_kernel,
        out_shape=jax.ShapeDtypeStruct((B, ne_pad), jnp.float32),
        grid_spec=pltpu.PrefetchScalarGridSpec(
            num_scalar_prefetch=0,
            grid=(ne_pad // ne_tile,),
            in_specs=[
                pl.BlockSpec((B, de), lambda n: (0, 0)),        # z (resident)
                pl.BlockSpec((ne_tile, de), lambda n: (n, 0)),  # E row tile
            ],
            out_specs=pl.BlockSpec((B, ne_tile), lambda n: (0, n)),
        ),
        compiler_params=pltpu.CompilerParams(
            dimension_semantics=("parallel",)),
    )(z, e_pad)

    return out[:, :ne]


# ---------------------------------------------------------------------------
# Pure-JAX reference (f32) following the PyTorch module exactly.
# ---------------------------------------------------------------------------
def reference_forward(e1_idx, r_idx, t_idx, params):
    E, R, T, W = params["E"], params["R"], params["T"], params["W"]
    gamma, beta = params["gamma"], params["beta"]
    e1 = E[e1_idx]
    r = R[r_idx]
    t = T[t_idx]
    mean = jnp.mean(e1, axis=0, keepdims=True)
    var = jnp.mean((e1 - mean) ** 2, axis=0, keepdims=True)
    x = (e1 - mean) * jax.lax.rsqrt(var + 1e-5) * gamma + beta
    z = jnp.einsum("bj,bi,jikl,bl->bk", r, x, W, t)
    return jax.nn.sigmoid(z @ E.T)


def init_params(key, ne, nr, nt, de, dr, dt):
    k_e, k_r, k_t, k_w = jax.random.split(key, 4)
    # xavier_normal_ for embedding weights, uniform(-0.1, 0.1) for the core W.
    E = jax.random.normal(k_e, (ne, de), jnp.float32) * jnp.sqrt(2.0 / (ne + de))
    R = jax.random.normal(k_r, (nr, dr), jnp.float32) * jnp.sqrt(2.0 / (nr + dr))
    T = jax.random.normal(k_t, (nt, dt), jnp.float32) * jnp.sqrt(2.0 / (nt + dt))
    W = jax.random.uniform(k_w, (dr, de, de, dt), jnp.float32, -0.1, 0.1)
    gamma = jnp.ones((de,), jnp.float32)    # BatchNorm1d default affine init
    beta = jnp.zeros((de,), jnp.float32)
    return dict(E=E, R=R, T=T, W=W, gamma=gamma, beta=beta)


if __name__ == "__main__":
    # Small synthetic knowledge-graph sizes (B=128 so the MXU M-dim is full,
    # ne not a multiple of 128 to exercise the lane-dense padding path).
    ne, nr, nt = 300, 24, 16         # #entities, #relations, #timestamps
    de, dr, dt = 32, 16, 8           # entity / relation / time embedding dims
    B = 128                          # batch size

    key = jax.random.PRNGKey(0)
    kp, k1, k2, k3 = jax.random.split(key, 4)
    params = init_params(kp, ne, nr, nt, de, dr, dt)

    e1_idx = jax.random.randint(k1, (B,), 0, ne)
    r_idx = jax.random.randint(k2, (B,), 0, nr)
    t_idx = jax.random.randint(k3, (B,), 0, nt)

    fwd = jax.jit(tuckert_forward)
    pred = jax.block_until_ready(fwd(e1_idx, r_idx, t_idx, params))

    ref = reference_forward(e1_idx, r_idx, t_idx, params)
    err = float(jnp.max(jnp.abs(pred - ref)))

    assert pred.shape == (B, ne)
    assert bool(jnp.all((pred >= 0.0) & (pred <= 1.0)))
    assert err < 2e-2, f"max abs error vs f32 reference: {err}"
    # TODO(synk): BatchNorm running-stat updates and nn.BCELoss are training-side
    # effects, not part of the forward output, so they are not reproduced.
    print("KERNEL_OK")
</pallas_src>

<mosaic_0001>
module attributes {stable_mosaic.version = 11 : i64} {
  func.func @tuckert_core_kernel(%arg0: i32, %arg1: memref<128x32xf32, #tpu.memory_space<vmem>>, %arg2: memref<128x16xf32, #tpu.memory_space<vmem>>, %arg3: memref<128x8xf32, #tpu.memory_space<vmem>>, %arg4: memref<256x256xbf16, #tpu.memory_space<vmem>>, %arg5: memref<1x32xf32, #tpu.memory_space<vmem>>, %arg6: memref<1x32xf32, #tpu.memory_space<vmem>>, %arg7: memref<128x32xbf16, #tpu.memory_space<vmem>>, %arg8: memref<2x128x256xbf16, #tpu.memory_space<vmem>>, %arg9: memref<128x256xf32, #tpu.memory_space<vmem>>) attributes {dimension_semantics = [#tpu.dimension_semantics<arbitrary>], iteration_bounds = array<i64: 2>, scalar_prefetch = 0 : i64, scratch_operands = 2 : i64, tpu.core_type = #tpu.core_type<tc>, window_params = [{pipeline_mode = #tpu.pipeline_mode<synchronous>, transform_indices = @transform_0, window_bounds = array<i64: 128, 32>}, {pipeline_mode = #tpu.pipeline_mode<synchronous>, transform_indices = @transform_1, window_bounds = array<i64: 128, 16>}, {pipeline_mode = #tpu.pipeline_mode<synchronous>, transform_indices = @transform_2, window_bounds = array<i64: 128, 8>}, {transform_indices = @transform_3, window_bounds = array<i64: 256, 256>}, {pipeline_mode = #tpu.pipeline_mode<synchronous>, transform_indices = @transform_4, window_bounds = array<i64: 1, 32>}, {pipeline_mode = #tpu.pipeline_mode<synchronous>, transform_indices = @transform_5, window_bounds = array<i64: 1, 32>}, {pipeline_mode = #tpu.pipeline_mode<synchronous>, transform_indices = @transform_6, window_bounds = array<i64: 128, 32>}]} {
    %c0_i32 = arith.constant 0 : i32
    %0 = arith.cmpi eq, %arg0, %c0_i32 : i32
    %1 = arith.extui %0 : i1 to i32
    %c0_i32_0 = arith.constant 0 : i32
    %2 = arith.cmpi ne, %1, %c0_i32_0 : i32
    scf.if %2 {
      %c0_9 = arith.constant 0 : index
      %c0_10 = arith.constant 0 : index
      %14 = vector.load %arg1[%c0_9, %c0_10] : memref<128x32xf32, #tpu.memory_space<vmem>>, vector<128x32xf32>
      %cst_11 = arith.constant dense<0.000000e+00> : vector<32xf32>
      %15 = vector.multi_reduction <add>, %14, %cst_11 [0] : vector<128x32xf32> to vector<32xf32>
      %16 = vector.shape_cast %15 : vector<32xf32> to vector<1x32xf32>
      %cst_12 = arith.constant 1.280000e+02 : f32
      %17 = vector.broadcast %cst_12 : f32 to vector<1x32xf32>
      %18 = arith.divf %16, %17 : vector<1x32xf32>
      %19 = vector.broadcast %18 : vector<1x32xf32> to vector<128x32xf32>
      %20 = arith.subf %14, %19 : vector<128x32xf32>
      %21 = arith.mulf %20, %20 : vector<128x32xf32>
      %cst_13 = arith.constant dense<0.000000e+00> : vector<32xf32>
      %22 = vector.multi_reduction <add>, %21, %cst_13 [0] : vector<128x32xf32> to vector<32xf32>
      %23 = vector.shape_cast %22 : vector<32xf32> to vector<1x32xf32>
      %cst_14 = arith.constant 1.280000e+02 : f32
      %24 = vector.broadcast %cst_14 : f32 to vector<1x32xf32>
      %25 = arith.divf %23, %24 : vector<1x32xf32>
      %26 = vector.broadcast %18 : vector<1x32xf32> to vector<128x32xf32>
      %27 = arith.subf %14, %26 : vector<128x32xf32>
      %cst_15 = arith.constant 9.99999974E-6 : f32
      %28 = vector.broadcast %cst_15 : f32 to vector<1x32xf32>
      %29 = arith.addf %25, %28 : vector<1x32xf32>
      %30 = math.rsqrt %29 : vector<1x32xf32>
      %31 = vector.broadcast %30 : vector<1x32xf32> to vector<128x32xf32>
      %32 = arith.mulf %27, %31 : vector<128x32xf32>
      %c0_16 = arith.constant 0 : index
      %c0_17 = arith.constant 0 : index
      %33 = vector.load %arg5[%c0_16, %c0_17] : memref<1x32xf32, #tpu.memory_space<vmem>>, vector<1x32xf32>
      %34 = vector.broadcast %33 : vector<1x32xf32> to vector<128x32xf32>
      %35 = arith.mulf %32, %34 : vector<128x32xf32>
      %c0_18 = arith.constant 0 : index
      %c0_19 = arith.constant 0 : index
      %36 = vector.load %arg6[%c0_18, %c0_19] : memref<1x32xf32, #tpu.memory_space<vmem>>, vector<1x32xf32>
      %37 = vector.broadcast %36 : vector<1x32xf32> to vector<128x32xf32>
      %38 = arith.addf %35, %37 : vector<128x32xf32>
      %c0_20 = arith.constant 0 : index
      %c0_21 = arith.constant 0 : index
      %39 = vector.load %arg2[%c0_20, %c0_21] : memref<128x16xf32, #tpu.memory_space<vmem>>, vector<128x16xf32>
      %40 = vector.extract_strided_slice %39 {offsets = [0, 0], sizes = [128, 1], strides = [1, 1]} : vector<128x16xf32> to vector<128x1xf32>
      %41 = vector.broadcast %40 : vector<128x1xf32> to vector<128x32xf32>
      %42 = arith.mulf %41, %38 : vector<128x32xf32>
      %43 = vector.extract_strided_slice %39 {offsets = [0, 1], sizes = [128, 1], strides = [1, 1]} : vector<128x16xf32> to vector<128x1xf32>
      %44 = vector.broadcast %43 : vector<128x1xf32> to vector<128x32xf32>
      %45 = arith.mulf %44, %38 : vector<128x32xf32>
      %46 = vector.extract_strided_slice %39 {offsets = [0, 2], sizes = [128, 1], strides = [1, 1]} : vector<128x16xf32> to vector<128x1xf32>
      %47 = vector.broadcast %46 : vector<128x1xf32> to vector<128x32xf32>
      %48 = arith.mulf %47, %38 : vector<128x32xf32>
      %49 = vector.extract_strided_slice %39 {offsets = [0, 3], sizes = [128, 1], strides = [1, 1]} : vector<128x16xf32> to vector<128x1xf32>
      %50 = vector.broadcast %49 : vector<128x1xf32> to vector<128x32xf32>
      %51 = arith.mulf %50, %38 : vector<128x32xf32>
      %52 = vector.extract_strided_slice %39 {offsets = [0, 4], sizes = [128, 1], strides = [1, 1]} : vector<128x16xf32> to vector<128x1xf32>
      %53 = vector.broadcast %52 : vector<128x1xf32> to vector<128x32xf32>
      %54 = arith.mulf %53, %38 : vector<128x32xf32>
      %55 = vector.extract_strided_slice %39 {offsets = [0, 5], sizes = [128, 1], strides = [1, 1]} : vector<128x16xf32> to vector<128x1xf32>
      %56 = vector.broadcast %55 : vector<128x1xf32> to vector<128x32xf32>
      %57 = arith.mulf %56, %38 : vector<128x32xf32>
      %58 = vector.extract_strided_slice %39 {offsets = [0, 6], sizes = [128, 1], strides = [1, 1]} : vector<128x16xf32> to vector<128x1xf32>
      %59 = vector.broadcast %58 : vector<128x1xf32> to vector<128x32xf32>
      %60 = arith.mulf %59, %38 : vector<128x32xf32>
      %61 = vector.extract_strided_slice %39 {offsets = [0, 7], sizes = [128, 1], strides = [1, 1]} : vector<128x16xf32> to vector<128x1xf32>
      %62 = vector.broadcast %61 : vector<128x1xf32> to vector<128x32xf32>
      %63 = arith.mulf %62, %38 : vector<128x32xf32>
      %64 = tpu.concatenate %42, %45, %48, %51, %54, %57, %60, %63 in 1 : vector<128x32xf32>, vector<128x32xf32>, vector<128x32xf32>, vector<128x32xf32>, vector<128x32xf32>, vector<128x32xf32>, vector<128x32xf32>, vector<128x32xf32> -> vector<128x256xf32>
      %65 = arith.truncf %64 : vector<128x256xf32> to vector<128x256xbf16>
      %c0_22 = arith.constant 0 : index
      %c0_23 = arith.constant 0 : index
      %c0_24 = arith.constant 0 : index
      %66 = vector.load %arg8[%c0_22, %c0_23, %c0_24] : memref<2x128x256xbf16, #tpu.memory_space<vmem>>, vector<1x128x256xbf16>
      %67 = vector.shape_cast %66 : vector<1x128x256xbf16> to vector<128x256xbf16>
      %68 = vector.shape_cast %65 : vector<128x256xbf16> to vector<1x128x256xbf16>
      tpu.vector_store %arg8[%c0_22, %c0_23, %c0_24], %68 {strides = array<i32>} : memref<2x128x256xbf16, #tpu.memory_space<vmem>>, vector<1x128x256xbf16>,
      %69 = vector.extract_strided_slice %39 {offsets = [0, 8], sizes = [128, 1], strides = [1, 1]} : vector<128x16xf32> to vector<128x1xf32>
      %70 = vector.broadcast %69 : vector<128x1xf32> to vector<128x32xf32>
      %71 = arith.mulf %70, %38 : vector<128x32xf32>
      %72 = vector.extract_strided_slice %39 {offsets = [0, 9], sizes = [128, 1], strides = [1, 1]} : vector<128x16xf32> to vector<128x1xf32>
      %73 = vector.broadcast %72 : vector<128x1xf32> to vector<128x32xf32>
      %74 = arith.mulf %73, %38 : vector<128x32xf32>
      %75 = vector.extract_strided_slice %39 {offsets = [0, 10], sizes = [128, 1], strides = [1, 1]} : vector<128x16xf32> to vector<128x1xf32>
      %76 = vector.broadcast %75 : vector<128x1xf32> to vector<128x32xf32>
      %77 = arith.mulf %76, %38 : vector<128x32xf32>
      %78 = vector.extract_strided_slice %39 {offsets = [0, 11], sizes = [128, 1], strides = [1, 1]} : vector<128x16xf32> to vector<128x1xf32>
      %79 = vector.broadcast %78 : vector<128x1xf32> to vector<128x32xf32>
      %80 = arith.mulf %79, %38 : vector<128x32xf32>
      %81 = vector.extract_strided_slice %39 {offsets = [0, 12], sizes = [128, 1], strides = [1, 1]} : vector<128x16xf32> to vector<128x1xf32>
      %82 = vector.broadcast %81 : vector<128x1xf32> to vector<128x32xf32>
      %83 = arith.mulf %82, %38 : vector<128x32xf32>
      %84 = vector.extract_strided_slice %39 {offsets = [0, 13], sizes = [128, 1], strides = [1, 1]} : vector<128x16xf32> to vector<128x1xf32>
      %85 = vector.broadcast %84 : vector<128x1xf32> to vector<128x32xf32>
      %86 = arith.mulf %85, %38 : vector<128x32xf32>
      %87 = vector.extract_strided_slice %39 {offsets = [0, 14], sizes = [128, 1], strides = [1, 1]} : vector<128x16xf32> to vector<128x1xf32>
      %88 = vector.broadcast %87 : vector<128x1xf32> to vector<128x32xf32>
      %89 = arith.mulf %88, %38 : vector<128x32xf32>
      %90 = vector.extract_strided_slice %39 {offsets = [0, 15], sizes = [128, 1], strides = [1, 1]} : vector<128x16xf32> to vector<128x1xf32>
      %91 = vector.broadcast %90 : vector<128x1xf32> to vector<128x32xf32>
      %92 = arith.mulf %91, %38 : vector<128x32xf32>
      %93 = tpu.concatenate %71, %74, %77, %80, %83, %86, %89, %92 in 1 : vector<128x32xf32>, vector<128x32xf32>, vector<128x32xf32>, vector<128x32xf32>, vector<128x32xf32>, vector<128x32xf32>, vector<128x32xf32>, vector<128x32xf32> -> vector<128x256xf32>
      %94 = arith.truncf %93 : vector<128x256xf32> to vector<128x256xbf16>
      %c1 = arith.constant 1 : index
      %c0_25 = arith.constant 0 : index
      %c0_26 = arith.constant 0 : index
      %95 = vector.load %arg8[%c1, %c0_25, %c0_26] : memref<2x128x256xbf16, #tpu.memory_space<vmem>>, vector<1x128x256xbf16>
      %96 = vector.shape_cast %95 : vector<1x128x256xbf16> to vector<128x256xbf16>
      %97 = vector.shape_cast %94 : vector<128x256xbf16> to vector<1x128x256xbf16>
      tpu.vector_store %arg8[%c1, %c0_25, %c0_26], %97 {strides = array<i32>} : memref<2x128x256xbf16, #tpu.memory_space<vmem>>, vector<1x128x256xbf16>,
      %cst_27 = arith.constant 0.000000e+00 : f32
      %98 = vector.broadcast %cst_27 : f32 to vector<128x256xf32>
      %c0_28 = arith.constant 0 : index
      %c0_29 = arith.constant 0 : index
      %99 = vector.load %arg9[%c0_28, %c0_29] : memref<128x256xf32, #tpu.memory_space<vmem>>, vector<128x256xf32>
      tpu.vector_store %arg9[%c0_28, %c0_29], %98 {strides = array<i32>} : memref<128x256xf32, #tpu.memory_space<vmem>>, vector<128x256xf32>,
    } else {
    }
    %c0 = arith.constant 0 : index
    %c0_1 = arith.constant 0 : index
    %3 = vector.load %arg9[%c0, %c0_1] : memref<128x256xf32, #tpu.memory_space<vmem>>, vector<128x256xf32>
    %4 = arith.index_cast %arg0 : i32 to index
    %c0_2 = arith.constant 0 : index
    %c0_3 = arith.constant 0 : index
    %5 = vector.load %arg8[%4, %c0_2, %c0_3] : memref<2x128x256xbf16, #tpu.memory_space<vmem>>, vector<1x128x256xbf16>
    %6 = vector.shape_cast %5 : vector<1x128x256xbf16> to vector<128x256xbf16>
    %c0_4 = arith.constant 0 : index
    %c0_5 = arith.constant 0 : index
    %7 = vector.load %arg4[%c0_4, %c0_5] : memref<256x256xbf16, #tpu.memory_space<vmem>>, vector<256x256xbf16>
    %cst = arith.constant dense<0.000000e+00> : vector<128x256xf32>
    %8 = tpu.matmul %6, %7, %cst {dimension_numbers = #tpu.dot_dimension_numbers<[1], [0], [0], [1], [0, 0, 1, 1], [], []>} : vector<128x256xbf16>, vector<256x256xbf16>, vector<128x256xf32> -> vector<128x256xf32>
    %9 = arith.addf %3, %8 : vector<128x256xf32>
    %c0_6 = arith.constant 0 : index
    %c0_7 = arith.constant 0 : index
    %10 = vector.load %arg9[%c0_6, %c0_7] : memref<128x256xf32, #tpu.memory_space<vmem>>, vector<128x256xf32>
    tpu.vector_store %arg9[%c0_6, %c0_7], %9 {strides = array<i32>} : memref<128x256xf32, #tpu.memory_space<vmem>>, vector<128x256xf32>,
    %c1_i32 = arith.constant 1 : i32
    %11 = arith.cmpi eq, %arg0, %c1_i32 : i32
    %12 = arith.extui %11 : i1 to i32
    %c0_i32_8 = arith.constant 0 : i32
    %13 = arith.cmpi ne, %12, %c0_i32_8 : i32
    scf.if %13 {
      %c0_9 = arith.constant 0 : index
      %c0_10 = arith.constant 0 : index
      %14 = vector.load %arg3[%c0_9, %c0_10] : memref<128x8xf32, #tpu.memory_space<vmem>>, vector<128x8xf32>
      %c0_11 = arith.constant 0 : index
      %c0_12 = arith.constant 0 : index
      %15 = vector.load %arg9[%c0_11, %c0_12] : memref<128x256xf32, #tpu.memory_space<vmem>>, vector<128x256xf32>
      %cst_13 = arith.constant 0.000000e+00 : f32
      %16 = vector.broadcast %cst_13 : f32 to vector<128x32xf32>
      %17 = vector.extract_strided_slice %14 {offsets = [0, 0], sizes = [128, 1], strides = [1, 1]} : vector<128x8xf32> to vector<128x1xf32>
      %18 = vector.extract_strided_slice %15 {offsets = [0, 0], sizes = [128, 32], strides = [1, 1]} : vector<128x256xf32> to vector<128x32xf32>
      %19 = vector.broadcast %17 : vector<128x1xf32> to vector<128x32xf32>
      %20 = arith.mulf %19, %18 : vector<128x32xf32>
      %21 = arith.addf %16, %20 : vector<128x32xf32>
      %22 = vector.extract_strided_slice %14 {offsets = [0, 1], sizes = [128, 1], strides = [1, 1]} : vector<128x8xf32> to vector<128x1xf32>
      %23 = vector.extract_strided_slice %15 {offsets = [0, 32], sizes = [128, 32], strides = [1, 1]} : vector<128x256xf32> to vector<128x32xf32>
      %24 = vector.broadcast %22 : vector<128x1xf32> to vector<128x32xf32>
      %25 = arith.mulf %24, %23 : vector<128x32xf32>
      %26 = arith.addf %21, %25 : vector<128x32xf32>
      %27 = vector.extract_strided_slice %14 {offsets = [0, 2], sizes = [128, 1], strides = [1, 1]} : vector<128x8xf32> to vector<128x1xf32>
      %28 = vector.extract_strided_slice %15 {offsets = [0, 64], sizes = [128, 32], strides = [1, 1]} : vector<128x256xf32> to vector<128x32xf32>
      %29 = vector.broadcast %27 : vector<128x1xf32> to vector<128x32xf32>
      %30 = arith.mulf %29, %28 : vector<128x32xf32>
      %31 = arith.addf %26, %30 : vector<128x32xf32>
      %32 = vector.extract_strided_slice %14 {offsets = [0, 3], sizes = [128, 1], strides = [1, 1]} : vector<128x8xf32> to vector<128x1xf32>
      %33 = vector.extract_strided_slice %15 {offsets = [0, 96], sizes = [128, 32], strides = [1, 1]} : vector<128x256xf32> to vector<128x32xf32>
      %34 = vector.broadcast %32 : vector<128x1xf32> to vector<128x32xf32>
      %35 = arith.mulf %34, %33 : vector<128x32xf32>
      %36 = arith.addf %31, %35 : vector<128x32xf32>
      %37 = vector.extract_strided_slice %14 {offsets = [0, 4], sizes = [128, 1], strides = [1, 1]} : vector<128x8xf32> to vector<128x1xf32>
      %38 = vector.extract_strided_slice %15 {offsets = [0, 128], sizes = [128, 32], strides = [1, 1]} : vector<128x256xf32> to vector<128x32xf32>
      %39 = vector.broadcast %37 : vector<128x1xf32> to vector<128x32xf32>
      %40 = arith.mulf %39, %38 : vector<128x32xf32>
      %41 = arith.addf %36, %40 : vector<128x32xf32>
      %42 = vector.extract_strided_slice %14 {offsets = [0, 5], sizes = [128, 1], strides = [1, 1]} : vector<128x8xf32> to vector<128x1xf32>
      %43 = vector.extract_strided_slice %15 {offsets = [0, 160], sizes = [128, 32], strides = [1, 1]} : vector<128x256xf32> to vector<128x32xf32>
      %44 = vector.broadcast %42 : vector<128x1xf32> to vector<128x32xf32>
      %45 = arith.mulf %44, %43 : vector<128x32xf32>
      %46 = arith.addf %41, %45 : vector<128x32xf32>
      %47 = vector.extract_strided_slice %14 {offsets = [0, 6], sizes = [128, 1], strides = [1, 1]} : vector<128x8xf32> to vector<128x1xf32>
      %48 = vector.extract_strided_slice %15 {offsets = [0, 192], sizes = [128, 32], strides = [1, 1]} : vector<128x256xf32> to vector<128x32xf32>
      %49 = vector.broadcast %47 : vector<128x1xf32> to vector<128x32xf32>
      %50 = arith.mulf %49, %48 : vector<128x32xf32>
      %51 = arith.addf %46, %50 : vector<128x32xf32>
      %52 = vector.extract_strided_slice %14 {offsets = [0, 7], sizes = [128, 1], strides = [1, 1]} : vector<128x8xf32> to vector<128x1xf32>
      %53 = vector.extract_strided_slice %15 {offsets = [0, 224], sizes = [128, 32], strides = [1, 1]} : vector<128x256xf32> to vector<128x32xf32>
      %54 = vector.broadcast %52 : vector<128x1xf32> to vector<128x32xf32>
      %55 = arith.mulf %54, %53 : vector<128x32xf32>
      %56 = arith.addf %51, %55 : vector<128x32xf32>
      %57 = arith.truncf %56 : vector<128x32xf32> to vector<128x32xbf16>
      %c0_14 = arith.constant 0 : index
      %c0_15 = arith.constant 0 : index
      %58 = vector.load %arg7[%c0_14, %c0_15] : memref<128x32xbf16, #tpu.memory_space<vmem>>, vector<128x32xbf16>
      tpu.vector_store %arg7[%c0_14, %c0_15], %57 {strides = array<i32>} : memref<128x32xbf16, #tpu.memory_space<vmem>>, vector<128x32xbf16>,
    } else {
    }
    return
  }
  func.func @transform_0(%arg0: i32) -> (i32, i32) {
    %c0_i32 = arith.constant 0 : i32
    %c0_i32_0 = arith.constant 0 : i32
    %c0_i32_1 = arith.constant 0 : i32
    return %c0_i32, %c0_i32_0 : i32, i32
  }
  func.func @transform_1(%arg0: i32) -> (i32, i32) {
    %c0_i32 = arith.constant 0 : i32
    %c0_i32_0 = arith.constant 0 : i32
    %c0_i32_1 = arith.constant 0 : i32
    return %c0_i32, %c0_i32_0 : i32, i32
  }
  func.func @transform_2(%arg0: i32) -> (i32, i32) {
    %c0_i32 = arith.constant 0 : i32
    %c0_i32_0 = arith.constant 0 : i32
    %c0_i32_1 = arith.constant 0 : i32
    return %c0_i32, %c0_i32_0 : i32, i32
  }
  func.func @transform_3(%arg0: i32) -> (i32, i32) {
    %c0_i32 = arith.constant 0 : i32
    %c0_i32_0 = arith.constant 0 : i32
    return %arg0, %c0_i32 : i32, i32
  }
  func.func @transform_4(%arg0: i32) -> (i32, i32) {
    %c0_i32 = arith.constant 0 : i32
    %c0_i32_0 = arith.constant 0 : i32
    %c0_i32_1 = arith.constant 0 : i32
    return %c0_i32, %c0_i32_0 : i32, i32
  }
  func.func @transform_5(%arg0: i32) -> (i32, i32) {
    %c0_i32 = arith.constant 0 : i32
    %c0_i32_0 = arith.constant 0 : i32
    %c0_i32_1 = arith.constant 0 : i32
    return %c0_i32, %c0_i32_0 : i32, i32
  }
  func.func @transform_6(%arg0: i32) -> (i32, i32) {
    %c0_i32 = arith.constant 0 : i32
    %c0_i32_0 = arith.constant 0 : i32
    %c0_i32_1 = arith.constant 0 : i32
    return %c0_i32, %c0_i32_0 : i32, i32
  }
}

module attributes {stable_mosaic.version = 11 : i64} {
  func.func @tuckert_score_kernel(%arg0: i32, %arg1: memref<128x32xbf16, #tpu.memory_space<vmem>>, %arg2: memref<128x32xbf16, #tpu.memory_space<vmem>>, %arg3: memref<128x128xf32, #tpu.memory_space<vmem>>) attributes {dimension_semantics = [#tpu.dimension_semantics<parallel>], iteration_bounds = array<i64: 3>, scalar_prefetch = 0 : i64, scratch_operands = 0 : i64, tpu.core_type = #tpu.core_type<tc>, window_params = [{pipeline_mode = #tpu.pipeline_mode<synchronous>, transform_indices = @transform_0, window_bounds = array<i64: 128, 32>}, {transform_indices = @transform_1, window_bounds = array<i64: 128, 32>}, {transform_indices = @transform_2, window_bounds = array<i64: 128, 128>}]} {
    %c0 = arith.constant 0 : index
    %c0_0 = arith.constant 0 : index
    %0 = vector.load %arg1[%c0, %c0_0] : memref<128x32xbf16, #tpu.memory_space<vmem>>, vector<128x32xbf16>
    %c0_1 = arith.constant 0 : index
    %c0_2 = arith.constant 0 : index
    %1 = vector.load %arg2[%c0_1, %c0_2] : memref<128x32xbf16, #tpu.memory_space<vmem>>, vector<128x32xbf16>
    %cst = arith.constant dense<0.000000e+00> : vector<128x128xf32>
    %2 = tpu.matmul %0, %1, %cst {dimension_numbers = #tpu.dot_dimension_numbers<[1], [1], [0], [0], [0, 0, 1, 0], [], []>} : vector<128x32xbf16>, vector<128x32xbf16>, vector<128x128xf32> -> vector<128x128xf32>
    %3 = arith.negf %2 : vector<128x128xf32>
    %4 = math.exp %3 : vector<128x128xf32>
    %cst_3 = arith.constant 1.000000e+00 : f32
    %5 = vector.broadcast %cst_3 : f32 to vector<128x128xf32>
    %6 = arith.addf %5, %4 : vector<128x128xf32>
    %7 = arith.divf %5, %6 : vector<128x128xf32>
    %c0_4 = arith.constant 0 : index
    %c0_5 = arith.constant 0 : index
    %8 = vector.load %arg3[%c0_4, %c0_5] : memref<128x128xf32, #tpu.memory_space<vmem>>, vector<128x128xf32>
    tpu.vector_store %arg3[%c0_4, %c0_5], %7 {strides = array<i32>} : memref<128x128xf32, #tpu.memory_space<vmem>>, vector<128x128xf32>,
    return
  }
  func.func @transform_0(%arg0: i32) -> (i32, i32) {
    %c0_i32 = arith.constant 0 : i32
    %c0_i32_0 = arith.constant 0 : i32
    %c0_i32_1 = arith.constant 0 : i32
    return %c0_i32, %c0_i32_0 : i32, i32
  }
  func.func @transform_1(%arg0: i32) -> (i32, i32) {
    %c0_i32 = arith.constant 0 : i32
    %c0_i32_0 = arith.constant 0 : i32
    return %arg0, %c0_i32 : i32, i32
  }
  func.func @transform_2(%arg0: i32) -> (i32, i32) {
    %c0_i32 = arith.constant 0 : i32
    %c0_i32_0 = arith.constant 0 : i32
    return %c0_i32, %arg0 : i32, i32
  }
}

</mosaic_0001>

<bundles_post_ra>
// kernel: tuckert_forward.3
= control target key start
LH: loop header
LB: loop body
LE: loop exit
PB: predicated region body
PF: predicated region fallthrough
CT: control target
= control target key end

     0   :  { %s938_s9 = smov 0   ;;  %s940_s10 = smov 0   ;;  %s1088_s0 = inlined_call_operand.vmem [shape: bf16[128,32], index: 0, kind: input, shape index: {}]   ;;  %s1089_s1 = inlined_call_operand.vmem [shape: bf16[384,32], index: 1, kind: input, shape index: {}]   ;;  %s1090_s2 = inlined_call_operand.vmem [shape: f32[128,384], index: 2, kind: output, shape index: {}]  }
   0x1   :  { %s942_s11 = smov 0  }
   0x2 LB: > { %s951_s12 = sadd.s32 4294967295, %s921_s11   ;;  %s953_s13 = sadd.s32 1, %s921_s11   ;;  %s921_s11 = sphi %s942_s11, %s1094_s11   ;;  %s917_s10 = sphi %s940_s10, %s1093_s10   ;;  %s913_s9 = sphi %s938_s9, %s1092_s9  }
   0x3   : > { %s63_s14 = ssub.s32 %s921_s11, %s953_s13  ;;  %s66_s15 = sadd.s32 1, %s917_s10 }
   0x4   : > { %p64_p0 = scmp.eq.s32.totalorder %s63_s14, 0  ;;  %p76_p1 = scmp.ne.s32.totalorder %s917_s10, %s913_s9 }
   0x5   : > { %p77_p2 = scmp.eq.s32.totalorder %s951_s12, 2  ;;  %p667_p3 = scmp.ge.s32.totalorder %s921_s11, 1 }
   0x6   : > { %s961_s16 = scalar_select %p64_p0, %s917_s10, %s66_s15  }
   0x7   : > { %p963_p4 = por %p77_p2, %p76_p1  ;;  %p113_p5 = scmp.lt.s32.totalorder %s921_s11, 4 }
   0x9   : > { %p114_p6 = pnand %p667_p3, %p113_p5 }
   0xa   : > { %s669_s18 = sshll.u32 (!%p114_p6), %s951_s12, 4  ;;  %s131_s15 = sand.u32 (!%p114_p6), 1, %s913_s9  }
   0xb   : > { %117 = sbr.rel (%p114_p6) target bundleno = 333 (0x14d), region = 28  ;;  %p135_p7 = scmp.lt.s32.totalorder (!%p114_p6), %s669_s18, 47 }
  0x10   : > { %v827_v0 = vld [vmem:[%s1088_s0] sm:$0xff]   ;;  %vm253_vm0 = vcmask 261120   ;;  %s1096_s18 = smov (!%p135_p7, %s669_s18), 47  ;;  %v829_v18 = vld [vmem:[%s1088_s0 + $0x8] sm:$0xff]   ;;  %v831_v20 = vld [vmem:[%s1088_s0 + $0x10] sm:$0xff]   ;;  %s712_s19 = sshll.u32 (%p963_p4), %s951_s12, 3 }
  0x11   : > { %v828_v1 = vld [vmem:[%s1088_s0 + $0x20] sm:$0xff]   ;;  %747 = vmatprep.mubr.msk.bf16.mxu0 %vm253_vm0, %v827_v0  ;;  %s670_s23 = sshll.u32 %s1096_s18, 2  ;;  %v830_v19 = vld [vmem:[%s1088_s0 + $0x28] sm:$0xff]   ;;  %v832_v21 = vld [vmem:[%s1088_s0 + $0x30] sm:$0xff]   ;;  %s668_s18 = sshll.u32 %s131_s15, 7 }
  0x12   : > { %755 = vmatprep.mubr.msk.bf16.mxu1 %vm253_vm0, %v828_v1  ;;  %s979_s26 = scalar_lea.vmem %s1089_s1, %s670_s23  ;;  %v833_v22 = vld [vmem:[%s1088_s0 + $0x18] sm:$0xff]   ;;  %s1038_s9 = scalar_lea.vmem [#allocation2], %s668_s18 }
  0x13   : > { %v819_v2 = vld [vmem:[%s979_s26 + $0x38] sm:$0xff]   ;;  %v820_v3 = vld [vmem:[%s979_s26 + $0x30] sm:$0xff]   ;;  %v821_v6 = vld [vmem:[%s979_s26 + $0x28] sm:$0xff]   ;;  %s519_s22 = scalar_lea.vmem (%p963_p4), %s1090_s2, %s712_s19 }
  0x14   : > { %779 = vmatprep.subr.msk.bf16.mxu0 %vm253_vm0, %v819_v2  ;;  %780 = vmatprep.subr.msk.bf16.mxu1 %vm253_vm0, %v819_v2  ;;  %v300_v4 = vsel %vm253_vm0, %v819_v2, 0  ;;  %v297_v5 = vsel %vm253_vm0, %v820_v3, 0  ;;  %v294_v7 = vsel %vm253_vm0, %v821_v6, 0  ;;  %v822_v8 = vld [vmem:[%s979_s26 + $0x20] sm:$0xff]   ;;  %v823_v10 = vld [vmem:[%s979_s26 + $0x18] sm:$0xff]   ;;  %v824_v12 = vld [vmem:[%s979_s26 + $0x10] sm:$0xff]  }
  0x15   : > { %732 = vmatpush3.bf16.xpose.msra.mxu0 %v300_v4  ;;  %771 = vmatpush3.bf16.xpose.msra.mxu1 %v300_v4  ;;  %v291_v9 = vsel %vm253_vm0, %v822_v8, 0  ;;  %v288_v11 = vsel %vm253_vm0, %v823_v10, 0  ;;  %v285_v13 = vsel %vm253_vm0, %v824_v12, 0  ;;  %v825_v14 = vld [vmem:[%s979_s26 + $0x8] sm:$0xff]   ;;  %v826_v16 = vld [vmem:[%s979_s26] sm:$0xff]   ;;  %v834_v23 = vld [vmem:[%s1088_s0 + $0x38] sm:$0xff]  }
  0x16   : > { %781 = vmatprep.subr.msk.bf16.mxu0 %vm253_vm0, %v820_v3  ;;  %782 = vmatprep.subr.msk.bf16.mxu1 %vm253_vm0, %v820_v3  ;;  %v282_v15 = vsel %vm253_vm0, %v825_v14, 0  ;;  %v279_v17 = vsel %vm253_vm0, %v826_v16, 0 }
  0x1d   : > { %734 = vmatpush3.bf16.xpose.msra.mxu0 %v297_v5  ;;  %772 = vmatpush3.bf16.xpose.msra.mxu1 %v297_v5 }
  0x1e   : > { %783 = vmatprep.subr.msk.bf16.mxu0 %vm253_vm0, %v821_v6  ;;  %784 = vmatprep.subr.msk.bf16.mxu1 %vm253_vm0, %v821_v6 }
  0x25   : > { %736 = vmatpush3.bf16.xpose.msra.mxu0 %v294_v7  ;;  %773 = vmatpush3.bf16.xpose.msra.mxu1 %v294_v7 }
  0x26   : > { %785 = vmatprep.subr.msk.bf16.mxu0 %vm253_vm0, %v822_v8  ;;  %786 = vmatprep.subr.msk.bf16.mxu1 %vm253_vm0, %v822_v8 }
  0x2d   : > { %738 = vmatpush3.bf16.xpose.msra.mxu0 %v291_v9  ;;  %774 = vmatpush3.bf16.xpose.msra.mxu1 %v291_v9 }
  0x2e   : > { %787 = vmatprep.subr.msk.bf16.mxu0 %vm253_vm0, %v823_v10  ;;  %788 = vmatprep.subr.msk.bf16.mxu1 %vm253_vm0, %v823_v10 }
  0x35   : > { %740 = vmatpush3.bf16.xpose.msra.mxu0 %v288_v11  ;;  %775 = vmatpush3.bf16.xpose.msra.mxu1 %v288_v11 }
  0x36   : > { %789 = vmatprep.subr.msk.bf16.mxu0 %vm253_vm0, %v824_v12  ;;  %790 = vmatprep.subr.msk.bf16.mxu1 %vm253_vm0, %v824_v12 }
  0x3d   : > { %742 = vmatpush3.bf16.xpose.msra.mxu0 %v285_v13  ;;  %776 = vmatpush3.bf16.xpose.msra.mxu1 %v285_v13 }
  0x3e   : > { %791 = vmatprep.subr.msk.bf16.mxu0 %vm253_vm0, %v825_v14  ;;  %792 = vmatprep.subr.msk.bf16.mxu1 %vm253_vm0, %v825_v14 }
  0x45   : > { %744 = vmatpush3.bf16.xpose.msra.mxu0 %v282_v15  ;;  %777 = vmatpush3.bf16.xpose.msra.mxu1 %v282_v15 }
  0x46   : > { %793 = vmatprep.subr.msk.bf16.mxu0 %vm253_vm0, %v826_v16  ;;  %794 = vmatprep.subr.msk.bf16.mxu1 %vm253_vm0, %v826_v16 }
  0x4d   : > { %746 = vmatpush3.bf16.xpose.msra.mxu0 %v279_v17  ;;  %778 = vmatpush3.bf16.xpose.msra.mxu1 %v279_v17 }
  0x54   : > { %748 = vmatmul.mubr.msk.bf16.vlgmr.msra.gmra.mxu0 %vm253_vm0, %v829_v18  ;;  %756 = vmatmul.mubr.msk.bf16.vlgmr.msra.gmra.mxu1 %vm253_vm0, %v830_v19 }
  0x55   : > { %751 = vmatprep.mubr.msk.bf16.mxu0 %vm253_vm0, %v831_v20  ;;  %759 = vmatprep.mubr.msk.bf16.mxu1 %vm253_vm0, %v832_v21 }
  0x5c   : > { %752 = vmatmul.mubr.msk.bf16.gmra.mxu0 %vm253_vm0, %v833_v22  ;;  %760 = vmatmul.mubr.msk.bf16.gmra.mxu1 %vm253_vm0, %v834_v23 }
 0x114   : > { %v749_v24 = vpop.f32.mrf.mxu0  ;;  %v757_v25 = vpop.f32.mrf.mxu1 }
 0x115   : > { %v697_v26 = vmul.f32 -1.442695, %v749_v24  ;;  %v705_v27 = vmul.f32 -1.442695, %v757_v25 }
 0x116   : > { %v336_v28 = vpop.f32.mrf.mxu0  ;;  %v368_v29 = vpop.f32.mrf.mxu1 }
 0x117   : > { %835 = vpow2.f32 %v697_v26  ;;  %v695_v30 = vmul.f32 -1.442695, %v336_v28  ;;  %v703_v31 = vmul.f32 -1.442695, %v368_v29 }
 0x118   : > { %837 = vpow2.f32 %v705_v27  ;;  %v750_v32 = vpop.f32.mrf.mxu0  ;;  %v758_v33 = vpop.f32.mrf.mxu1 }
 0x119   : > { %839 = vpow2.f32 %v695_v30  ;;  %v698_v34 = vmul.f32 -1.442695, %v750_v32  ;;  %v706_v35 = vmul.f32 -1.442695, %v758_v33 }
 0x11a   : > { %841 = vpow2.f32 %v703_v31  ;;  %v339_v36 = vpop.f32.mrf.mxu0  ;;  %v371_v37 = vpop.f32.mrf.mxu1 }
 0x11b   : > { %843 = vpow2.f32 %v698_v34  ;;  %v696_v38 = vmul.f32 -1.442695, %v339_v36  ;;  %v704_v39 = vmul.f32 -1.442695, %v371_v37 }
 0x11c   : > { %845 = vpow2.f32 %v706_v35  ;;  %v753_v40 = vpop.f32.mrf.mxu0  ;;  %v761_v41 = vpop.f32.mrf.mxu1 }
 0x11d   : > { %847 = vpow2.f32 %v696_v38  ;;  %v701_v42 = vmul.f32 -1.442695, %v753_v40  ;;  %v709_v43 = vmul.f32 -1.442695, %v761_v41 }
 0x11e   : > { %849 = vpow2.f32 %v704_v39  ;;  %v352_v44 = vpop.f32.mrf.mxu0  ;;  %v384_v45 = vpop.f32.mrf.mxu1 }
 0x11f   : > { %851 = vpow2.f32 %v701_v42  ;;  %v699_v46 = vmul.f32 -1.442695, %v352_v44  ;;  %v707_v47 = vmul.f32 -1.442695, %v384_v45 }
 0x120   : > { %853 = vpow2.f32 %v709_v43  ;;  %v754_v48 = vpop.f32.mrf.mxu0  ;;  %v762_v49 = vpop.f32.mrf.mxu1 }
 0x121   : > { %855 = vpow2.f32 %v699_v46  ;;  %v702_v50 = vmul.f32 -1.442695, %v754_v48  ;;  %v710_v51 = vmul.f32 -1.442695, %v762_v49 }
 0x122   : > { %857 = vpow2.f32 %v707_v47  ;;  %v355_v52 = vpop.f32.mrf.mxu0  ;;  %v387_v53 = vpop.f32.mrf.mxu1 }
 0x123   : > { %859 = vpow2.f32 %v702_v50  ;;  %v700_v54 = vmul.f32 -1.442695, %v355_v52  ;;  %v708_v55 = vmul.f32 -1.442695, %v387_v53 }
 0x124   : > { %v836_v56 = vpop.eup %835  ;;  %861 = vpow2.f32 %v710_v51 }
 0x125   : > { %v838_v57 = vpop.eup %837  ;;  %v449_v58 = vadd.f32 1.0, %v836_v56  ;;  %863 = vpow2.f32 %v700_v54 }
 0x126   : > { %v840_v59 = vpop.eup %839  ;;  %v457_v60 = vadd.f32 1.0, %v838_v57  ;;  %865 = vpow2.f32 %v708_v55 }
 0x127   : > { %v842_v61 = vpop.eup %841  ;;  %867 = vrcp.f32 %v449_v58  ;;  %v447_v62 = vadd.f32 1.0, %v840_v59 }
 0x128   : > { %v844_v63 = vpop.eup %843  ;;  %869 = vrcp.f32 %v457_v60  ;;  %v455_v0 = vadd.f32 1.0, %v842_v61 }
 0x129   : > { %v846_v1 = vpop.eup %845  ;;  %871 = vrcp.f32 %v447_v62  ;;  %v450_v2 = vadd.f32 1.0, %v844_v63 }
 0x12a   : > { %v848_v3 = vpop.eup %847  ;;  %873 = vrcp.f32 %v455_v0  ;;  %v458_v4 = vadd.f32 1.0, %v846_v1 }
 0x12b   : > { %v850_v5 = vpop.eup %849  ;;  %875 = vrcp.f32 %v450_v2  ;;  %v448_v6 = vadd.f32 1.0, %v848_v3 }
 0x12c   : > { %v852_v7 = vpop.eup %851  ;;  %877 = vrcp.f32 %v458_v4  ;;  %v456_v8 = vadd.f32 1.0, %v850_v5 }
 0x12d   : > { %v854_v9 = vpop.eup %853  ;;  %879 = vrcp.f32 %v448_v6  ;;  %v453_v10 = vadd.f32 1.0, %v852_v7 }
 0x12e   : > { %v856_v11 = vpop.eup %855  ;;  %881 = vrcp.f32 %v456_v8  ;;  %v461_v12 = vadd.f32 1.0, %v854_v9 }
 0x12f   : > { %v858_v13 = vpop.eup %857  ;;  %883 = vrcp.f32 %v453_v10  ;;  %v451_v14 = vadd.f32 1.0, %v856_v11 }
 0x130   : > { %v860_v15 = vpop.eup %859  ;;  %885 = vrcp.f32 %v461_v12  ;;  %v459_v16 = vadd.f32 1.0, %v858_v13 }
 0x131   : > { %v862_v17 = vpop.eup %861  ;;  %887 = vrcp.f32 %v451_v14  ;;  %v454_v18 = vadd.f32 1.0, %v860_v15 }
 0x132   : > { %v864_v19 = vpop.eup %863  ;;  %889 = vrcp.f32 %v459_v16  ;;  %v462_v20 = vadd.f32 1.0, %v862_v17 }
 0x133   : > { %v866_v21 = vpop.eup %865  ;;  %891 = vrcp.f32 %v454_v18  ;;  %v452_v22 = vadd.f32 1.0, %v864_v19 }
 0x134   : > { %v868_v23 = vpop.eup %867  ;;  %893 = vrcp.f32 %v462_v20  ;;  %v460_v24 = vadd.f32 1.0, %v866_v21 }
 0x135   : > { %v870_v25 = vpop.eup %869  ;;  %497 = vst [vmem:[%s1038_s9 + $0x10] sm:$0xff] %v868_v23  ;;  %895 = vrcp.f32 %v452_v22 }
 0x136   : > { %v872_v26 = vpop.eup %871  ;;  %505 = vst [vmem:[%s1038_s9 + $0x50] sm:$0xff] %v870_v25  ;;  %897 = vrcp.f32 %v460_v24 }
 0x137   : > { %v874_v27 = vpop.eup %873  ;;  %495 = vst [vmem:[%s1038_s9] sm:$0xff] %v872_v26 }
 0x138   : > { %v876_v28 = vpop.eup %875  ;;  %503 = vst [vmem:[%s1038_s9 + $0x40] sm:$0xff] %v874_v27 }
 0x139   : > { %v878_v29 = vpop.eup %877  ;;  %498 = vst [vmem:[%s1038_s9 + $0x18] sm:$0xff] %v876_v28 }
 0x13a   : > { %v880_v30 = vpop.eup %879  ;;  %506 = vst [vmem:[%s1038_s9 + $0x58] sm:$0xff] %v878_v29 }
 0x13b   : > { %v882_v31 = vpop.eup %881  ;;  %496 = vst [vmem:[%s1038_s9 + $0x8] sm:$0xff] %v880_v30 }
 0x13c   : > { %v884_v32 = vpop.eup %883  ;;  %504 = vst [vmem:[%s1038_s9 + $0x48] sm:$0xff] %v882_v31  ;;  %v582_v42 = vld [vmem:[%s1038_s9 + $0x10] sm:$0xff] (%p963_p4) }
 0x13d   : > { %v886_v33 = vpop.eup %885  ;;  %501 = vst [vmem:[%s1038_s9 + $0x30] sm:$0xff] %v884_v32  ;;  %583 = vst [vmem:[%s519_s22 + $0x30] sm:$0xff] (%p963_p4), %v582_v42  ;;  %v598_v50 = vld [vmem:[%s1038_s9 + $0x50] sm:$0xff] (%p963_p4) }
 0x13e   : > { %v888_v34 = vpop.eup %887  ;;  %509 = vst [vmem:[%s1038_s9 + $0x70] sm:$0xff] %v886_v33  ;;  %v578_v40 = vld [vmem:[%s1038_s9] sm:$0xff] (%p963_p4)  ;;  %599 = vst [vmem:[%s519_s22 + $0xf0] sm:$0xff] (%p963_p4), %v598_v50 }
 0x13f   : > { %v890_v35 = vpop.eup %889  ;;  %499 = vst [vmem:[%s1038_s9 + $0x20] sm:$0xff] %v888_v34  ;;  %579 = vst [vmem:[%s519_s22] sm:$0xff] (%p963_p4), %v578_v40  ;;  %v594_v48 = vld [vmem:[%s1038_s9 + $0x40] sm:$0xff] (%p963_p4) }
 0x140   : > { %v892_v36 = vpop.eup %891  ;;  %507 = vst [vmem:[%s1038_s9 + $0x60] sm:$0xff] %v890_v35  ;;  %517 = sbr.rel (!%p963_p4) target bundleno = 333 (0x14d), region = 32  ;;  %v584_v43 = vld [vmem:[%s1038_s9 + $0x18] sm:$0xff] (%p963_p4)  ;;  %595 = vst [vmem:[%s519_s22 + $0xc0] sm:$0xff] (%p963_p4), %v594_v48 }
 0x141   : > { %v894_v37 = vpop.eup %893  ;;  %502 = vst [vmem:[%s1038_s9 + $0x38] sm:$0xff] %v892_v36  ;;  %585 = vst [vmem:[%s519_s22 + $0x48] sm:$0xff] (%p963_p4), %v584_v43  ;;  %v600_v51 = vld [vmem:[%s1038_s9 + $0x58] sm:$0xff] (%p963_p4) }
 0x142   : > { %v896_v38 = vpop.eup %895  ;;  %510 = vst [vmem:[%s1038_s9 + $0x78] sm:$0xff] %v894_v37  ;;  %v580_v41 = vld [vmem:[%s1038_s9 + $0x8] sm:$0xff] (%p963_p4)  ;;  %601 = vst [vmem:[%s519_s22 + $0x108] sm:$0xff] (%p963_p4), %v600_v51 }
 0x143   : > { %v898_v39 = vpop.eup %897  ;;  %500 = vst [vmem:[%s1038_s9 + $0x28] sm:$0xff] %v896_v38  ;;  %581 = vst [vmem:[%s519_s22 + $0x18] sm:$0xff] (%p963_p4), %v580_v41  ;;  %v596_v49 = vld [vmem:[%s1038_s9 + $0x48] sm:$0xff] (%p963_p4) }
 0x144   : > { %508 = vst [vmem:[%s1038_s9 + $0x68] sm:$0xff] %v898_v39  ;;  %v590_v46 = vld [vmem:[%s1038_s9 + $0x30] sm:$0xff] (%p963_p4)  ;;  %597 = vst [vmem:[%s519_s22 + $0xd8] sm:$0xff] (%p963_p4), %v596_v49 }
 0x145   : > { %591 = vst [vmem:[%s519_s22 + $0x90] sm:$0xff] %v590_v46  ;;  %v606_v54 = vld [vmem:[%s1038_s9 + $0x70] sm:$0xff] }
 0x146   : > { %v586_v44 = vld [vmem:[%s1038_s9 + $0x20] sm:$0xff]  ;;  %607 = vst [vmem:[%s519_s22 + $0x150] sm:$0xff] %v606_v54 }
 0x147   : > { %587 = vst [vmem:[%s519_s22 + $0x60] sm:$0xff] %v586_v44  ;;  %v602_v52 = vld [vmem:[%s1038_s9 + $0x60] sm:$0xff] }
 0x148   : > { %v592_v47 = vld [vmem:[%s1038_s9 + $0x38] sm:$0xff]  ;;  %603 = vst [vmem:[%s519_s22 + $0x120] sm:$0xff] %v602_v52 }
 0x149   : > { %593 = vst [vmem:[%s519_s22 + $0xa8] sm:$0xff] %v592_v47  ;;  %v608_v55 = vld [vmem:[%s1038_s9 + $0x78] sm:$0xff] }
 0x14a   : > { %v588_v45 = vld [vmem:[%s1038_s9 + $0x28] sm:$0xff]  ;;  %609 = vst [vmem:[%s519_s22 + $0x168] sm:$0xff] %v608_v55 }
 0x14b   : > { %589 = vst [vmem:[%s519_s22 + $0x78] sm:$0xff] %v588_v45  ;;  %v604_v53 = vld [vmem:[%s1038_s9 + $0x68] sm:$0xff] }
 0x14c   : > { %605 = vst [vmem:[%s519_s22 + $0x138] sm:$0xff] %v604_v53 }
 0x14d PF: > { %p9_p8 = scmp.ge.s32.totalorder %s953_s13, 5   ;;  %s1092_s9 = smov %s917_s10 }
 0x14e   : > { %s1093_s10 = smov %s961_s16  ;;  %s1094_s11 = smov %s953_s13 }
 0x14f   :  { %11 = sbr.rel (!%p9_p8) target bundleno = 2 (0x2), region = 96 }

// kernel: tuckert_forward.2
= control target key start
LH: loop header
LB: loop body
LE: loop exit
PB: predicated region body
PF: predicated region fallthrough
CT: control target
= control target key end

     0   :  { %s5738_s21 = smov 0   ;;  %s9014_s0 = inlined_call_operand.vmem [shape: f32[128,32], index: 0, kind: input, shape index: {}]   ;;  %s9015_s1 = inlined_call_operand.vmem [shape: f32[128,16], index: 1, kind: input, shape index: {}]   ;;  %s9016_s2 = inlined_call_operand.vmem [shape: f32[128,8], index: 2, kind: input, shape index: {}]   ;;  %s9017_s3 = inlined_call_operand.vmem [shape: bf16[512,256], index: 3, kind: input, shape index: {}]   ;;  %s9018_s4 = inlined_call_operand.vmem [shape: f32[1,32], index: 4, kind: input, shape index: {}]   ;;  %s9019_s5 = inlined_call_operand.vmem [shape: f32[1,32], index: 5, kind: input, shape index: {}]   ;;  %s9020_s6 = inlined_call_operand.vmem [shape: bf16[128,32], index: 6, kind: output, shape index: {}]  }
   0x1 LB: > { %s5744_s22 = sadd.s32 4294967295, %s5670_s21   ;;  %p4801_p0 = scmp.ge.s32.totalorder %s5670_s21, 1  ;;  %s5670_s21 = sphi %s5738_s21, %s16_s21  }
   0x2   : > { %p209_p1 = scmp.lt.s32.totalorder %s5670_s21, 3 }
   0x4   : > { %p210_p2 = pnand %p4801_p0, %p209_p1 }
   0x5   : > { %s4802_s23 = sshll.u32 (!%p210_p2), %s5744_s22, 5  ;;  %p4805_p4 = scmp.ne.s32.totalorder (!%p210_p2), %s5744_s22, 0 }
   0x6   : > { %213 = sbr.rel (%p210_p2) target bundleno = 2219 (0x8ab), region = 44  ;;  %p236_p3 = scmp.lt.s32.totalorder (!%p210_p2), %s4802_s23, 63 }
   0xb   : > { %s9482_s23 = smov (!%p236_p3, %s4802_s23), 63  ;;  %245 = sbr.rel (%p4805_p4) target bundleno = 941 (0x3ad), region = 48 }
   0xc   : > { %s4909_s24 = sshll.u32 %s9482_s23, 3 }
   0xd   : > { %s5752_s27 = scalar_lea.vmem %s9017_s3, %s4909_s24 }
  0x10   : > { %v5758_v0 = vld [vmem:[%s9015_s1 + $0x10] sm:$0xff]  ;;  %v5763_v1 = vld [vmem:[%s9015_s1] sm:$0xff]  ;;  %v5672_v2 = vmov 0   ;;  %v5770_v3 = vld [vmem:[%s9015_s1 + $0x18] sm:$0xff]  ;;  %vm262_vm0 = vcmask 261120   ;;  %v5673_v25 = vmov 1  }
  0x11   : > { %5031 = vset.pattern.permute.xlu1 %v5672_v2  ;;  %5030 = vset.pattern.permute.xlu0 %v5672_v2  ;;  %v5775_v4 = vld [vmem:[%s9015_s1 + $0x8] sm:$0xff]  ;;  %v5787_v6 = vld [vmem:[%s9015_s1 + $0x20] sm:$0xff]  ;;  %v5794_v7 = vld [vmem:[%s9015_s1 + $0x38] sm:$0xff]  ;;  %v5674_v51 = vmov 2   ;;  %s5680_s9 = smov 32   ;;  %s5681_s10 = smov 64  }
  0x12   : > { %464 = vperm.xlu1 %5031, %v5758_v0   ;;  %454 = vperm.xlu0 %5030, %v5763_v1   ;;  %v5782_v5 = vld [vmem:[%s9015_s1 + $0x28] sm:$0xff]  ;;  %v5799_v8 = vld [vmem:[%s9015_s1 + $0x30] sm:$0xff]  ;;  %v5811_v10 = vld [vmem:[%s9015_s1 + $0x40] sm:$0xff]  ;;  %s5683_s11 = smov 96   ;;  %vm1508_vm1 = vcmask 523264   ;;  %vm1525_vm2 = vcmask 785408  }
  0x13   : > { %v5806_v9 = vld [vmem:[%s9015_s1 + $0x48] sm:$0xff]  ;;  %v5818_v11 = vld [vmem:[%s9015_s1 + $0x58] sm:$0xff]  ;;  %v5823_v12 = vld [vmem:[%s9015_s1 + $0x50] sm:$0xff] }
  0x14   : > { %v5830_v13 = vld [vmem:[%s9015_s1 + $0x68] sm:$0xff]  ;;  %v5835_v14 = vld [vmem:[%s9015_s1 + $0x60] sm:$0xff]  ;;  %v5852_v17 = vld [vmem:[%s9015_s1 + $0x78] sm:$0xff] }
  0x15   : > { %v5840_v15 = vld [vmem:[%s9014_s0] sm:$0xff]  ;;  %v5845_v16 = vld [vmem:[%s9014_s0 + $0x8] sm:$0xff]  ;;  %v5857_v18 = vld [vmem:[%s9015_s1 + $0x70] sm:$0xff] }
  0x16   : > { %469 = vperm.xlu1 %5031, %v5770_v3   ;;  %459 = vperm.xlu0 %5030, %v5775_v4   ;;  %v263_v19 = vsel %vm262_vm0, %v5840_v15, 0.0  ;;  %v264_v20 = vsel %vm262_vm0, %v5845_v16, 0.0  ;;  %v5866_v21 = vld [vmem:[%s9014_s0 + $0x10] sm:$0xff]  ;;  %v5875_v24 = vld [vmem:[%s9014_s0 + $0x18] sm:$0xff]  ;;  %v5884_v28 = vld [vmem:[%s9014_s0 + $0x20] sm:$0xff] }
  0x17   : > { %v265_v22 = vadd.f32 %v264_v20, %v263_v19  ;;  %v266_v23 = vsel %vm262_vm0, %v5866_v21, 0.0  ;;  %v268_v27 = vsel %vm262_vm0, %v5875_v24, 0.0  ;;  %v270_v30 = vsel %vm262_vm0, %v5884_v28, 0.0  ;;  %v5893_v31 = vld [vmem:[%s9014_s0 + $0x28] sm:$0xff]  ;;  %v5902_v34 = vld [vmem:[%s9014_s0 + $0x30] sm:$0xff]  ;;  %v5911_v37 = vld [vmem:[%s9014_s0 + $0x38] sm:$0xff] }
  0x18   : > { %v272_v33 = vsel %vm262_vm0, %v5893_v31, 0.0  ;;  %v274_v36 = vsel %vm262_vm0, %v5902_v34, 0.0  ;;  %v276_v39 = vsel %vm262_vm0, %v5911_v37, 0.0  ;;  %v5920_v40 = vld [vmem:[%s9014_s0 + $0x40] sm:$0xff]  ;;  %v5929_v43 = vld [vmem:[%s9014_s0 + $0x48] sm:$0xff]  ;;  %v5938_v46 = vld [vmem:[%s9014_s0 + $0x50] sm:$0xff] }
  0x19   : > { %v267_v26 = vadd.f32 %v266_v23, %v265_v22  ;;  %v278_v42 = vsel %vm262_vm0, %v5920_v40, 0.0  ;;  %v280_v45 = vsel %vm262_vm0, %v5929_v43, 0.0  ;;  %v282_v48 = vsel %vm262_vm0, %v5938_v46, 0.0  ;;  %v5947_v49 = vld [vmem:[%s9014_s0 + $0x58] sm:$0xff]  ;;  %v5956_v53 = vld [vmem:[%s9014_s0 + $0x60] sm:$0xff]  ;;  %v5965_v56 = vld [vmem:[%s9014_s0 + $0x68] sm:$0xff] }
  0x1a   : > { %479 = vperm.xlu1 %5031, %v5782_v5   ;;  %474 = vperm.xlu0 %5030, %v5787_v6   ;;  %v284_v52 = vsel %vm262_vm0, %v5947_v49, 0.0  ;;  %v286_v55 = vsel %vm262_vm0, %v5956_v53, 0.0  ;;  %v288_v58 = vsel %vm262_vm0, %v5965_v56, 0.0  ;;  %v5974_v59 = vld [vmem:[%s9014_s0 + $0x70] sm:$0xff]  ;;  %v5983_v62 = vld [vmem:[%s9014_s0 + $0x78] sm:$0xff]  ;;  %v5675_v23 = vmov 3  }
  0x1b   : > { %v269_v29 = vadd.f32 %v268_v27, %v267_v26  ;;  %v290_v61 = vsel %vm262_vm0, %v5974_v59, 0.0  ;;  %v292_v2 = vsel %vm262_vm0, %v5983_v62, 0.0 }
  0x1d   : > { %v271_v32 = vadd.f32 %v270_v30, %v269_v29 }
  0x1e   : > { %489 = vperm.xlu1 %5031, %v5794_v7   ;;  %484 = vperm.xlu0 %5030, %v5799_v8  }
  0x1f   : > { %v273_v35 = vadd.f32 %v272_v33, %v271_v32 }
  0x21   : > { %v275_v38 = vadd.f32 %v274_v36, %v273_v35 }
  0x22   : > { %499 = vperm.xlu1 %5031, %v5806_v9   ;;  %494 = vperm.xlu0 %5030, %v5811_v10  }
  0x23   : > { %v277_v41 = vadd.f32 %v276_v39, %v275_v38 }
  0x25   : > { %v279_v44 = vadd.f32 %v278_v42, %v277_v41 }
  0x26   : > { %509 = vperm.xlu1 %5031, %v5818_v11   ;;  %504 = vperm.xlu0 %5030, %v5823_v12  }
  0x27   : > { %v281_v47 = vadd.f32 %v280_v45, %v279_v44 }
  0x29   : > { %v283_v50 = vadd.f32 %v282_v48, %v281_v47  ;;  %v5676_v47 = vmov 4  }
  0x2a   : > { %519 = vperm.xlu1 %5031, %v5830_v13   ;;  %514 = vperm.xlu0 %5030, %v5835_v14  }
  0x2b   : > { %v285_v54 = vadd.f32 %v284_v52, %v283_v50 }
  0x2d   : > { %v287_v57 = vadd.f32 %v286_v55, %v285_v54 }
  0x2e   : > { %529 = vperm.xlu1 %5031, %v5852_v17   ;;  %524 = vperm.xlu0 %5030, %v5857_v18  }
  0x2f   : > { %v289_v60 = vadd.f32 %v288_v58, %v287_v57 }
  0x31   : > { %v291_v63 = vadd.f32 %v290_v61, %v289_v60 }
  0x32   : > { %5033 = vset.pattern.permute.xlu1 %v5673_v25  ;;  %5032 = vset.pattern.permute.xlu0 %v5673_v25 }
  0x33   : > { %553 = vperm.xlu1 %5033, %v5775_v4   ;;  %549 = vperm.xlu0 %5032, %v5763_v1   ;;  %v293_v19 = vadd.f32 %v292_v2, %v291_v63 }
  0x35   : > { %v294_v20 = vrot.slane %v293_v19, 4 }
  0x37   : > { %557 = vperm.xlu1 %5033, %v5758_v0   ;;  %561 = vperm.xlu0 %5032, %v5770_v3   ;;  %v295_v22 = vadd.f32 %v294_v20, %v293_v19 }
  0x39   : > { %v296_v25 = vrot.slane %v295_v22, 2 }
  0x3b   : > { %565 = vperm.xlu1 %5033, %v5787_v6   ;;  %569 = vperm.xlu0 %5032, %v5782_v5   ;;  %v297_v26 = vadd.f32 %v296_v25, %v295_v22 }
  0x3d   : > { %v298_v27 = vrot.slane %v297_v26, 1 }
  0x3f   : > { %573 = vperm.xlu1 %5033, %v5799_v8   ;;  %577 = vperm.xlu0 %5032, %v5794_v7   ;;  %v299_v29 = vadd.f32 %v298_v27, %v297_v26 }
  0x41   : > { %v6003_v30 = vmul.f32 0.0078125, %v299_v29 }
  0x43   : > { %581 = vperm.xlu1 %5033, %v5811_v10   ;;  %585 = vperm.xlu0 %5032, %v5806_v9   ;;  %v6009_v32 = vsub.f32 %v5840_v15, %v6003_v30  ;;  %v6013_v33 = vsub.f32 %v5845_v16, %v6003_v30  ;;  %v6019_v35 = vsub.f32 %v5866_v21, %v6003_v30 }
  0x44   : > { %v6033_v39 = vsub.f32 %v5875_v24, %v6003_v30  ;;  %v6046_v24 = vsub.f32 %v5884_v28, %v6003_v30  ;;  %v6059_v57 = vsub.f32 %v5893_v31, %v6003_v30  ;;  %v6071_v2 = vsub.f32 %v5902_v34, %v6003_v30 }
  0x45   : > { %v318_v36 = vmul.f32 %v6009_v32, %v6009_v32  ;;  %v319_v38 = vmul.f32 %v6013_v33, %v6013_v33  ;;  %v320_v21 = vmul.f32 %v6019_v35, %v6019_v35  ;;  %v6084_v25 = vsub.f32 %v5911_v37, %v6003_v30 }
  0x46   : > { %v321_v50 = vmul.f32 %v6033_v39, %v6033_v39  ;;  %v322_v28 = vmul.f32 %v6046_v24, %v6046_v24  ;;  %v323_v31 = vmul.f32 %v6059_v57, %v6059_v57  ;;  %v324_v34 = vmul.f32 %v6071_v2, %v6071_v2 }
  0x47   : > { %589 = vperm.xlu1 %5033, %v5823_v12   ;;  %593 = vperm.xlu0 %5032, %v5818_v11   ;;  %v334_v41 = vsel %vm262_vm0, %v318_v36, 0.0  ;;  %v335_v42 = vsel %vm262_vm0, %v319_v38, 0.0  ;;  %v6097_v38 = vsub.f32 %v5920_v40, %v6003_v30  ;;  %v325_v37 = vmul.f32 %v6084_v25, %v6084_v25 }
  0x48   : > { %v336_v44 = vadd.f32 %v335_v42, %v334_v41  ;;  %v339_v58 = vsel %vm262_vm0, %v321_v50, 0.0  ;;  %v341_v19 = vsel %vm262_vm0, %v322_v28, 0.0  ;;  %v343_v26 = vsel %vm262_vm0, %v323_v31, 0.0 }
  0x49   : > { %v326_v40 = vmul.f32 %v6097_v38, %v6097_v38  ;;  %v347_v50 = vsel %vm262_vm0, %v325_v37, 0.0 }
  0x4b   : > { %597 = vperm.xlu1 %5033, %v5835_v14   ;;  %601 = vperm.xlu0 %5032, %v5830_v13  }
  0x4f   : > { %605 = vperm.xlu1 %5033, %v5857_v18   ;;  %609 = vperm.xlu0 %5032, %v5852_v17  }
  0x53   : > { %5034 = vset.pattern.permute.xlu1 %v5674_v51  ;;  %5035 = vset.pattern.permute.xlu0 %v5674_v51  ;;  %v337_v51 = vsel %vm262_vm0, %v320_v21, 0.0  ;;  %v345_v21 = vsel %vm262_vm0, %v324_v34, 0.0 }
  0x54   : > { %629 = vperm.xlu1 %5034, %v5763_v1   ;;  %633 = vperm.xlu0 %5035, %v5775_v4   ;;  %v338_v52 = vadd.f32 %v337_v51, %v336_v44 }
  0x56   : > { %v340_v60 = vadd.f32 %v339_v58, %v338_v52  ;;  %v6123_v58 = vsub.f32 %v5938_v46, %v6003_v30 }
  0x58   : > { %637 = vperm.xlu1 %5034, %v5758_v0   ;;  %645 = vperm.xlu0 %5035, %v5787_v6   ;;  %v342_v20 = vadd.f32 %v341_v19, %v340_v60  ;;  %v349_v60 = vsel %vm262_vm0, %v326_v40, 0.0  ;;  %v6132_v19 = vsub.f32 %v5947_v49, %v6003_v30  ;;  %v6145_v49 = vsub.f32 %v5956_v53, %v6003_v30 }
  0x5a   : > { %v344_v27 = vadd.f32 %v343_v26, %v342_v20  ;;  %v328_v20 = vmul.f32 %v6123_v58, %v6123_v58  ;;  %v5677_v26 = vmov 5   ;;  %v330_v53 = vmul.f32 %v6145_v49, %v6145_v49 }
  0x5c   : > { %641 = vperm.xlu1 %5034, %v5770_v3   ;;  %653 = vperm.xlu0 %5035, %v5799_v8   ;;  %v346_v41 = vadd.f32 %v345_v21, %v344_v27  ;;  %v329_v21 = vmul.f32 %v6132_v19, %v6132_v19 }
  0x5e   : > { %v348_v51 = vadd.f32 %v347_v50, %v346_v41  ;;  %v353_v41 = vsel %vm262_vm0, %v328_v20, 0.0 }
  0x60   : > { %649 = vperm.xlu1 %5034, %v5782_v5   ;;  %661 = vperm.xlu0 %5035, %v5811_v10   ;;  %v350_v31 = vadd.f32 %v349_v60, %v348_v51  ;;  %v355_v60 = vsel %vm262_vm0, %v329_v21, 0.0 }
  0x64   : > { %657 = vperm.xlu1 %5034, %v5794_v7   ;;  %669 = vperm.xlu0 %5035, %v5823_v12  }
  0x68   : > { %665 = vperm.xlu1 %5034, %v5806_v9   ;;  %677 = vperm.xlu0 %5035, %v5835_v14  }
  0x6c   : > { %673 = vperm.xlu1 %5034, %v5818_v11   ;;  %685 = vperm.xlu0 %5035, %v5857_v18  }
  0x70   : > { %681 = vperm.xlu1 %5034, %v5830_v13   ;;  %5036 = vset.pattern.permute.xlu0 %v5675_v23 }
  0x71   : > { %709 = vperm.xlu0 %5036, %v5763_v1  }
  0x74   : > { %689 = vperm.xlu1 %5034, %v5852_v17  }
  0x75   : > { %721 = vperm.xlu0 %5036, %v5770_v3  }
  0x78   : > { %5037 = vset.pattern.permute.xlu1 %v5675_v23 }
  0x79   : > { %713 = vperm.xlu1 %5037, %v5775_v4   ;;  %729 = vperm.xlu0 %5036, %v5782_v5  }
  0x7d   : > { %717 = vperm.xlu1 %5037, %v5758_v0   ;;  %737 = vperm.xlu0 %5036, %v5794_v7  }
  0x81   : > { %725 = vperm.xlu1 %5037, %v5787_v6   ;;  %745 = vperm.xlu0 %5036, %v5806_v9  }
  0x85   : > { %733 = vperm.xlu1 %5037, %v5799_v8   ;;  %753 = vperm.xlu0 %5036, %v5818_v11  }
  0x89   : > { %741 = vperm.xlu1 %5037, %v5811_v10   ;;  %761 = vperm.xlu0 %5036, %v5830_v13  }
  0x8d   : > { %v6025_v15 = vpop.permute.xlu1 %464  ;;  %749 = vperm.xlu1 %5037, %v5823_v12   ;;  %769 = vperm.xlu0 %5036, %v5852_v17   ;;  %v6029_v16 = vpop.permute.xlu0 %454 }
  0x8e   : > { %9105 = vst [vmem:[#allocation4_spill] sm:$0xff] %v6025_v15  ;;  %9106 = vst [vmem:[#allocation5_spill] sm:$0xff] %v6029_v16 }
  0x91   : > { %v6039_v45 = vpop.permute.xlu1 %469  ;;  %757 = vperm.xlu1 %5037, %v5835_v14   ;;  %5039 = vset.pattern.permute.xlu0 %v5676_v47  ;;  %v6042_v48 = vpop.permute.xlu0 %459 }
  0x92   : > { %9107 = vst [vmem:[#allocation6_spill] sm:$0xff] %v6039_v45  ;;  %9108 = vst [vmem:[#allocation7_spill] sm:$0xff] %v6042_v48  ;;  %793 = vperm.xlu0 %5039, %v5775_v4  }
  0x95   : > { %v6052_v54 = vpop.permute.xlu1 %479  ;;  %765 = vperm.xlu1 %5037, %v5857_v18   ;;  %v6055_v55 = vpop.permute.xlu0 %474 }
  0x96   : > { %9109 = vst [vmem:[#allocation8_spill] sm:$0xff] %v6052_v54  ;;  %9110 = vst [vmem:[#allocation9_spill] sm:$0xff] %v6055_v55  ;;  %805 = vperm.xlu0 %5039, %v5787_v6  }
  0x99   : > { %v6065_v61 = vpop.permute.xlu1 %489  ;;  %5038 = vset.pattern.permute.xlu1 %v5676_v47  ;;  %v6067_v63 = vpop.permute.xlu0 %484  ;;  %v6110_v47 = vsub.f32 %v5929_v43, %v6003_v30 }
  0x9a   : > { %9111 = vst [vmem:[#allocation10_spill] sm:$0xff] %v6065_v61  ;;  %9112 = vst [vmem:[#allocation11_spill] sm:$0xff] %v6067_v63  ;;  %789 = vperm.xlu1 %5038, %v5763_v1   ;;  %813 = vperm.xlu0 %5039, %v5799_v8  }
  0x9b   : > { %v327_v43 = vmul.f32 %v6110_v47, %v6110_v47 }
  0x9d   : > { %v6078_v22 = vpop.permute.xlu1 %499  ;;  %v6080_v23 = vpop.permute.xlu0 %494  ;;  %v351_v46 = vsel %vm262_vm0, %v327_v43, 0.0  ;;  %v6158_v43 = vsub.f32 %v5965_v56, %v6003_v30 }
  0x9e   : > { %9113 = vst [vmem:[#allocation12_spill] sm:$0xff] %v6078_v22  ;;  %9114 = vst [vmem:[#allocation13_spill] sm:$0xff] %v6080_v23  ;;  %797 = vperm.xlu1 %5038, %v5758_v0   ;;  %821 = vperm.xlu0 %5039, %v5811_v10   ;;  %v352_v37 = vadd.f32 %v351_v46, %v350_v31 }
  0x9f   : > { %v331_v56 = vmul.f32 %v6158_v43, %v6158_v43 }
  0xa0   : > { %v354_v51 = vadd.f32 %v353_v41, %v352_v37  ;;  %v6171_v37 = vsub.f32 %v5974_v59, %v6003_v30  ;;  %v357_v41 = vsel %vm262_vm0, %v330_v53, 0.0 }
  0xa1   : > { %v6091_v29 = vpop.permute.xlu1 %509  ;;  %v6093_v36 = vpop.permute.xlu0 %504 }
  0xa2   : > { %9115 = vst [vmem:[#allocation14_spill] sm:$0xff] %v6091_v29  ;;  %9116 = vst [vmem:[#allocation15_spill] sm:$0xff] %v6093_v36  ;;  %801 = vperm.xlu1 %5038, %v5770_v3   ;;  %829 = vperm.xlu0 %5039, %v5823_v12   ;;  %v356_v46 = vadd.f32 %v355_v60, %v354_v51  ;;  %v6184_v51 = vsub.f32 %v5983_v62, %v6003_v30  ;;  %v359_v60 = vsel %vm262_vm0, %v331_v56, 0.0 }
  0xa3   : > { %v332_v59 = vmul.f32 %v6171_v37, %v6171_v37 }
  0xa5   : > { %v6104_v42 = vpop.permute.xlu1 %519  ;;  %v6106_v44 = vpop.permute.xlu0 %514  ;;  %v361_v62 = vsel %vm262_vm0, %v332_v59, 0.0 }
  0xa6   : > { %9117 = vst [vmem:[#allocation16_spill] sm:$0xff] %v6104_v42  ;;  %9118 = vst [vmem:[#allocation17_spill] sm:$0xff] %v6106_v44  ;;  %809 = vperm.xlu1 %5038, %v5782_v5   ;;  %837 = vperm.xlu0 %5039, %v5835_v14  }
  0xa9   : > { %v6117_v52 = vpop.permute.xlu1 %529  ;;  %v6119_v28 = vpop.permute.xlu0 %524 }
  0xaa   : > { %9119 = vst [vmem:[#allocation18_spill] sm:$0xff] %v6117_v52  ;;  %9120 = vst [vmem:[#allocation19_spill] sm:$0xff] %v6119_v28  ;;  %817 = vperm.xlu1 %5038, %v5794_v7   ;;  %845 = vperm.xlu0 %5039, %v5857_v18   ;;  %v358_v52 = vadd.f32 %v357_v41, %v356_v46  ;;  %v333_v46 = vmul.f32 %v6184_v51, %v6184_v51 }
  0xac   : > { %v360_v42 = vadd.f32 %v359_v60, %v358_v52  ;;  %v363_v56 = vsel %vm262_vm0, %v333_v46, 0.0 }
  0xae   : > { %v6137_v34 = vpop.permute.xlu1 %553  ;;  %825 = vperm.xlu1 %5038, %v5806_v9   ;;  %5040 = vset.pattern.permute.xlu0 %v5677_v26  ;;  %v6140_v27 = vpop.permute.xlu0 %549 }
  0xaf   : > { %869 = vperm.xlu0 %5040, %v5763_v1  }
  0xb2   : > { %v6150_v40 = vpop.permute.xlu1 %557  ;;  %833 = vperm.xlu1 %5038, %v5818_v11   ;;  %v6153_v50 = vpop.permute.xlu0 %561 }
  0xb3   : > { %881 = vperm.xlu0 %5040, %v5770_v3  }
  0xb6   : > { %v6163_v31 = vpop.permute.xlu1 %565  ;;  %841 = vperm.xlu1 %5038, %v5830_v13   ;;  %v6166_v20 = vpop.permute.xlu0 %569 }
  0xb7   : > { %889 = vperm.xlu0 %5040, %v5782_v5  }
  0xba   : > { %v6176_v28 = vpop.permute.xlu1 %573  ;;  %849 = vperm.xlu1 %5038, %v5852_v17   ;;  %v6179_v21 = vpop.permute.xlu0 %577 }
  0xbb   : > { %897 = vperm.xlu0 %5040, %v5794_v7  }
  0xbe   : > { %v6189_v44 = vpop.permute.xlu1 %581  ;;  %5041 = vset.pattern.permute.xlu1 %v5677_v26  ;;  %v6191_v53 = vpop.permute.xlu0 %585  ;;  %v362_v26 = vadd.f32 %v361_v62, %v360_v42  ;;  %v5678_v62 = vmov 6  }
  0xbf   : > { %873 = vperm.xlu1 %5041, %v5775_v4   ;;  %905 = vperm.xlu0 %5040, %v5806_v9  }
  0xc0   : > { %v364_v52 = vadd.f32 %v363_v56, %v362_v26 }
  0xc2   : > { %v6198_v30 = vpop.permute.xlu1 %589  ;;  %v6200_v41 = vpop.permute.xlu0 %593  ;;  %v365_v42 = vrot.slane %v364_v52, 4 }
  0xc3   : > { %877 = vperm.xlu1 %5041, %v5758_v0   ;;  %913 = vperm.xlu0 %5040, %v5818_v11  }
  0xc4   : > { %v366_v26 = vadd.f32 %v365_v42, %v364_v52 }
  0xc6   : > { %v6205_v36 = vpop.permute.xlu1 %597  ;;  %v6207_v29 = vpop.permute.xlu0 %601  ;;  %v367_v63 = vrot.slane %v366_v26, 2 }
  0xc7   : > { %885 = vperm.xlu1 %5041, %v5787_v6   ;;  %921 = vperm.xlu0 %5040, %v5830_v13  }
  0xc8   : > { %v368_v54 = vadd.f32 %v367_v63, %v366_v26 }
  0xca   : > { %v6211_v59 = vpop.permute.xlu1 %605  ;;  %v6213_v60 = vpop.permute.xlu0 %609  ;;  %v369_v48 = vrot.slane %v368_v54, 1 }
  0xcb   : > { %893 = vperm.xlu1 %5041, %v5799_v8   ;;  %929 = vperm.xlu0 %5040, %v5852_v17  }
  0xcc   : > { %v370_v15 = vadd.f32 %v369_v48, %v368_v54  ;;  %v5679_v48 = vmov 7  }
  0xcf   : > { %901 = vperm.xlu1 %5041, %v5811_v10   ;;  %v6218_v46 = vpop.permute.xlu1 %629  ;;  %5043 = vset.pattern.permute.xlu0 %v5678_v62  ;;  %v6220_v23 = vpop.permute.xlu0 %633 }
  0xd0   : > { %9121 = vst [vmem:[#allocation20_spill] sm:$0xff] %v6218_v46  ;;  %9122 = vst [vmem:[#allocation21_spill] sm:$0xff] %v6220_v23  ;;  %953 = vperm.xlu0 %5043, %v5775_v4   ;;  %v6315_v46 = vld [vmem:[%s9019_s5] ss:$0 sm:$0xff] }
  0xd3   : > { %909 = vperm.xlu1 %5041, %v5823_v12   ;;  %v6224_v56 = vpop.permute.xlu1 %637  ;;  %v6226_v22 = vpop.permute.xlu0 %645 }
  0xd4   : > { %9123 = vst [vmem:[#allocation22_spill] sm:$0xff] %v6226_v22  ;;  %965 = vperm.xlu0 %5043, %v5787_v6  }
  0xd7   : > { %917 = vperm.xlu1 %5041, %v5835_v14   ;;  %v6230_v61 = vpop.permute.xlu1 %641  ;;  %v6232_v55 = vpop.permute.xlu0 %653 }
  0xd8   : > { %973 = vperm.xlu0 %5043, %v5799_v8  }
  0xdb   : > { %925 = vperm.xlu1 %5041, %v5857_v18   ;;  %v6236_v52 = vpop.permute.xlu1 %649  ;;  %v6238_v42 = vpop.permute.xlu0 %661 }
  0xdc   : > { %9124 = vst [vmem:[#allocation23_spill] sm:$0xff] %v6236_v52  ;;  %9125 = vst [vmem:[#allocation24_spill] sm:$0xff] %v6238_v42  ;;  %981 = vperm.xlu0 %5043, %v5811_v10   ;;  %v371_v42 = vmul.f32 0.0078125, %v370_v15 }
  0xde   : > { %v372_v22 = vadd.f32 1e-05, %v371_v42 }
  0xdf   : > { %5042 = vset.pattern.permute.xlu1 %v5678_v62  ;;  %v6241_v45 = vpop.permute.xlu1 %657  ;;  %v6243_v16 = vpop.permute.xlu0 %669 }
  0xe0   : > { %949 = vperm.xlu1 %5042, %v5763_v1   ;;  %989 = vperm.xlu0 %5043, %v5823_v12   ;;  %5542 = vrsqrt.f32 %v372_v22 }
  0xe3   : > { %v6247_v63 = vpop.permute.xlu1 %665  ;;  %v6249_v26 = vpop.permute.xlu0 %677 }
  0xe4   : > { %9126 = vst [vmem:[#allocation25_spill] sm:$0xff] %v6247_v63  ;;  %9127 = vst [vmem:[#allocation26_spill] sm:$0xff] %v6249_v26  ;;  %957 = vperm.xlu1 %5042, %v5758_v0   ;;  %997 = vperm.xlu0 %5043, %v5835_v14  }
  0xe7   : > { %v6253_v52 = vpop.permute.xlu1 %673  ;;  %v6255_v62 = vpop.permute.xlu0 %685 }
  0xe8   : > { %961 = vperm.xlu1 %5042, %v5770_v3   ;;  %1005 = vperm.xlu0 %5043, %v5857_v18  }
  0xeb   : > { %v6259_v23 = vpop.permute.xlu1 %681 }
  0xec   : > { %9128 = vst [vmem:[#allocation27_spill] sm:$0xff] %v6259_v23  ;;  %969 = vperm.xlu1 %5042, %v5782_v5   ;;  %5044 = vset.pattern.permute.xlu0 %v5679_v48  ;;  %v6262_v54 = vpop.permute.xlu0 %709 }
  0xed   : > { %9129 = vst [vmem:[#allocation28_spill] sm:$0xff] %v6262_v54  ;;  %1029 = vperm.xlu0 %5044, %v5763_v1   ;;  %v6283_v54 = vpop.eup %5542 }
  0xef   : > { %v6265_v15 = vpop.permute.xlu1 %689 }
  0xf0   : > { %977 = vperm.xlu1 %5042, %v5794_v7   ;;  %v6268_v26 = vpop.permute.xlu0 %721 }
  0xf1   : > { %1041 = vperm.xlu0 %5044, %v5770_v3  }
  0xf4   : > { %985 = vperm.xlu1 %5042, %v5806_v9   ;;  %v6272_v42 = vpop.permute.xlu1 %713  ;;  %v6274_v23 = vpop.permute.xlu0 %729 }
  0xf5   : > { %9130 = vst [vmem:[#allocation29_spill] sm:$0xff] %v6272_v42  ;;  %9131 = vst [vmem:[#allocation30_spill] sm:$0xff] %v6274_v23  ;;  %1049 = vperm.xlu0 %5044, %v5782_v5   ;;  %v376_v23 = vmul.f32 %v6283_v54, %v6019_v35  ;;  %v377_v5 = vmul.f32 %v6283_v54, %v6033_v39  ;;  %v381_v42 = vmul.f32 %v6283_v54, %v6084_v25 }
  0xf8   : > { %993 = vperm.xlu1 %5042, %v5818_v11   ;;  %v6278_v22 = vpop.permute.xlu1 %717  ;;  %v6280_v1 = vpop.permute.xlu0 %737 }
  0xf9   : > { %9132 = vst [vmem:[#allocation31_spill] sm:$0xff] %v6280_v1  ;;  %1057 = vperm.xlu0 %5044, %v5794_v7   ;;  %v6298_v7 = vld [vmem:[%s9018_s4] ss:$0 sm:$0xff]  ;;  %v384_v1 = vmul.f32 %v6283_v54, %v6123_v58 }
  0xfa   : > { %v399_v39 = vmul.f32 %v6298_v7, %v376_v23  ;;  %v404_v25 = vmul.f32 %v6298_v7, %v381_v42 }
  0xfc   : > { %1001 = vperm.xlu1 %5042, %v5830_v13   ;;  %v6286_v3 = vpop.permute.xlu1 %725  ;;  %v6288_v63 = vpop.permute.xlu0 %745  ;;  %v6340_v42 = vadd.f32 %v6315_v46, %v404_v25 }
  0xfd   : > { %9133 = vst [vmem:[#allocation32_spill] sm:$0xff] %v6286_v3  ;;  %9134 = vst [vmem:[#allocation33_spill] sm:$0xff] %v6288_v63  ;;  %1065 = vperm.xlu0 %5044, %v5806_v9   ;;  %v380_v3 = vmul.f32 %v6283_v54, %v6071_v2  ;;  %v400_v9 = vmul.f32 %v6298_v7, %v377_v5  ;;  %v6326_v5 = vadd.f32 %v6315_v46, %v399_v39 }
  0xfe   : > { %9139 = vst [vmem:[#allocation38_spill] sm:$0xff] %v6340_v42  ;;  %v619_v25 = vmul.f32 %v6179_v21, %v6340_v42 }
  0xff   : > { %v403_v2 = vmul.f32 %v6298_v7, %v380_v3  ;;  %9137 = vst [vmem:[#allocation36_spill] sm:$0xff] %v6326_v5 }
 0x100   : > { %1009 = vperm.xlu1 %5042, %v5852_v17   ;;  %v6305_v63 = vpop.permute.xlu1 %733  ;;  %v6307_v35 = vpop.permute.xlu0 %753 }
 0x101   : > { %9135 = vst [vmem:[#allocation34_spill] sm:$0xff] %v6305_v63  ;;  %9136 = vst [vmem:[#allocation35_spill] sm:$0xff] %v6307_v35  ;;  %1073 = vperm.xlu0 %5044, %v5818_v11   ;;  %v385_v63 = vmul.f32 %v6283_v54, %v6132_v19  ;;  %v6329_v11 = vadd.f32 %v6315_v46, %v400_v9  ;;  %v614_v19 = vmul.f32 %v6150_v40, %v6326_v5 }
 0x102   : > { %v6343_v3 = vadd.f32 %v6315_v46, %v403_v2  ;;  %v388_v40 = vmul.f32 %v6283_v54, %v6171_v37 }
 0x103   : > { %9138 = vst [vmem:[#allocation37_spill] sm:$0xff] %v6329_v11  ;;  %v408_v39 = vmul.f32 %v6298_v7, %v385_v63 }
 0x104   : > { %5045 = vset.pattern.permute.xlu1 %v5679_v48  ;;  %v6321_v35 = vpop.permute.xlu1 %741  ;;  %v6323_v23 = vpop.permute.xlu0 %761  ;;  %v615_v48 = vmul.f32 %v6153_v50, %v6329_v11  ;;  %9140 = vst [vmem:[#allocation39_spill] sm:$0xff] %v6343_v3  ;;  %v618_v63 = vmul.f32 %v6176_v28, %v6343_v3 }
 0x105   : > { %1033 = vperm.xlu1 %5045, %v5775_v4   ;;  %1081 = vperm.xlu0 %5044, %v5830_v13   ;;  %v407_v4 = vmul.f32 %v6298_v7, %v384_v1  ;;  %v389_v13 = vmul.f32 %v6283_v54, %v6184_v51  ;;  %v6362_v2 = vadd.f32 %v6315_v46, %v408_v39 }
 0x106   : > { %v5051_v50 = vpack.i.bf16 %v615_v48, %v614_v19  ;;  %v5061_v28 = vpack.i.bf16 %v619_v25, %v618_v63 }
 0x107   : > { %9141 = vst [vmem:[#allocation40_spill] sm:$0xff] %v6362_v2  ;;  %v6367_v51 = vadd.f32 %v6315_v46, %v407_v4  ;;  %v412_v37 = vmul.f32 %v6298_v7, %v389_v13  ;;  %v623_v19 = vmul.f32 %v6200_v41, %v6362_v2 }
 0x108   : > { %v6346_v9 = vpop.permute.xlu1 %749  ;;  %v6348_v58 = vpop.permute.xlu0 %769 }
 0x109   : > { %1037 = vperm.xlu1 %5045, %v5758_v0   ;;  %1089 = vperm.xlu0 %5044, %v5852_v17   ;;  %9142 = vst [vmem:[#allocation41_spill] sm:$0xff] %v6367_v51  ;;  %v411_v0 = vmul.f32 %v6298_v7, %v388_v40  ;;  %v622_v21 = vmul.f32 %v6198_v30, %v6367_v51 }
 0x10a   : > { %v6382_v39 = vadd.f32 %v6315_v46, %v412_v37  ;;  %v374_v40 = vmul.f32 %v6283_v54, %v6009_v32  ;;  %v379_v32 = vmul.f32 %v6283_v54, %v6059_v57  ;;  %v699_v57 = vmul.f32 %v6241_v45, %v6340_v42 }
 0x10b   : > { %v6385_v4 = vadd.f32 %v6315_v46, %v411_v0  ;;  %v5071_v13 = vpack.i.bf16 %v623_v19, %v622_v21  ;;  %v698_v21 = vmul.f32 %v6232_v55, %v6343_v3  ;;  %v382_v19 = vmul.f32 %v6283_v54, %v6097_v38 }
 0x10c   : > { %v6364_v1 = vpop.permute.xlu1 %757  ;;  %9143 = vst [vmem:[#allocation42_spill] sm:$0xff] %v6382_v39  ;;  %v627_v41 = vmul.f32 %v6213_v60, %v6382_v39  ;;  %v397_v60 = vmul.f32 %v6298_v7, %v374_v40  ;;  %v702_v40 = vmul.f32 %v6243_v16, %v6367_v51  ;;  %v387_v16 = vmul.f32 %v6283_v54, %v6158_v43 }
 0x10d   : > { %1045 = vperm.xlu1 %5045, %v5787_v6   ;;  %v6372_v17 = vpop.permute.xlu0 %793  ;;  %5052 = vrot.lane.b32.xlu0 %v5051_v50, %s5680_s9  ;;  %9144 = vst [vmem:[#allocation43_spill] sm:$0xff] %v6385_v4  ;;  %v626_v30 = vmul.f32 %v6211_v59, %v6385_v4  ;;  %v375_v50 = vmul.f32 %v6283_v54, %v6013_v33 }
 0x10e   : > { %v695_v59 = vmul.f32 %v6230_v61, %v6329_v11  ;;  %v694_v33 = vmul.f32 %v6224_v56, %v6326_v5  ;;  %v5101_v38 = vpack.i.bf16 %v699_v57, %v698_v21  ;;  %v410_v21 = vmul.f32 %v6298_v7, %v387_v16 }
 0x10f   : > { %v5081_v25 = vpack.i.bf16 %v627_v41, %v626_v30  ;;  %v398_v37 = vmul.f32 %v6298_v7, %v375_v50 }
 0x110   : > { %v6379_v48 = vpop.permute.xlu1 %765  ;;  %v5091_v61 = vpack.i.bf16 %v695_v59, %v694_v33  ;;  %v386_v59 = vmul.f32 %v6283_v54, %v6145_v49 }
 0x111   : > { %1053 = vperm.xlu1 %5045, %v5799_v8   ;;  %v6388_v6 = vpop.permute.xlu0 %805  ;;  %5062 = vrot.lane.b32.xlu0 %v5061_v28, %s5680_s9  ;;  %v6429_v56 = vadd.f32 %v6315_v46, %v398_v37 }
 0x113   : > { %9146 = vst [vmem:[#allocation45_spill] sm:$0xff] %v6429_v56  ;;  %v613_v41 = vmul.f32 %v6137_v34, %v6429_v56 }
 0x115   : > { %1061 = vperm.xlu1 %5045, %v5811_v10   ;;  %v6400_v8 = vpop.permute.xlu1 %789  ;;  %v6402_v63 = vpop.permute.xlu0 %813  ;;  %5072 = vrot.lane.b32.xlu0 %v5071_v13, %s5680_s9  ;;  %v378_v10 = vmul.f32 %v6283_v54, %v6046_v24  ;;  %v6426_v24 = vadd.f32 %v6315_v46, %v397_v60  ;;  %v402_v13 = vmul.f32 %v6298_v7, %v379_v32  ;;  %v5682_v60 = vmov 8  }
 0x116   : > { %5287 = vset.pattern.permute.xlu0 %v5682_v60 }
 0x117   : > { %9145 = vst [vmem:[#allocation44_spill] sm:$0xff] %v6426_v24  ;;  %v401_v30 = vmul.f32 %v6298_v7, %v378_v10  ;;  %v6456_v34 = vadd.f32 %v6315_v46, %v402_v13  ;;  %v774_v13 = vmul.f32 %v6278_v22, %v6326_v5 }
 0x119   : > { %1069 = vperm.xlu1 %5045, %v5823_v12   ;;  %v6416_v0 = vpop.permute.xlu1 %797  ;;  %v6418_v28 = vpop.permute.xlu0 %821  ;;  %5082 = vrot.lane.b32.xlu0 %v5081_v25, %s5680_s9  ;;  %v383_v12 = vmul.f32 %v6283_v54, %v6110_v47  ;;  %v612_v47 = vmul.f32 %v6140_v27, %v6426_v24  ;;  %v405_v25 = vmul.f32 %v6298_v7, %v382_v19 }
 0x11a   : > { %9147 = vst [vmem:[#allocation46_spill] sm:$0xff] %v6456_v34  ;;  %v6459_v27 = vadd.f32 %v6315_v46, %v401_v30  ;;  %v617_v10 = vmul.f32 %v6166_v20, %v6456_v34  ;;  %v409_v54 = vmul.f32 %v6298_v7, %v386_v59 }
 0x11b   : > { %v406_v50 = vmul.f32 %v6298_v7, %v383_v12  ;;  %v5046_v49 = vpack.i.bf16 %v613_v41, %v612_v47  ;;  %v6503_v41 = vadd.f32 %v6315_v46, %v410_v21 }
 0x11c   : > { %9148 = vst [vmem:[#allocation47_spill] sm:$0xff] %v6459_v27  ;;  %v616_v32 = vmul.f32 %v6163_v31, %v6459_v27  ;;  %v706_v31 = vmul.f32 %v6255_v62, %v6385_v4  ;;  %v775_v62 = vmul.f32 %v6268_v26, %v6329_v11  ;;  %v6500_v30 = vadd.f32 %v6315_v46, %v409_v54 }
 0x11d   : > { %1077 = vperm.xlu1 %5045, %v5835_v14   ;;  %v6438_v55 = vpop.permute.xlu1 %801  ;;  %v6440_v45 = vpop.permute.xlu0 %829  ;;  %5092 = vrot.lane.b32.xlu0 %v5091_v61, %s5681_s10  ;;  %v703_v14 = vmul.f32 %v6253_v52, %v6362_v2  ;;  %v707_v61 = vmul.f32 %v6265_v15, %v6382_v39  ;;  %v6476_v43 = vadd.f32 %v6315_v46, %v406_v50 }
 0x11e   : > { %v5056_v19 = vpack.i.bf16 %v617_v10, %v616_v32  ;;  %9151 = vst [vmem:[#allocation50_spill] sm:$0xff] %v6500_v30  ;;  %9152 = vst [vmem:[#allocation51_spill] sm:$0xff] %v6503_v41  ;;  %v625_v22 = vmul.f32 %v6207_v29, %v6503_v41  ;;  %v782_v10 = vmul.f32 %v6346_v9, %v6367_v51 }
 0x11f   : > { %v5111_v33 = vpack.i.bf16 %v703_v14, %v702_v40  ;;  %9149 = vst [vmem:[#allocation48_spill] sm:$0xff] %v6476_v43  ;;  %v621_v12 = vmul.f32 %v6191_v53, %v6476_v43  ;;  %v5121_v7 = vpack.i.bf16 %v707_v61, %v706_v31  ;;  %v624_v53 = vmul.f32 %v6205_v36, %v6500_v30  ;;  %v9153_v40 = vld [vmem:[#allocation31_spill] sm:$0xff]  ;;  %v9154_v14 = vld [vmem:[#allocation34_spill] sm:$0xff]  ;;  %v9155_v36 = vld [vmem:[#allocation20_spill] sm:$0xff] }
 0x120   : > { %v778_v50 = vmul.f32 %v9154_v14, %v6343_v3  ;;  %v692_v59 = vmul.f32 %v9155_v36, %v6426_v24  ;;  %v786_v9 = vmul.f32 %v6379_v48, %v6385_v4 }
 0x121   : > { %1085 = vperm.xlu1 %5045, %v5857_v18   ;;  %v6464_v52 = vpop.permute.xlu1 %809  ;;  %v6466_v37 = vpop.permute.xlu0 %837  ;;  %5102 = vrot.lane.b32.xlu0 %v5101_v38, %s5681_s10  ;;  %v6479_v18 = vadd.f32 %v6315_v46, %v405_v25  ;;  %v5131_v38 = vpack.i.bf16 %v775_v62, %v774_v13  ;;  %v779_v46 = vmul.f32 %v9153_v40, %v6340_v42 }
 0x122   : > { %v787_v13 = vmul.f32 %v6348_v58, %v6382_v39 }
 0x123   : > { %9150 = vst [vmem:[#allocation49_spill] sm:$0xff] %v6479_v18  ;;  %v620_v15 = vmul.f32 %v6189_v44, %v6479_v18  ;;  %v5141_v32 = vpack.i.bf16 %v779_v46, %v778_v50  ;;  %v9161_v46 = vld [vmem:[#allocation25_spill] sm:$0xff] }
 0x124   : > { %v701_v14 = vmul.f32 %v9161_v46, %v6476_v43  ;;  %v5161_v50 = vpack.i.bf16 %v787_v13, %v786_v9 }
 0x125   : > { %v6485_v57 = vpop.permute.xlu1 %817  ;;  %v6487_v20 = vpop.permute.xlu0 %845  ;;  %5112 = vrot.lane.b32.xlu0 %v5111_v33, %s5681_s10  ;;  %5047 = vrot.lane.b32.xlu1 %v5046_v49, %s5680_s9  ;;  %v5066_v44 = vpack.i.bf16 %v621_v12, %v620_v15  ;;  %v5076_v49 = vpack.i.bf16 %v625_v22, %v624_v53  ;;  %v9157_v33 = vld [vmem:[#allocation35_spill] sm:$0xff]  ;;  %v9158_v15 = vld [vmem:[#allocation22_spill] sm:$0xff] }
 0x126   : > { %5286 = vset.pattern.permute.xlu1 %v5682_v60  ;;  %v9156_v60 = vld [vmem:[#allocation21_spill] sm:$0xff]  ;;  %v783_v61 = vmul.f32 %v9157_v33, %v6362_v2  ;;  %v696_v12 = vmul.f32 %v9158_v15, %v6459_v27 }
 0x127   : > { %v693_v29 = vmul.f32 %v9156_v60, %v6429_v56 }
 0x128   : > { %v5151_v62 = vpack.i.bf16 %v783_v61, %v782_v10 }
 0x129   : > { %v6505_v47 = vpop.permute.xlu1 %825  ;;  %5122 = vrot.lane.b32.xlu0 %v5121_v7, %s5681_s10  ;;  %5057 = vrot.lane.b32.xlu1 %v5056_v19, %s5680_s9  ;;  %v5086_v21 = vpack.i.bf16 %v693_v29, %v692_v59  ;;  %v9159_v19 = vld [vmem:[#allocation23_spill] sm:$0xff]  ;;  %v9163_v29 = vld [vmem:[#allocation26_spill] sm:$0xff] }
 0x12a   : > { %v6511_v26 = vpop.permute.xlu0 %869  ;;  %v697_v7 = vmul.f32 %v9159_v19, %v6456_v34  ;;  %v9162_v59 = vld [vmem:[#allocation27_spill] sm:$0xff] }
 0x12b   : > { %v705_v60 = vmul.f32 %v9162_v59, %v6503_v41 }
 0x12c   : > { %v5096_v22 = vpack.i.bf16 %v697_v7, %v696_v12  ;;  %v9165_v12 = vld [vmem:[#allocation29_spill] sm:$0xff] }
 0x12d   : > { %v6519_v25 = vpop.permute.xlu1 %833  ;;  %5132 = vrot.lane.b32.xlu0 %v5131_v38, %s5683_s11  ;;  %5067 = vrot.lane.b32.xlu1 %v5066_v44, %s5680_s9  ;;  %v9160_v38 = vld [vmem:[#allocation24_spill] sm:$0xff]  ;;  %v773_v19 = vmul.f32 %v9165_v12, %v6429_v56 }
 0x12e   : > { %v882_v16 = vpop.permute.xlu0 %881  ;;  %v700_v40 = vmul.f32 %v9160_v38, %v6479_v18 }
 0x130   : > { %v5106_v36 = vpack.i.bf16 %v701_v14, %v700_v40  ;;  %v9167_v40 = vld [vmem:[#allocation32_spill] sm:$0xff]  ;;  %v9168_v14 = vld [vmem:[#allocation33_spill] sm:$0xff] }
 0x131   : > { %v6531_v54 = vpop.permute.xlu1 %841  ;;  %5142 = vrot.lane.b32.xlu0 %v5141_v32, %s5683_s11  ;;  %5077 = vrot.lane.b32.xlu1 %v5076_v49, %s5680_s9  ;;  %v704_v49 = vmul.f32 %v9163_v29, %v6500_v30  ;;  %v935_v32 = vmul.f32 %v882_v16, %v6329_v11  ;;  %v9166_v16 = vld [vmem:[#allocation30_spill] sm:$0xff]  ;;  %v776_v46 = vmul.f32 %v9167_v40, %v6459_v27 }
 0x132   : > { %v6535_v31 = vpop.permute.xlu0 %889  ;;  %v777_v38 = vmul.f32 %v9166_v16, %v6456_v34  ;;  %v780_v29 = vmul.f32 %v6321_v35, %v6479_v18 }
 0x133   : > { %v5116_v61 = vpack.i.bf16 %v705_v60, %v704_v49 }
 0x134   : > { %v5136_v60 = vpack.i.bf16 %v777_v38, %v776_v46 }
 0x135   : > { %v6545_v44 = vpop.permute.xlu1 %849  ;;  %5152 = vrot.lane.b32.xlu0 %v5151_v62, %s5683_s11  ;;  %5087 = vrot.lane.b32.xlu1 %v5086_v21, %s5681_s10  ;;  %v9164_v21 = vld [vmem:[#allocation28_spill] sm:$0xff] }
 0x136   : > { %v898_v53 = vpop.permute.xlu0 %897  ;;  %v772_v15 = vmul.f32 %v9164_v21, %v6426_v24 }
 0x137   : > { %v939_v49 = vmul.f32 %v898_v53, %v6340_v42 }
 0x139   : > { %5162 = vrot.lane.b32.xlu0 %v5161_v50, %s5683_s11  ;;  %5097 = vrot.lane.b32.xlu1 %v5096_v22, %s5681_s10  ;;  %v5126_v22 = vpack.i.bf16 %v773_v19, %v772_v15  ;;  %v781_v50 = vmul.f32 %v9168_v14, %v6476_v43  ;;  %v785_v19 = vmul.f32 %v6323_v23, %v6503_v41 }
 0x13a   : > { %v874_v58 = vpop.permute.xlu1 %873  ;;  %v906_v48 = vpop.permute.xlu0 %905  ;;  %v937_v23 = vmul.f32 %v6535_v31, %v6456_v34 }
 0x13b   : > { %v5146_v15 = vpack.i.bf16 %v781_v50, %v780_v29 }
 0x13d   : > { %5107 = vrot.lane.b32.xlu1 %v5106_v36, %s5681_s10 }
 0x13e   : > { %v878_v10 = vpop.permute.xlu1 %877  ;;  %v914_v33 = vpop.permute.xlu0 %913 }
 0x13f   : > { %v934_v7 = vmul.f32 %v878_v10, %v6326_v5 }
 0x141   : > { %v5171_v62 = vpack.i.bf16 %v935_v32, %v934_v7  ;;  %5117 = vrot.lane.b32.xlu1 %v5116_v61, %s5681_s10  ;;  %v784_v61 = vmul.f32 %v6364_v1, %v6500_v30  ;;  %v932_v7 = vmul.f32 %v6511_v26, %v6426_v24 }
 0x142   : > { %v886_v9 = vpop.permute.xlu1 %885  ;;  %v922_v13 = vpop.permute.xlu0 %921 }
 0x143   : > { %5172 = vrot.lane.b32.xlu0 %v5171_v62, %s5680_s9  ;;  %v5156_v35 = vpack.i.bf16 %v785_v19, %v784_v61  ;;  %v933_v62 = vmul.f32 %v874_v58, %v6429_v56  ;;  %v936_v14 = vmul.f32 %v886_v9, %v6459_v27 }
 0x145   : > { %5127 = vrot.lane.b32.xlu1 %v5126_v22, %s5683_s11  ;;  %v943_v22 = vmul.f32 %v914_v33, %v6362_v2  ;;  %v5166_v46 = vpack.i.bf16 %v933_v62, %v932_v7  ;;  %v5176_v58 = vpack.i.bf16 %v937_v23, %v936_v14 }
 0x146   : > { %v894_v36 = vpop.permute.xlu1 %893  ;;  %v930_v59 = vpop.permute.xlu0 %929 }
 0x147   : > { %v938_v32 = vmul.f32 %v894_v36, %v6343_v3  ;;  %v947_v33 = vmul.f32 %v930_v59, %v6382_v39 }
 0x149   : > { %v5181_v10 = vpack.i.bf16 %v939_v49, %v938_v32  ;;  %5137 = vrot.lane.b32.xlu1 %v5136_v60, %s5683_s11  ;;  %v941_v49 = vmul.f32 %v906_v48, %v6476_v43 }
 0x14a   : > { %v902_v21 = vpop.permute.xlu1 %901 }
 0x14b   : > { %v954_v12 = vpop.permute.xlu0 %953  ;;  %5182 = vrot.lane.b32.xlu0 %v5181_v10, %s5680_s9  ;;  %v940_v36 = vmul.f32 %v902_v21, %v6479_v18 }
 0x14c   : > { %v1013_v59 = vmul.f32 %v954_v12, %v6429_v56 }
 0x14d   : > { %5147 = vrot.lane.b32.xlu1 %v5146_v15, %s5683_s11  ;;  %v5186_v9 = vpack.i.bf16 %v941_v49, %v940_v36  ;;  %v945_v15 = vmul.f32 %v922_v13, %v6503_v41 }
 0x14e   : > { %v910_v53 = vpop.permute.xlu1 %909 }
 0x14f   : > { %v942_v1 = vmul.f32 %v910_v53, %v6367_v51  ;;  %v966_v16 = vpop.permute.xlu0 %965 }
 0x150   : > { %v1016_v12 = vmul.f32 %v966_v16, %v6459_v27 }
 0x151   : > { %v5191_v38 = vpack.i.bf16 %v943_v22, %v942_v1  ;;  %5157 = vrot.lane.b32.xlu1 %v5156_v35, %s5683_s11 }
 0x152   : > { %v918_v40 = vpop.permute.xlu1 %917 }
 0x153   : > { %v974_v50 = vpop.permute.xlu0 %973  ;;  %5192 = vrot.lane.b32.xlu0 %v5191_v38, %s5680_s9  ;;  %v944_v32 = vmul.f32 %v918_v40, %v6500_v30 }
 0x155   : > { %5167 = vrot.lane.b32.xlu1 %v5166_v46, %s5680_s9  ;;  %v5196_v21 = vpack.i.bf16 %v945_v15, %v944_v32 }
 0x156   : > { %v926_v26 = vpop.permute.xlu1 %925 }
 0x157   : > { %v946_v60 = vmul.f32 %v926_v26, %v6385_v4  ;;  %v982_v29 = vpop.permute.xlu0 %981  ;;  %v1018_v26 = vmul.f32 %v974_v50, %v6343_v3 }
 0x158   : > { %v1020_v49 = vmul.f32 %v982_v29, %v6479_v18 }
 0x159   : > { %v5201_v31 = vpack.i.bf16 %v947_v33, %v946_v60  ;;  %5177 = vrot.lane.b32.xlu1 %v5176_v58, %s5680_s9 }
 0x15b   : > { %v950_v10 = vpop.permute.xlu1 %949  ;;  %v990_v61 = vpop.permute.xlu0 %989  ;;  %5202 = vrot.lane.b32.xlu0 %v5201_v31, %s5680_s9 }
 0x15c   : > { %v1012_v19 = vmul.f32 %v950_v10, %v6426_v24  ;;  %v1022_v10 = vmul.f32 %v990_v61, %v6367_v51 }
 0x15d   : > { %5187 = vrot.lane.b32.xlu1 %v5186_v9, %s5680_s9 }
 0x15e   : > { %v5206_v53 = vpack.i.bf16 %v1013_v59, %v1012_v19 }
 0x15f   : > { %v958_v48 = vpop.permute.xlu1 %957  ;;  %v998_v35 = vpop.permute.xlu0 %997 }
 0x160   : > { %v1014_v22 = vmul.f32 %v958_v48, %v6326_v5  ;;  %v1024_v19 = vmul.f32 %v998_v35, %v6500_v30 }
 0x161   : > { %5197 = vrot.lane.b32.xlu1 %v5196_v21, %s5680_s9 }
 0x163   : > { %v962_v7 = vpop.permute.xlu1 %961  ;;  %v1006_v62 = vpop.permute.xlu0 %1005 }
 0x164   : > { %v1015_v1 = vmul.f32 %v962_v7, %v6329_v11 }
 0x165   : > { %5207 = vrot.lane.b32.xlu1 %v5206_v53, %s5681_s10 }
 0x166   : > { %v5211_v13 = vpack.i.bf16 %v1015_v1, %v1014_v22  ;;  %v1026_v22 = vmul.f32 %v1006_v62, %v6385_v4 }
 0x167   : > { %v970_v38 = vpop.permute.xlu1 %969 }
 0x168   : > { %v1017_v40 = vmul.f32 %v970_v38, %v6456_v34  ;;  %v1030_v23 = vpop.permute.xlu0 %1029  ;;  %5212 = vrot.lane.b32.xlu0 %v5211_v13, %s5681_s10 }
 0x169   : > { %v1092_v13 = vmul.f32 %v1030_v23, %v6426_v24 }
 0x16a   : > { %v5216_v46 = vpack.i.bf16 %v1017_v40, %v1016_v12 }
 0x16b   : > { %v978_v14 = vpop.permute.xlu1 %977 }
 0x16c   : > { %v1019_v58 = vmul.f32 %v978_v14, %v6340_v42  ;;  %v1042_v33 = vpop.permute.xlu0 %1041  ;;  %5217 = vrot.lane.b32.xlu1 %v5216_v46, %s5681_s10 }
 0x16d   : > { %v1095_v14 = vmul.f32 %v1042_v33, %v6329_v11 }
 0x16e   : > { %v5221_v36 = vpack.i.bf16 %v1019_v58, %v1018_v26 }
 0x16f   : > { %v986_v60 = vpop.permute.xlu1 %985 }
 0x170   : > { %v1021_v16 = vmul.f32 %v986_v60, %v6476_v43  ;;  %v1050_v31 = vpop.permute.xlu0 %1049  ;;  %5222 = vrot.lane.b32.xlu0 %v5221_v36, %s5681_s10 }
 0x171   : > { %v1097_v60 = vmul.f32 %v1050_v31, %v6456_v34 }
 0x172   : > { %v5226_v9 = vpack.i.bf16 %v1021_v16, %v1020_v49 }
 0x173   : > { %v994_v32 = vpop.permute.xlu1 %993 }
 0x174   : > { %v1023_v50 = vmul.f32 %v994_v32, %v6362_v2  ;;  %v1058_v15 = vpop.permute.xlu0 %1057  ;;  %5227 = vrot.lane.b32.xlu1 %v5226_v9, %s5681_s10 }
 0x175   : > { %v1099_v32 = vmul.f32 %v1058_v15, %v6340_v42 }
 0x176   : > { %v5231_v59 = vpack.i.bf16 %v1023_v50, %v1022_v10 }
 0x177   : > { %v1002_v21 = vpop.permute.xlu1 %1001 }
 0x178   : > { %v1025_v29 = vmul.f32 %v1002_v21, %v6503_v41  ;;  %5232 = vrot.lane.b32.xlu0 %v5231_v59, %s5681_s10  ;;  %v1066_v48 = vpop.permute.xlu0 %1065 }
 0x179   : > { %v1101_v59 = vmul.f32 %v1066_v48, %v6476_v43 }
 0x17a   : > { %v5236_v53 = vpack.i.bf16 %v1025_v29, %v1024_v19 }
 0x17b   : > { %v1010_v7 = vpop.permute.xlu1 %1009 }
 0x17c   : > { %v1027_v61 = vmul.f32 %v1010_v7, %v6382_v39  ;;  %5237 = vrot.lane.b32.xlu1 %v5236_v53, %s5681_s10  ;;  %v1074_v38 = vpop.permute.xlu0 %1073 }
 0x17d   : > { %v1103_v53 = vmul.f32 %v1074_v38, %v6362_v2 }
 0x17e   : > { %v5241_v1 = vpack.i.bf16 %v1027_v61, %v1026_v22 }
 0x180   : > { %v1034_v12 = vpop.permute.xlu1 %1033  ;;  %5242 = vrot.lane.b32.xlu0 %v5241_v1, %s5681_s10  ;;  %v1082_v26 = vpop.permute.xlu0 %1081 }
 0x181   : > { %v1093_v35 = vmul.f32 %v1034_v12, %v6429_v56  ;;  %v1105_v48 = vmul.f32 %v1082_v26, %v6503_v41  ;;  %v6666_v26 = vld [vmem:[%s9015_s1] sm:$0xff] }
 0x183   : > { %v5246_v40 = vpack.i.bf16 %v1093_v35, %v1092_v13 }
 0x184   : > { %v1038_v46 = vpop.permute.xlu1 %1037  ;;  %v1090_v49 = vpop.permute.xlu0 %1089 }
 0x185   : > { %v1094_v62 = vmul.f32 %v1038_v46, %v6326_v5  ;;  %5247 = vrot.lane.b32.xlu1 %v5246_v40, %s5683_s11  ;;  %v1107_v35 = vmul.f32 %v1090_v49, %v6382_v39 }
 0x187   : > { %v5251_v58 = vpack.i.bf16 %v1095_v14, %v1094_v62 }
 0x188   : > { %v1046_v36 = vpop.permute.xlu1 %1045  ;;  %v6643_v21 = vpop.permute.xlu0 %5052 }
 0x189   : > { %v1096_v23 = vmul.f32 %v1046_v36, %v6459_v27  ;;  %5252 = vrot.lane.b32.xlu0 %v5251_v58, %s5683_s11  ;;  %v6676_v36 = vld [vmem:[%s9015_s1 + $0x8] sm:$0xff] }
 0x18b   : > { %v5256_v16 = vpack.i.bf16 %v1097_v60, %v1096_v23  ;;  %v6682_v60 = vld [vmem:[%s9015_s1 + $0x10] sm:$0xff] }
 0x18c   : > { %v1054_v9 = vpop.permute.xlu1 %1053  ;;  %v6650_v7 = vpop.permute.xlu0 %5062  ;;  %9170 = vst [vmem:[#allocation34_spill] sm:$0xff] %v6682_v60 }
 0x18d   : > { %v1098_v33 = vmul.f32 %v1054_v9, %v6343_v3  ;;  %5257 = vrot.lane.b32.xlu1 %v5256_v16, %s5683_s11  ;;  %v6692_v16 = vld [vmem:[%s9015_s1 + $0x20] sm:$0xff]  ;;  %v6698_v9 = vld [vmem:[%s9015_s1 + $0x18] sm:$0xff] }
 0x18e   : > { %9172 = vst [vmem:[#allocation21_spill] sm:$0xff] %v6692_v16  ;;  %9173 = vst [vmem:[#allocation35_spill] sm:$0xff] %v6698_v9 }
 0x18f   : > { %v5261_v10 = vpack.i.bf16 %v1099_v32, %v1098_v33  ;;  %v6706_v33 = vld [vmem:[%s9015_s1 + $0x30] sm:$0xff] }
 0x190   : > { %v1062_v50 = vpop.permute.xlu1 %1061  ;;  %v6656_v40 = vpop.permute.xlu0 %5072  ;;  %9175 = vst [vmem:[#allocation23_spill] sm:$0xff] %v6706_v33 }
 0x191   : > { %v1100_v31 = vmul.f32 %v1062_v50, %v6479_v18  ;;  %5262 = vrot.lane.b32.xlu0 %v5261_v10, %s5683_s11  ;;  %v6712_v10 = vld [vmem:[%s9015_s1 + $0x28] sm:$0xff] }
 0x192   : > { %9176 = vst [vmem:[#allocation24_spill] sm:$0xff] %v6712_v10 }
 0x193   : > { %v5266_v19 = vpack.i.bf16 %v1101_v59, %v1100_v31  ;;  %v6722_v31 = vld [vmem:[%s9015_s1 + $0x40] sm:$0xff] }
 0x194   : > { %v1070_v29 = vpop.permute.xlu1 %1069  ;;  %v6669_v62 = vpop.permute.xlu0 %5082  ;;  %9178 = vst [vmem:[#allocation27_spill] sm:$0xff] %v6722_v31 }
 0x195   : > { %v1102_v15 = vmul.f32 %v1070_v29, %v6367_v51  ;;  %5267 = vrot.lane.b32.xlu1 %v5266_v19, %s5683_s11  ;;  %9169 = vst [vmem:[#allocation31_spill] sm:$0xff] %v6669_v62  ;;  %v6728_v19 = vld [vmem:[%s9015_s1 + $0x38] sm:$0xff] }
 0x196   : > { %9179 = vst [vmem:[#allocation26_spill] sm:$0xff] %v6728_v19 }
 0x197   : > { %v5271_v22 = vpack.i.bf16 %v1103_v53, %v1102_v15  ;;  %v6738_v15 = vld [vmem:[%s9015_s1 + $0x50] sm:$0xff] }
 0x198   : > { %v1078_v61 = vpop.permute.xlu1 %1077  ;;  %v6687_v49 = vpop.permute.xlu0 %5092  ;;  %9181 = vst [vmem:[#allocation29_spill] sm:$0xff] %v6738_v15 }
 0x199   : > { %v1104_v1 = vmul.f32 %v1078_v61, %v6500_v30  ;;  %5272 = vrot.lane.b32.xlu0 %v5271_v22, %s5683_s11  ;;  %v6744_v22 = vld [vmem:[%s9015_s1 + $0x48] sm:$0xff] }
 0x19a   : > { %9182 = vst [vmem:[#allocation30_spill] sm:$0xff] %v6744_v22 }
 0x19b   : > { %v5276_v13 = vpack.i.bf16 %v1105_v48, %v1104_v1  ;;  %v6752_v48 = vld [vmem:[%s9015_s1 + $0x60] sm:$0xff]  ;;  %v6758_v1 = vld [vmem:[%s9015_s1 + $0x58] sm:$0xff] }
 0x19c   : > { %v1086_v12 = vpop.permute.xlu1 %1085  ;;  %v6715_v50 = vpop.permute.xlu0 %5102  ;;  %9184 = vst [vmem:[#allocation33_spill] sm:$0xff] %v6752_v48  ;;  %9185 = vst [vmem:[#allocation52_spill] sm:$0xff] %v6758_v1 }
 0x19d   : > { %v1106_v38 = vmul.f32 %v1086_v12, %v6385_v4  ;;  %5277 = vrot.lane.b32.xlu1 %v5276_v13, %s5683_s11 }
 0x19f   : > { %v5281_v46 = vpack.i.bf16 %v1107_v35, %v1106_v38  ;;  %v6768_v35 = vld [vmem:[%s9015_s1 + $0x70] sm:$0xff]  ;;  %v6774_v38 = vld [vmem:[%s9015_s1 + $0x68] sm:$0xff] }
 0x1a0   : > { %v6660_v14 = vpop.permute.xlu1 %5047  ;;  %v6733_v53 = vpop.permute.xlu0 %5112  ;;  %9188 = vst [vmem:[#allocation55_spill] sm:$0xff] %v6774_v38 }
 0x1a1   : > { %5282 = vrot.lane.b32.xlu0 %v5281_v46, %s5683_s11  ;;  %1703 = vperm.xlu1 %5286, %v6666_v26  }
 0x1a4   : > { %v6671_v58 = vpop.permute.xlu1 %5057  ;;  %v6761_v13 = vpop.permute.xlu0 %5122 }
 0x1a5   : > { %1707 = vperm.xlu0 %5287, %v6676_v36   ;;  %1711 = vperm.xlu1 %5286, %v6682_v60   ;;  %9186 = vst [vmem:[#allocation53_spill] sm:$0xff] %v6761_v13 }
 0x1a8   : > { %v6685_v23 = vpop.permute.xlu1 %5067 }
 0x1a9   : > { %9171 = vst [vmem:[#allocation20_spill] sm:$0xff] %v6685_v23  ;;  %1719 = vperm.xlu0 %5287, %v6692_v16   ;;  %1715 = vperm.xlu1 %5286, %v6698_v9  }
 0x1ac   : > { %v6701_v32 = vpop.permute.xlu1 %5077 }
 0x1ad   : > { %9174 = vst [vmem:[#allocation22_spill] sm:$0xff] %v6701_v32  ;;  %1727 = vperm.xlu0 %5287, %v6706_v33   ;;  %1723 = vperm.xlu1 %5286, %v6712_v10  }
 0x1b0   : > { %v6717_v59 = vpop.permute.xlu1 %5087 }
 0x1b1   : > { %9177 = vst [vmem:[#allocation25_spill] sm:$0xff] %v6717_v59  ;;  %1735 = vperm.xlu0 %5287, %v6722_v31   ;;  %1731 = vperm.xlu1 %5286, %v6728_v19  }
 0x1b4   : > { %v6731_v29 = vpop.permute.xlu1 %5097 }
 0x1b5   : > { %9180 = vst [vmem:[#allocation28_spill] sm:$0xff] %v6731_v29  ;;  %1743 = vperm.xlu0 %5287, %v6738_v15   ;;  %1739 = vperm.xlu1 %5286, %v6744_v22   ;;  %v5684_v29 = vmov 9  }
 0x1b8   : > { %v6747_v61 = vpop.permute.xlu1 %5107 }
 0x1b9   : > { %9183 = vst [vmem:[#allocation32_spill] sm:$0xff] %v6747_v61  ;;  %1751 = vperm.xlu0 %5287, %v6752_v48   ;;  %1747 = vperm.xlu1 %5286, %v6758_v1   ;;  %v6779_v61 = vpop.permute.xlu0 %5132 }
 0x1ba   : > { %9190 = vst [vmem:[#allocation57_spill] sm:$0xff] %v6779_v61  ;;  %v9218_v61 = vld [vmem:[#allocation16_spill] sm:$0xff] }
 0x1bc   : > { %v6763_v12 = vpop.permute.xlu1 %5117 }
 0x1bd   : > { %9187 = vst [vmem:[#allocation54_spill] sm:$0xff] %v6763_v12  ;;  %1759 = vperm.xlu0 %5287, %v6768_v35   ;;  %1755 = vperm.xlu1 %5286, %v6774_v38   ;;  %v6784_v12 = vld [vmem:[%s9015_s1 + $0x78] sm:$0xff] }
 0x1c0   : > { %v6777_v46 = vpop.permute.xlu1 %5127 }
 0x1c1   : > { %9189 = vst [vmem:[#allocation56_spill] sm:$0xff] %v6777_v46  ;;  %5288 = vset.pattern.permute.xlu0 %v5684_v29  ;;  %1763 = vperm.xlu1 %5286, %v6784_v12   ;;  %v6792_v46 = vpop.permute.xlu0 %5142 }
 0x1c2   : > { %1783 = vperm.xlu0 %5288, %v6666_v26   ;;  %9192 = vst [vmem:[#allocation59_spill] sm:$0xff] %v6792_v46 }
 0x1c4   : > { %v6788_v59 = vpop.permute.xlu1 %5137 }
 0x1c5   : > { %9191 = vst [vmem:[#allocation58_spill] sm:$0xff] %v6788_v59  ;;  %5289 = vset.pattern.permute.xlu1 %v5684_v29  ;;  %v6800_v23 = vpop.permute.xlu0 %5152 }
 0x1c6   : > { %1795 = vperm.xlu0 %5288, %v6698_v9   ;;  %1787 = vperm.xlu1 %5289, %v6676_v36   ;;  %9195 = vst [vmem:[#allocation62_spill] sm:$0xff] %v6800_v23 }
 0x1c8   : > { %v6794_v32 = vpop.permute.xlu1 %5147 }
 0x1c9   : > { %9193 = vst [vmem:[#allocation60_spill] sm:$0xff] %v6794_v32  ;;  %v6808_v59 = vpop.permute.xlu0 %5162 }
 0x1ca   : > { %1803 = vperm.xlu0 %5288, %v6712_v10   ;;  %1791 = vperm.xlu1 %5289, %v6682_v60   ;;  %9197 = vst [vmem:[#allocation64_spill] sm:$0xff] %v6808_v59  ;;  %v9205_v59 = vld [vmem:[#allocation7_spill] sm:$0xff] }
 0x1cc   : > { %v6798_v13 = vpop.permute.xlu1 %5157 }
 0x1cd   : > { %9194 = vst [vmem:[#allocation61_spill] sm:$0xff] %v6798_v13  ;;  %v6816_v10 = vpop.permute.xlu0 %5172 }
 0x1ce   : > { %1811 = vperm.xlu0 %5288, %v6728_v19   ;;  %1799 = vperm.xlu1 %5289, %v6692_v16   ;;  %9200 = vst [vmem:[#allocation67_spill] sm:$0xff] %v6816_v10  ;;  %v9201_v19 = vld [vmem:[#allocation4_spill] sm:$0xff] }
 0x1cf   : > { %v534_v9 = vmul.f32 %v9201_v19, %v6326_v5  ;;  %v9208_v19 = vld [vmem:[#allocation9_spill] sm:$0xff] }
 0x1d0   : > { %v6804_v29 = vpop.permute.xlu1 %5167  ;;  %v6838_v23 = vmul.f32 %v9208_v19, %v6459_v27  ;;  %v9217_v19 = vld [vmem:[#allocation15_spill] sm:$0xff] }
 0x1d1   : > { %9196 = vst [vmem:[#allocation63_spill] sm:$0xff] %v6804_v29  ;;  %v9202_v29 = vld [vmem:[#allocation5_spill] sm:$0xff] }
 0x1d2   : > { %1819 = vperm.xlu0 %5288, %v6744_v22   ;;  %1807 = vperm.xlu1 %5289, %v6706_v33   ;;  %v6822_v22 = vmul.f32 %v9202_v29, %v6426_v24  ;;  %v9210_v29 = vld [vmem:[#allocation10_spill] sm:$0xff] }
 0x1d4   : > { %v6810_v32 = vpop.permute.xlu1 %5177  ;;  %9203 = vst [vmem:[#allocation4_spill] sm:$0xff] %v6822_v22 }
 0x1d5   : > { %9198 = vst [vmem:[#allocation65_spill] sm:$0xff] %v6810_v32  ;;  %v9204_v32 = vld [vmem:[#allocation6_spill] sm:$0xff] }
 0x1d6   : > { %1827 = vperm.xlu0 %5288, %v6758_v1   ;;  %1815 = vperm.xlu1 %5289, %v6722_v31   ;;  %v535_v1 = vmul.f32 %v9204_v32, %v6329_v11  ;;  %v6830_v31 = vmul.f32 %v9205_v59, %v6429_v56  ;;  %9209 = vst [vmem:[#allocation6_spill] sm:$0xff] %v6838_v23  ;;  %v9212_v32 = vld [vmem:[#allocation12_spill] sm:$0xff]  ;;  %v9214_v59 = vld [vmem:[#allocation13_spill] sm:$0xff] }
 0x1d7   : > { %v6846_v60 = vmul.f32 %v9212_v32, %v6476_v43  ;;  %v6850_v33 = vmul.f32 %v9214_v59, %v6479_v18  ;;  %v542_v23 = vmul.f32 %v9217_v19, %v6367_v51  ;;  %v6876_v19 = vmul.f32 %v6372_v17, %v6429_v56 }
 0x1d8   : > { %v6814_v13 = vpop.permute.xlu1 %5187  ;;  %v6896_v17 = vmul.f32 %v6416_v0, %v6326_v5  ;;  %v6900_v56 = vmul.f32 %v6418_v28, %v6479_v18  ;;  %v6916_v0 = vmul.f32 %v6466_v37, %v6500_v30  ;;  %v6920_v28 = vmul.f32 %v6485_v57, %v6340_v42 }
 0x1d9   : > { %9199 = vst [vmem:[#allocation66_spill] sm:$0xff] %v6814_v13  ;;  %v9206_v13 = vld [vmem:[#allocation8_spill] sm:$0xff]  ;;  %9213 = vst [vmem:[#allocation7_spill] sm:$0xff] %v6846_v60  ;;  %v9220_v60 = vld [vmem:[#allocation18_spill] sm:$0xff]  ;;  %v5055_v18 = vunpack.i.h.bf16 %v6643_v21  ;;  %v6935_v37 = vmul.f32 %v6519_v25, %v6362_v2  ;;  %v6939_v57 = vmul.f32 %v6531_v54, %v6503_v41  ;;  %v5075_v25 = vunpack.i.h.bf16 %v6656_v40 }
 0x1da   : > { %1835 = vperm.xlu0 %5288, %v6774_v38   ;;  %1823 = vperm.xlu1 %5289, %v6738_v15   ;;  %v6834_v10 = vmul.f32 %v9206_v13, %v6456_v34  ;;  %v539_v38 = vmul.f32 %v9210_v29, %v6340_v42  ;;  %v9211_v15 = vld [vmem:[#allocation11_spill] sm:$0xff]  ;;  %9215 = vst [vmem:[#allocation8_spill] sm:$0xff] %v6850_v33  ;;  %v9216_v13 = vld [vmem:[#allocation14_spill] sm:$0xff]  ;;  %v5095_v54 = vunpack.i.h.bf16 %v6687_v49 }
 0x1db   : > { %v538_v46 = vmul.f32 %v9211_v15, %v6343_v3  ;;  %v6858_v29 = vmul.f32 %v9218_v61, %v6503_v41  ;;  %v9219_v15 = vld [vmem:[#allocation17_spill] sm:$0xff]  ;;  %v6868_v59 = vmul.f32 %v9220_v60, %v6382_v39  ;;  %v9222_v33 = vld [vmem:[#allocation19_spill] sm:$0xff]  ;;  %v6882_v61 = vmul.f32 %v6388_v6, %v6459_v27  ;;  %9224 = vst [vmem:[#allocation11_spill] sm:$0xff] %v6916_v0 }
 0x1dc   : > { %9207 = vst [vmem:[#allocation5_spill] sm:$0xff] %v6834_v10  ;;  %v543_v10 = vmul.f32 %v9216_v13, %v6362_v2  ;;  %v6862_v22 = vmul.f32 %v9219_v15, %v6500_v30  ;;  %v6864_v32 = vpop.permute.xlu1 %5197  ;;  %v6872_v13 = vmul.f32 %v9222_v33, %v6385_v4  ;;  %v6886_v60 = vmul.f32 %v6400_v8, %v6426_v24  ;;  %v6892_v15 = vpop.permute.xlu0 %5182 }
 0x1dd   : > { %9221 = vst [vmem:[#allocation9_spill] sm:$0xff] %v6868_v59  ;;  %v6890_v33 = vmul.f32 %v6402_v63, %v6343_v3  ;;  %v6904_v6 = vmul.f32 %v6438_v55, %v6329_v11  ;;  %v6908_v8 = vmul.f32 %v6440_v45, %v6367_v51  ;;  %v6912_v63 = vmul.f32 %v6464_v52, %v6456_v34  ;;  %v9236_v5 = vld [vmem:[#allocation6_spill] sm:$0xff]  ;;  %v9249_v59 = vld [vmem:[#allocation63_spill] sm:$0xff] }
 0x1de   : > { %9223 = vst [vmem:[#allocation10_spill] sm:$0xff] %v6872_v13  ;;  %1843 = vperm.xlu0 %5288, %v6784_v12   ;;  %1831 = vperm.xlu1 %5289, %v6752_v48   ;;  %v6924_v55 = vmul.f32 %v6487_v20, %v6385_v4  ;;  %v6928_v45 = vmul.f32 %v6505_v47, %v6476_v43  ;;  %v5054_v52 = vunpack.i.l.bf16 %v6643_v21  ;;  %v5685_v27 = vmov 10  }
 0x1df   : > { %v5065_v20 = vunpack.i.h.bf16 %v6650_v7  ;;  %v5064_v47 = vunpack.i.l.bf16 %v6650_v7  ;;  %v6950_v21 = vmul.f32 %v6545_v44, %v6382_v39  ;;  %v5074_v34 = vunpack.i.l.bf16 %v6656_v40 }
 0x1e0   : > { %9225 = vst [vmem:[#allocation12_spill] sm:$0xff] %v6924_v55  ;;  %v6943_v30 = vpop.permute.xlu0 %5192  ;;  %v6945_v43 = vpop.permute.xlu1 %5207  ;;  %v5094_v41 = vunpack.i.l.bf16 %v6687_v49  ;;  %v5105_v7 = vunpack.i.h.bf16 %v6715_v50  ;;  %v5104_v24 = vunpack.i.l.bf16 %v6715_v50  ;;  %v1495_v4 = vsel %vm262_vm0, %v535_v1, %v5055_v18 }
 0x1e1   : > { %9226 = vst [vmem:[#allocation13_spill] sm:$0xff] %v6950_v21  ;;  %v1494_v51 = vsel %vm262_vm0, %v534_v9, %v5054_v52  ;;  %v5115_v44 = vunpack.i.h.bf16 %v6733_v53  ;;  %v5114_v39 = vunpack.i.l.bf16 %v6733_v53  ;;  %v1499_v40 = vsel %vm262_vm0, %v539_v38, %v5065_v20  ;;  %v9243_v21 = vld [vmem:[#allocation28_spill] sm:$0xff] }
 0x1e2   : > { %5291 = vset.pattern.permute.xlu0 %v5685_v27  ;;  %1839 = vperm.xlu1 %5289, %v6768_v35   ;;  %v1498_v2 = vsel %vm262_vm0, %v538_v46, %v5064_v47  ;;  %v5050_v3 = vunpack.i.h.bf16 %v6660_v14  ;;  %v5049_v49 = vunpack.i.l.bf16 %v6660_v14  ;;  %v1503_v18 = vsel %vm262_vm0, %v543_v10, %v5075_v25  ;;  %v9229_v25 = vld [vmem:[#allocation23_spill] sm:$0xff] }
 0x1e3   : > { %1867 = vperm.xlu0 %5291, %v6676_v36   ;;  %v1502_v9 = vsel %vm262_vm0, %v542_v23, %v5074_v34  ;;  %v1511_v53 = vsel %vm1508_vm1, %v1494_v51, %v5094_v41  ;;  %v1512_v1 = vsel %vm1508_vm1, %v1495_v4, %v5095_v54  ;;  %v1515_v14 = vsel %vm1508_vm1, %v1498_v2, %v5104_v24  ;;  %v9227_v51 = vld [vmem:[#allocation4_spill] sm:$0xff]  ;;  %v9228_v41 = vld [vmem:[#allocation57_spill] sm:$0xff] }
 0x1e4   : > { %v6966_v42 = vpop.permute.xlu0 %5202  ;;  %v1516_v38 = vsel %vm1508_vm1, %v1499_v40, %v5105_v7  ;;  %v6978_v46 = vpop.permute.xlu1 %5217  ;;  %v1519_v52 = vsel %vm1508_vm1, %v1502_v9, %v5114_v39  ;;  %v1520_v10 = vsel %vm1508_vm1, %v1503_v18, %v5115_v44  ;;  %v5060_v34 = vunpack.i.h.bf16 %v6671_v58  ;;  %v9230_v39 = vld [vmem:[#allocation34_spill] sm:$0xff]  ;;  %v9231_v54 = vld [vmem:[#allocation20_spill] sm:$0xff]  ;;  %v9232_v44 = vld [vmem:[#allocation59_spill] sm:$0xff] }
 0x1e5   : > { %v5059_v23 = vunpack.i.l.bf16 %v6671_v58  ;;  %v1493_v20 = vsel %vm262_vm0, %v6830_v31, %v5050_v3  ;;  %v1492_v4 = vsel %vm262_vm0, %v9227_v51, %v5049_v49  ;;  %v5135_v2 = vunpack.i.h.bf16 %v9228_v41  ;;  %v9234_v9 = vld [vmem:[#allocation22_spill] sm:$0xff]  ;;  %v9235_v50 = vld [vmem:[#allocation5_spill] sm:$0xff] }
 0x1e6   : > { %5290 = vset.pattern.permute.xlu1 %v5685_v27  ;;  %v5134_v24 = vunpack.i.l.bf16 %v9228_v41  ;;  %v5070_v7 = vunpack.i.h.bf16 %v9231_v54  ;;  %v5069_v58 = vunpack.i.l.bf16 %v9231_v54  ;;  %v5145_v40 = vunpack.i.h.bf16 %v9232_v44  ;;  %v9238_v18 = vld [vmem:[#allocation25_spill] sm:$0xff] }
 0x1e7   : > { %1879 = vperm.xlu0 %5291, %v6692_v16   ;;  %1863 = vperm.xlu1 %5290, %v6666_v26   ;;  %v5144_v3 = vunpack.i.l.bf16 %v9232_v44  ;;  %v5080_v51 = vunpack.i.h.bf16 %v9234_v9  ;;  %v5079_v41 = vunpack.i.l.bf16 %v9234_v9  ;;  %v1497_v27 = vsel %vm262_vm0, %v9235_v50, %v5060_v34  ;;  %v9239_v34 = vld [vmem:[#allocation27_spill] sm:$0xff] }
 0x1e8   : > { %v6990_v47 = vpop.permute.xlu0 %5212  ;;  %v1496_v11 = vsel %vm262_vm0, %v9236_v5, %v5059_v23  ;;  %v7009_v44 = vsel %vm1525_vm2, %v1511_v53, %v5134_v24  ;;  %v7012_v49 = vsel %vm1525_vm2, %v1512_v1, %v5135_v2  ;;  %v5090_v31 = vunpack.i.h.bf16 %v9238_v18  ;;  %v7018_v50 = vpop.permute.xlu1 %5227  ;;  %v9240_v5 = vld [vmem:[#allocation35_spill] sm:$0xff]  ;;  %v9242_v53 = vld [vmem:[#allocation8_spill] sm:$0xff] }
 0x1e9   : > { %v5089_v9 = vunpack.i.l.bf16 %v9238_v18  ;;  %v9241_v23 = vld [vmem:[#allocation7_spill] sm:$0xff]  ;;  %v1500_v24 = vsel %vm262_vm0, %v9242_v53, %v5069_v58  ;;  %v7027_v1 = vsel %vm1525_vm2, %v1515_v14, %v5144_v3  ;;  %v7030_v2 = vsel %vm1525_vm2, %v1516_v38, %v5145_v40 }
 0x1ea   : > { %v7034_v18 = vsel %vm262_vm0, %v6858_v29, %v5080_v51  ;;  %v5100_v13 = vunpack.i.h.bf16 %v9243_v21  ;;  %v9244_v58 = vld [vmem:[#allocation67_spill] sm:$0xff]  ;;  %v1510_v3 = vsel %vm1508_vm1, %v1493_v20, %v5090_v31  ;;  %v9245_v51 = vld [vmem:[#allocation32_spill] sm:$0xff]  ;;  %v5169_v20 = vunpack.i.l.bf16 %v9249_v59 }
 0x1eb   : > { %1887 = vperm.xlu0 %5291, %v9229_v25   ;;  %1871 = vperm.xlu1 %5290, %v9230_v39   ;;  %v9237_v25 = vld [vmem:[#allocation62_spill] sm:$0xff]  ;;  %v5175_v38 = vunpack.i.h.bf16 %v9244_v58  ;;  %v5174_v40 = vunpack.i.l.bf16 %v9244_v58  ;;  %v1509_v29 = vsel %vm1508_vm1, %v1492_v4, %v5089_v9  ;;  %v5170_v4 = vunpack.i.h.bf16 %v9249_v59  ;;  %v9250_v58 = vld [vmem:[#allocation56_spill] sm:$0xff] }
 0x1ec   : > { %v5155_v54 = vunpack.i.h.bf16 %v9237_v25  ;;  %v5154_v16 = vunpack.i.l.bf16 %v9237_v25  ;;  %v7016_v55 = vpop.permute.xlu0 %5222  ;;  %v1501_v25 = vsel %vm262_vm0, %v9241_v23, %v5070_v7  ;;  %v5099_v7 = vunpack.i.l.bf16 %v9243_v21 }
 0x1ed   : > { %v7066_v9 = vsel %vm1508_vm1, %v1497_v27, %v5100_v13  ;;  %v1545_v62 = vsel %vm262_vm0, %v6904_v6, %v5175_v38  ;;  %v5129_v59 = vunpack.i.l.bf16 %v9250_v58  ;;  %v9251_v27 = vld [vmem:[#allocation54_spill] sm:$0xff]  ;;  %v1543_v38 = vsel %vm262_vm0, %v6876_v19, %v5170_v4 }
 0x1ee   : > { %v7041_v23 = vsel %vm1525_vm2, %v1519_v52, %v5154_v16  ;;  %v7044_v14 = vsel %vm1525_vm2, %v1520_v10, %v5155_v54  ;;  %v7054_v21 = vpop.permute.xlu1 %5237  ;;  %v9246_v16 = vld [vmem:[#allocation29_spill] sm:$0xff]  ;;  %v9247_v52 = vld [vmem:[#allocation24_spill] sm:$0xff]  ;;  %v7063_v31 = vsel %vm1508_vm1, %v1496_v11, %v5099_v7  ;;  %v1544_v54 = vsel %vm262_vm0, %v6896_v17, %v5174_v40  ;;  %v9253_v6 = vld [vmem:[#allocation26_spill] sm:$0xff] }
 0x1ef   : > { %1895 = vperm.xlu0 %5291, %v9239_v34   ;;  %1875 = vperm.xlu1 %5290, %v9240_v5   ;;  %v1504_v34 = vsel %vm262_vm0, %v6862_v22, %v5079_v41  ;;  %v5110_v22 = vunpack.i.h.bf16 %v9245_v51  ;;  %v5109_v41 = vunpack.i.l.bf16 %v9245_v51  ;;  %v5210_v51 = vunpack.i.h.bf16 %v6945_v43 }
 0x1f0   : > { %v7052_v53 = vpop.permute.xlu0 %5232  ;;  %v5130_v10 = vunpack.i.h.bf16 %v9250_v58  ;;  %v5120_v7 = vunpack.i.h.bf16 %v9251_v27  ;;  %v5185_v4 = vunpack.i.h.bf16 %v6892_v15 }
 0x1f1   : > { %v7077_v11 = vsel %vm1508_vm1, %v1500_v24, %v5109_v41  ;;  %v7080_v13 = vsel %vm1508_vm1, %v1501_v25, %v5110_v22  ;;  %v1542_v24 = vsel %vm262_vm0, %v6886_v60, %v5169_v20  ;;  %v5215_v22 = vunpack.i.h.bf16 %v6990_v47 }
 0x1f2   : > { %v5214_v41 = vunpack.i.l.bf16 %v6990_v47 }
 0x1f3   : > { %1903 = vperm.xlu0 %5291, %v9246_v16   ;;  %1883 = vperm.xlu1 %5290, %v9247_v52   ;;  %v5209_v16 = vunpack.i.l.bf16 %v6945_v43  ;;  %v5119_v43 = vunpack.i.l.bf16 %v9251_v27  ;;  %v1559_v27 = vsel %vm1508_vm1, %v1543_v38, %v5210_v51  ;;  %v9255_v51 = vld [vmem:[#allocation65_spill] sm:$0xff] }
 0x1f4   : > { %v7084_v39 = vpop.permute.xlu0 %5242  ;;  %v1560_v38 = vsel %vm1508_vm1, %v1544_v54, %v5214_v41  ;;  %v9257_v41 = vld [vmem:[#allocation52_spill] sm:$0xff] }
 0x1f5   : > { %9252 = vst [vmem:[#allocation14_spill] sm:$0xff] %v7084_v39  ;;  %v1558_v58 = vsel %vm1508_vm1, %v1542_v24, %v5209_v16  ;;  %v1527_v39 = vsel %vm1525_vm2, %v1510_v3, %v5130_v10  ;;  %v7101_v60 = vsel %vm1508_vm1, %v1504_v34, %v5119_v43  ;;  %v9254_v16 = vld [vmem:[#allocation30_spill] sm:$0xff]  ;;  %v5179_v3 = vunpack.i.l.bf16 %v9255_v51 }
 0x1f6   : > { %v1561_v34 = vsel %vm1508_vm1, %v1545_v62, %v5215_v22  ;;  %v5220_v43 = vunpack.i.h.bf16 %v6978_v46  ;;  %v5184_v62 = vunpack.i.l.bf16 %v6892_v15  ;;  %v5686_v22 = vmov 11  }
 0x1f7   : > { %1911 = vperm.xlu0 %5291, %v6752_v48   ;;  %1891 = vperm.xlu1 %5290, %v9253_v6   ;;  %v5248_v17 = vpop.permute.xlu1 %5247  ;;  %v1526_v48 = vsel %vm1525_vm2, %v1509_v29, %v5129_v59  ;;  %v5180_v29 = vunpack.i.h.bf16 %v9255_v51  ;;  %v5225_v15 = vunpack.i.h.bf16 %v7016_v55 }
 0x1f8   : > { %v5250_v40 = vunpack.i.h.bf16 %v5248_v17  ;;  %v5249_v25 = vunpack.i.l.bf16 %v5248_v17 }
 0x1fa   : > { %v1574_v0 = vsel %vm1525_vm2, %v1558_v58, %v5249_v25  ;;  %v1575_v19 = vsel %vm1525_vm2, %v1559_v27, %v5250_v40  ;;  %v7118_v58 = vsel %vm1508_vm1, %v7034_v18, %v5120_v7 }
 0x1fb   : > { %v4910_v20 = vpack.c.bf16 %v1574_v0, %v1526_v48  ;;  %v4911_v17 = vpack.c.bf16 %v1575_v19, %v1527_v39  ;;  %1919 = vperm.xlu0 %5291, %v6768_v35   ;;  %v5253_v47 = vpop.permute.xlu0 %5252  ;;  %1899 = vperm.xlu1 %5290, %v9254_v16   ;;  %v5219_v48 = vunpack.i.l.bf16 %v6978_v46  ;;  %v9256_v0 = vld [vmem:[#allocation58_spill] sm:$0xff]  ;;  %v1547_v19 = vsel %vm262_vm0, %v6912_v63, %v5180_v29 }
 0x1fc   : > { %v5255_v10 = vunpack.i.h.bf16 %v5253_v47  ;;  %v5254_v59 = vunpack.i.l.bf16 %v5253_v47  ;;  %v5140_v39 = vunpack.i.h.bf16 %v9256_v0  ;;  %v5139_v24 = vunpack.i.l.bf16 %v9256_v0 }
 0x1fd   : > { %1686 = vst [vmem:[#allocation2] sm:$0xff] %v4910_v20  ;;  %1687 = vst [vmem:[#allocation2 + $0x8] sm:$0xff] %v4911_v17  ;;  %v1546_v20 = vsel %vm262_vm0, %v6882_v61, %v5179_v3  ;;  %v1563_v17 = vsel %vm1508_vm1, %v1547_v19, %v5220_v43  ;;  %v1549_v29 = vsel %vm262_vm0, %v6920_v28, %v5185_v4  ;;  %v5230_v4 = vunpack.i.h.bf16 %v7018_v50 }
 0x1fe   : > { %v1576_v40 = vsel %vm1525_vm2, %v1560_v38, %v5254_v59  ;;  %v1577_v25 = vsel %vm1525_vm2, %v1561_v34, %v5255_v10  ;;  %v1530_v63 = vsel %vm1525_vm2, %v7063_v31, %v5139_v24  ;;  %v1531_v61 = vsel %vm1525_vm2, %v7066_v9, %v5140_v39  ;;  %v9258_v38 = vld [vmem:[#allocation55_spill] sm:$0xff]  ;;  %v9259_v34 = vld [vmem:[#allocation66_spill] sm:$0xff]  ;;  %v9260_v39 = vld [vmem:[#allocation60_spill] sm:$0xff] }
 0x1ff   : > { %v4912_v54 = vpack.c.bf16 %v1576_v40, %v7009_v44  ;;  %v4913_v46 = vpack.c.bf16 %v1577_v25, %v7012_v49  ;;  %5292 = vset.pattern.permute.xlu0 %v5686_v22  ;;  %1907 = vperm.xlu1 %5290, %v9257_v41   ;;  %v5258_v27 = vpop.permute.xlu1 %5257  ;;  %v5224_v49 = vunpack.i.l.bf16 %v7016_v55  ;;  %v1562_v44 = vsel %vm1508_vm1, %v1546_v20, %v5219_v48 }
 0x200   : > { %v5260_v18 = vunpack.i.h.bf16 %v5258_v27  ;;  %v5259_v7 = vunpack.i.l.bf16 %v5258_v27  ;;  %1943 = vperm.xlu0 %5292, %v6666_v26   ;;  %v1548_v55 = vsel %vm262_vm0, %v6890_v33, %v5184_v62  ;;  %v5190_v31 = vunpack.i.h.bf16 %v9259_v34 }
 0x201   : > { %1688 = vst [vmem:[#allocation2 + $0x10] sm:$0xff] %v4912_v54  ;;  %1689 = vst [vmem:[#allocation2 + $0x18] sm:$0xff] %v4913_v46  ;;  %v5189_v43 = vunpack.i.l.bf16 %v9259_v34  ;;  %v1564_v0 = vsel %vm1508_vm1, %v1548_v55, %v5224_v49  ;;  %v1565_v28 = vsel %vm1508_vm1, %v1549_v29, %v5225_v15  ;;  %v5229_v33 = vunpack.i.l.bf16 %v7018_v50 }
 0x202   : > { %v1578_v47 = vsel %vm1525_vm2, %v1562_v44, %v5259_v7  ;;  %v1579_v51 = vsel %vm1525_vm2, %v1563_v17, %v5260_v18  ;;  %v5150_v24 = vunpack.i.h.bf16 %v9260_v39  ;;  %v5149_v40 = vunpack.i.l.bf16 %v9260_v39 }
 0x203   : > { %v4914_v3 = vpack.c.bf16 %v1578_v47, %v1530_v63  ;;  %v4915_v10 = vpack.c.bf16 %v1579_v51, %v1531_v61  ;;  %v5263_v59 = vpop.permute.xlu0 %5262  ;;  %1915 = vperm.xlu1 %5290, %v9258_v38   ;;  %v5195_v54 = vunpack.i.h.bf16 %v6943_v30  ;;  %v5194_v46 = vunpack.i.l.bf16 %v6943_v30 }
 0x204   : > { %v5265_v9 = vunpack.i.h.bf16 %v5263_v59  ;;  %v5264_v48 = vunpack.i.l.bf16 %v5263_v59  ;;  %1955 = vperm.xlu0 %5292, %v9240_v5   ;;  %v1551_v20 = vsel %vm262_vm0, %v6928_v45, %v5190_v31  ;;  %v1550_v18 = vsel %vm262_vm0, %v6900_v56, %v5189_v43 }
 0x205   : > { %1690 = vst [vmem:[#allocation2 + $0x20] sm:$0xff] %v4914_v3  ;;  %1691 = vst [vmem:[#allocation2 + $0x28] sm:$0xff] %v4915_v10  ;;  %v1566_v49 = vsel %vm1508_vm1, %v1550_v18, %v5229_v33  ;;  %v1567_v30 = vsel %vm1508_vm1, %v1551_v20, %v5230_v4  ;;  %v1534_v45 = vsel %vm1525_vm2, %v7077_v11, %v5149_v40  ;;  %v5200_v11 = vunpack.i.h.bf16 %v6864_v32  ;;  %v9262_v4 = vld [vmem:[#allocation11_spill] sm:$0xff]  ;;  %v9263_v40 = vld [vmem:[#allocation34_spill] sm:$0xff] }
 0x206   : > { %v1580_v25 = vsel %vm1525_vm2, %v1564_v0, %v5264_v48  ;;  %v1581_v62 = vsel %vm1525_vm2, %v1565_v28, %v5265_v9  ;;  %v1535_v56 = vsel %vm1525_vm2, %v7080_v13, %v5150_v24  ;;  %v1553_v63 = vsel %vm262_vm0, %v6935_v37, %v5195_v54  ;;  %v9267_v20 = vld [vmem:[#allocation9_spill] sm:$0xff] }
 0x207   : > { %v4916_v27 = vpack.c.bf16 %v1580_v25, %v7027_v1  ;;  %v4917_v19 = vpack.c.bf16 %v1581_v62, %v7030_v2  ;;  %1923 = vperm.xlu1 %5290, %v6784_v12   ;;  %v5268_v50 = vpop.permute.xlu1 %5267  ;;  %v5235_v1 = vunpack.i.h.bf16 %v7052_v53  ;;  %v5234_v2 = vunpack.i.l.bf16 %v7052_v53 }
 0x208   : > { %v5270_v7 = vunpack.i.h.bf16 %v5268_v50  ;;  %v5269_v15 = vunpack.i.l.bf16 %v5268_v50  ;;  %1963 = vperm.xlu0 %5292, %v9247_v52   ;;  %v1552_v61 = vsel %vm262_vm0, %v6908_v8, %v5194_v46  ;;  %v5199_v29 = vunpack.i.l.bf16 %v6864_v32 }
 0x209   : > { %1692 = vst [vmem:[#allocation2 + $0x30] sm:$0xff] %v4916_v27  ;;  %1693 = vst [vmem:[#allocation2 + $0x38] sm:$0xff] %v4917_v19  ;;  %v1568_v37 = vsel %vm1508_vm1, %v1552_v61, %v5234_v2  ;;  %v1569_v3 = vsel %vm1508_vm1, %v1553_v63, %v5235_v1  ;;  %v5240_v8 = vunpack.i.h.bf16 %v7054_v21  ;;  %v5239_v10 = vunpack.i.l.bf16 %v7054_v21  ;;  %v9265_v19 = vld [vmem:[#allocation31_spill] sm:$0xff]  ;;  %v9270_v2 = vld [vmem:[#allocation13_spill] sm:$0xff] }
 0x20a   : > { %v1582_v44 = vsel %vm1525_vm2, %v1566_v49, %v5269_v15  ;;  %v1583_v17 = vsel %vm1525_vm2, %v1567_v30, %v5270_v7  ;;  %v5205_v43 = vunpack.i.h.bf16 %v6966_v42  ;;  %v5204_v9 = vunpack.i.l.bf16 %v6966_v42  ;;  %v9269_v15 = vld [vmem:[#allocation10_spill] sm:$0xff]  ;;  %v9272_v63 = vld [vmem:[#allocation21_spill] sm:$0xff] }
 0x20b   : > { %v4918_v47 = vpack.c.bf16 %v1582_v44, %v1534_v45  ;;  %v4919_v53 = vpack.c.bf16 %v1583_v17, %v1535_v56  ;;  %v5273_v51 = vpop.permute.xlu0 %5272  ;;  %5293 = vset.pattern.permute.xlu1 %v5686_v22  ;;  %v9261_v22 = vld [vmem:[#allocation61_spill] sm:$0xff]  ;;  %v1555_v21 = vsel %vm262_vm0, %v6939_v57, %v5200_v11  ;;  %v1554_v33 = vsel %vm262_vm0, %v9262_v4, %v5199_v29  ;;  %v9271_v45 = vld [vmem:[#allocation12_spill] sm:$0xff] }
 0x20c   : > { %v5275_v13 = vunpack.i.h.bf16 %v5273_v51  ;;  %v5274_v55 = vunpack.i.l.bf16 %v5273_v51  ;;  %1971 = vperm.xlu0 %5292, %v9253_v6   ;;  %1947 = vperm.xlu1 %5293, %v6676_v36   ;;  %v5160_v59 = vunpack.i.h.bf16 %v9261_v22  ;;  %v5159_v32 = vunpack.i.l.bf16 %v9261_v22  ;;  %v9273_v61 = vld [vmem:[#allocation53_spill] sm:$0xff] }
 0x20d   : > { %1694 = vst [vmem:[#allocation2 + $0x40] sm:$0xff] %v4918_v47  ;;  %1695 = vst [vmem:[#allocation2 + $0x48] sm:$0xff] %v4919_v53  ;;  %v1570_v25 = vsel %vm1508_vm1, %v1554_v33, %v5239_v10  ;;  %v1571_v42 = vsel %vm1508_vm1, %v1555_v21, %v5240_v8  ;;  %v9266_v50 = vunpack.i.h.bf16 %v9265_v19  ;;  %v9268_v7 = vunpack.i.l.bf16 %v9265_v19  ;;  %v9285_v4 = vld [vmem:[#allocation33_spill] sm:$0xff] }
 0x20e   : > { %v1584_v34 = vsel %vm1525_vm2, %v1568_v37, %v5274_v55  ;;  %v1585_v31 = vsel %vm1525_vm2, %v1569_v3, %v5275_v13  ;;  %v1538_v57 = vsel %vm1525_vm2, %v7101_v60, %v5159_v32  ;;  %v1539_v54 = vsel %vm1525_vm2, %v7118_v58, %v5160_v59  ;;  %v9276_v55 = vld [vmem:[#allocation64_spill] sm:$0xff] }
 0x20f   : > { %v4920_v48 = vpack.c.bf16 %v1584_v34, %v7041_v23  ;;  %v4921_v0 = vpack.c.bf16 %v1585_v31, %v7044_v14  ;;  %v5278_v28 = vpop.permute.xlu1 %5277  ;;  %v9264_v23 = vld [vmem:[#allocation14_spill] sm:$0xff]  ;;  %v1507_v18 = vsel %vm262_vm0, %v9267_v20, %v9266_v50  ;;  %v1506_v49 = vsel %vm262_vm0, %v9269_v15, %v9268_v7  ;;  %v9279_v31 = vld [vmem:[#allocation23_spill] sm:$0xff] }
 0x210   : > { %v5280_v39 = vunpack.i.h.bf16 %v5278_v28  ;;  %v5279_v24 = vunpack.i.l.bf16 %v5278_v28  ;;  %1979 = vperm.xlu0 %5292, %v9254_v16   ;;  %1951 = vperm.xlu1 %5293, %v9263_v40   ;;  %v5245_v62 = vunpack.i.h.bf16 %v9264_v23  ;;  %v5244_v14 = vunpack.i.l.bf16 %v9264_v23 }
 0x211   : > { %1696 = vst [vmem:[#allocation2 + $0x50] sm:$0xff] %v4920_v48  ;;  %1697 = vst [vmem:[#allocation2 + $0x58] sm:$0xff] %v4921_v0  ;;  %v1557_v58 = vsel %vm262_vm0, %v9270_v2, %v5205_v43  ;;  %v1556_v56 = vsel %vm262_vm0, %v9271_v45, %v5204_v9  ;;  %v9274_v47 = vunpack.i.l.bf16 %v9273_v61  ;;  %v9275_v51 = vunpack.i.h.bf16 %v9273_v61  ;;  %v9280_v43 = vld [vmem:[#allocation27_spill] sm:$0xff]  ;;  %v9282_v0 = vld [vmem:[#allocation29_spill] sm:$0xff] }
 0x212   : > { %v1586_v46 = vsel %vm1525_vm2, %v1570_v25, %v5279_v24  ;;  %v1587_v27 = vsel %vm1525_vm2, %v1571_v42, %v5280_v39  ;;  %v1572_v29 = vsel %vm1508_vm1, %v1556_v56, %v5244_v14  ;;  %v1573_v13 = vsel %vm1508_vm1, %v1557_v58, %v5245_v62 }
 0x213   : > { %v4922_v30 = vpack.c.bf16 %v1586_v46, %v1538_v57  ;;  %v4923_v1 = vpack.c.bf16 %v1587_v27, %v1539_v54  ;;  %v5283_v60 = vpop.permute.xlu0 %5282  ;;  %v1523_v53 = vsel %vm1508_vm1, %v1506_v49, %v9274_v47  ;;  %v1524_v11 = vsel %vm1508_vm1, %v1507_v18, %v9275_v51 }
 0x214   : > { %v5285_v44 = vunpack.i.h.bf16 %v5283_v60  ;;  %v5284_v17 = vunpack.i.l.bf16 %v5283_v60  ;;  %1987 = vperm.xlu0 %5292, %v9257_v41   ;;  %1959 = vperm.xlu1 %5293, %v9272_v63   ;;  %v9277_v37 = vunpack.i.l.bf16 %v9276_v55  ;;  %v9278_v8 = vunpack.i.h.bf16 %v9276_v55 }
 0x215   : > { %1698 = vst [vmem:[#allocation2 + $0x60] sm:$0xff] %v4922_v30  ;;  %1699 = vst [vmem:[#allocation2 + $0x68] sm:$0xff] %v4923_v1  ;;  %v5687_v48 = vmov 12   ;;  %v5688_v50 = vmov 13  }
 0x216   : > { %v1540_v3 = vsel %vm1525_vm2, %v1523_v53, %v9277_v37  ;;  %v1541_v10 = vsel %vm1525_vm2, %v1524_v11, %v9278_v8  ;;  %v1588_v22 = vsel %vm1525_vm2, %v1572_v29, %v5284_v17  ;;  %v1589_v59 = vsel %vm1525_vm2, %v1573_v13, %v5285_v44 }
 0x217   : > { %v4924_v32 = vpack.c.bf16 %v1588_v22, %v1540_v3  ;;  %v4925_v34 = vpack.c.bf16 %v1589_v59, %v1541_v10  ;;  %v5689_v53 = vmov 14  }
 0x218   : > { %1995 = vperm.xlu0 %5292, %v9258_v38   ;;  %1967 = vperm.xlu1 %5293, %v9279_v31  }
 0x219   : > { %1700 = vst [vmem:[#allocation2 + $0x70] sm:$0xff] %v4924_v32  ;;  %1701 = vst [vmem:[#allocation2 + $0x78] sm:$0xff] %v4925_v34 }
 0x21c   : > { %2003 = vperm.xlu0 %5292, %v6784_v12   ;;  %1975 = vperm.xlu1 %5293, %v9280_v43   ;;  %v7247_v9 = vpop.permute.xlu1 %1703 }
 0x21d   : > { %9281 = vst [vmem:[#allocation15_spill] sm:$0xff] %v7247_v9 }
 0x220   : > { %5295 = vset.pattern.permute.xlu0 %v5687_v48  ;;  %1983 = vperm.xlu1 %5293, %v9282_v0   ;;  %v7250_v28 = vpop.permute.xlu1 %1711  ;;  %v7252_v21 = vpop.permute.xlu0 %1707 }
 0x221   : > { %9283 = vst [vmem:[#allocation16_spill] sm:$0xff] %v7250_v28  ;;  %9284 = vst [vmem:[#allocation17_spill] sm:$0xff] %v7252_v21  ;;  %2027 = vperm.xlu0 %5295, %v6676_v36   ;;  %v9294_v28 = vld [vmem:[#allocation37_spill] sm:$0xff] }
 0x224   : > { %1991 = vperm.xlu1 %5293, %v9285_v4   ;;  %v7256_v33 = vpop.permute.xlu1 %1715  ;;  %v7258_v39 = vpop.permute.xlu0 %1719 }
 0x225   : > { %9286 = vst [vmem:[#allocation18_spill] sm:$0xff] %v7256_v33  ;;  %9287 = vst [vmem:[#allocation19_spill] sm:$0xff] %v7258_v39  ;;  %2039 = vperm.xlu0 %5295, %v9272_v63  }
 0x228   : > { %1999 = vperm.xlu1 %5293, %v6768_v35   ;;  %v7262_v24 = vpop.permute.xlu1 %1723  ;;  %v7264_v25 = vpop.permute.xlu0 %1727 }
 0x229   : > { %9288 = vst [vmem:[#allocation4_spill] sm:$0xff] %v7262_v24  ;;  %2047 = vperm.xlu0 %5295, %v9279_v31  }
 0x22c   : > { %5294 = vset.pattern.permute.xlu1 %v5687_v48  ;;  %v7267_v42 = vpop.permute.xlu1 %1731  ;;  %v7269_v23 = vpop.permute.xlu0 %1735 }
 0x22d   : > { %9289 = vst [vmem:[#allocation57_spill] sm:$0xff] %v7269_v23  ;;  %2055 = vperm.xlu0 %5295, %v9280_v43   ;;  %2023 = vperm.xlu1 %5294, %v6666_v26   ;;  %v9296_v23 = vld [vmem:[#allocation38_spill] sm:$0xff] }
 0x230   : > { %v7273_v62 = vpop.permute.xlu1 %1739  ;;  %v7275_v14 = vpop.permute.xlu0 %1743 }
 0x231   : > { %9290 = vst [vmem:[#allocation20_spill] sm:$0xff] %v7273_v62  ;;  %2063 = vperm.xlu0 %5295, %v9282_v0   ;;  %2031 = vperm.xlu1 %5294, %v9263_v40  }
 0x234   : > { %v7279_v57 = vpop.permute.xlu1 %1747  ;;  %v7281_v54 = vpop.permute.xlu0 %1751 }
 0x235   : > { %9291 = vst [vmem:[#allocation59_spill] sm:$0xff] %v7281_v54  ;;  %2071 = vperm.xlu0 %5295, %v9285_v4   ;;  %2035 = vperm.xlu1 %5294, %v9240_v5  }
 0x238   : > { %v7285_v46 = vpop.permute.xlu1 %1755  ;;  %v7287_v27 = vpop.permute.xlu0 %1759 }
 0x239   : > { %9292 = vst [vmem:[#allocation22_spill] sm:$0xff] %v7285_v46  ;;  %2079 = vperm.xlu0 %5295, %v6768_v35   ;;  %2043 = vperm.xlu1 %5294, %v9247_v52  }
 0x23c   : > { %v7291_v19 = vpop.permute.xlu1 %1763 }
 0x23d   : > { %9293 = vst [vmem:[#allocation5_spill] sm:$0xff] %v7291_v19  ;;  %5296 = vset.pattern.permute.xlu0 %v5688_v50  ;;  %v7293_v20 = vpop.permute.xlu0 %1783  ;;  %2051 = vperm.xlu1 %5294, %v9253_v6   ;;  %v9299_v19 = vld [vmem:[#allocation40_spill] sm:$0xff] }
 0x23e   : > { %2103 = vperm.xlu0 %5296, %v6666_v26  }
 0x241   : > { %v7297_v18 = vpop.permute.xlu0 %1795  ;;  %2059 = vperm.xlu1 %5294, %v9254_v16   ;;  %v7300_v7 = vpop.permute.xlu1 %1787 }
 0x242   : > { %2115 = vperm.xlu0 %5296, %v9240_v5   ;;  %v1849_v9 = vmul.f32 %v7297_v18, %v9294_v28 }
 0x245   : > { %v7303_v15 = vpop.permute.xlu0 %1803  ;;  %2067 = vperm.xlu1 %5294, %v9257_v41   ;;  %v7306_v49 = vpop.permute.xlu1 %1791 }
 0x246   : > { %2123 = vperm.xlu0 %5296, %v9247_v52  }
 0x249   : > { %v7309_v30 = vpop.permute.xlu0 %1811  ;;  %2075 = vperm.xlu1 %5294, %v9258_v38   ;;  %v7312_v1 = vpop.permute.xlu1 %1799 }
 0x24a   : > { %2131 = vperm.xlu0 %5296, %v9253_v6   ;;  %v1853_v24 = vmul.f32 %v7309_v30, %v9296_v23  ;;  %v5560_v30 = vld [vmem:[%s9015_s1 + $0x20] sm:$0xff] }
 0x24d   : > { %v7315_v60 = vpop.permute.xlu0 %1819  ;;  %2083 = vperm.xlu1 %5294, %v6784_v12   ;;  %v7318_v2 = vpop.permute.xlu1 %1807 }
 0x24e   : > { %2139 = vperm.xlu0 %5296, %v9254_v16  }
 0x251   : > { %v7321_v58 = vpop.permute.xlu0 %1827  ;;  %5297 = vset.pattern.permute.xlu1 %v5688_v50  ;;  %v7323_v45 = vpop.permute.xlu1 %1815 }
 0x252   : > { %2147 = vperm.xlu0 %5296, %v9257_v41   ;;  %2107 = vperm.xlu1 %5297, %v6676_v36  }
 0x255   : > { %v7327_v56 = vpop.permute.xlu0 %1835  ;;  %v7329_v44 = vpop.permute.xlu1 %1823 }
 0x256   : > { %2155 = vperm.xlu0 %5296, %v9258_v38   ;;  %2111 = vperm.xlu1 %5297, %v9263_v40  }
 0x259   : > { %v7333_v17 = vpop.permute.xlu1 %1831  ;;  %v7335_v61 = vpop.permute.xlu0 %1843 }
 0x25a   : > { %2163 = vperm.xlu0 %5296, %v6784_v12   ;;  %2119 = vperm.xlu1 %5297, %v9272_v63  }
 0x25d   : > { %v7339_v47 = vpop.permute.xlu1 %1839 }
 0x25e   : > { %5299 = vset.pattern.permute.xlu0 %v5689_v53  ;;  %2127 = vperm.xlu1 %5297, %v9279_v31   ;;  %v7342_v51 = vpop.permute.xlu0 %1867 }
 0x25f   : > { %2187 = vperm.xlu0 %5299, %v6676_v36  }
 0x262   : > { %2135 = vperm.xlu1 %5297, %v9280_v43   ;;  %v7346_v11 = vpop.permute.xlu1 %1863  ;;  %v7348_v29 = vpop.permute.xlu0 %1879 }
 0x263   : > { %2199 = vperm.xlu0 %5299, %v9272_v63  }
 0x266   : > { %2143 = vperm.xlu1 %5297, %v9282_v0   ;;  %v7352_v13 = vpop.permute.xlu1 %1871  ;;  %v7354_v55 = vpop.permute.xlu0 %1887 }
 0x267   : > { %2207 = vperm.xlu0 %5299, %v9279_v31   ;;  %v5690_v31 = vmov 15  }
 0x26a   : > { %2151 = vperm.xlu1 %5297, %v9285_v4   ;;  %v7358_v37 = vpop.permute.xlu1 %1875  ;;  %v7360_v3 = vpop.permute.xlu0 %1895 }
 0x26b   : > { %2215 = vperm.xlu0 %5299, %v9280_v43  }
 0x26e   : > { %2159 = vperm.xlu1 %5297, %v6768_v35   ;;  %v7364_v8 = vpop.permute.xlu1 %1883  ;;  %v7366_v63 = vpop.permute.xlu0 %1903 }
 0x26f   : > { %2223 = vperm.xlu0 %5299, %v9282_v0  }
 0x272   : > { %5298 = vset.pattern.permute.xlu1 %v5689_v53  ;;  %v7369_v10 = vpop.permute.xlu1 %1891  ;;  %v7371_v22 = vpop.permute.xlu0 %1911 }
 0x273   : > { %2231 = vperm.xlu0 %5299, %v9285_v4   ;;  %2183 = vperm.xlu1 %5298, %v6666_v26  }
 0x276   : > { %v7375_v59 = vpop.permute.xlu1 %1899  ;;  %v7377_v32 = vpop.permute.xlu0 %1919 }
 0x277   : > { %2239 = vperm.xlu0 %5299, %v6768_v35   ;;  %2191 = vperm.xlu1 %5298, %v9263_v40  }
 0x27a   : > { %v7381_v34 = vpop.permute.xlu1 %1907 }
 0x27b   : > { %5300 = vset.pattern.permute.xlu0 %v5690_v31  ;;  %v7383_v43 = vpop.permute.xlu0 %1943  ;;  %2195 = vperm.xlu1 %5298, %v9240_v5  }
 0x27c   : > { %2263 = vperm.xlu0 %5300, %v6666_v26  }
 0x27e   : > { %v7387_v48 = vpop.permute.xlu1 %1915 }
 0x27f   : > { %v7389_v0 = vpop.permute.xlu0 %1955  ;;  %2203 = vperm.xlu1 %5298, %v9247_v52  }
 0x280   : > { %2275 = vperm.xlu0 %5300, %v9240_v5  }
 0x282   : > { %v7393_v35 = vpop.permute.xlu1 %1923 }
 0x283   : > { %v7395_v4 = vpop.permute.xlu0 %1963  ;;  %2211 = vperm.xlu1 %5298, %v9253_v6  }
 0x284   : > { %2283 = vperm.xlu0 %5300, %v9247_v52  }
 0x287   : > { %v7399_v50 = vpop.permute.xlu0 %1971  ;;  %2219 = vperm.xlu1 %5298, %v9254_v16   ;;  %v7402_v26 = vpop.permute.xlu1 %1947 }
 0x288   : > { %2291 = vperm.xlu0 %5300, %v9253_v6  }
 0x28b   : > { %v7405_v53 = vpop.permute.xlu0 %1979  ;;  %2227 = vperm.xlu1 %5298, %v9257_v41   ;;  %v7408_v5 = vpop.permute.xlu1 %1951 }
 0x28c   : > { %2299 = vperm.xlu0 %5300, %v9254_v16   ;;  %v9295_v16 = vld [vmem:[#allocation36_spill] sm:$0xff] }
 0x28d   : > { %v1848_v46 = vmul.f32 %v7306_v49, %v9295_v16 }
 0x28f   : > { %v7411_v33 = vpop.permute.xlu0 %1987  ;;  %2235 = vperm.xlu1 %5298, %v9258_v38   ;;  %v7414_v52 = vpop.permute.xlu1 %1959 }
 0x290   : > { %2307 = vperm.xlu0 %5300, %v9257_v41   ;;  %v5307_v41 = vpack.i.bf16 %v1849_v9, %v1848_v46 }
 0x293   : > { %v7417_v21 = vpop.permute.xlu0 %1995  ;;  %2243 = vperm.xlu1 %5298, %v6784_v12   ;;  %v7420_v6 = vpop.permute.xlu1 %1967 }
 0x294   : > { %2315 = vperm.xlu0 %5300, %v9258_v38   ;;  %v9297_v38 = vld [vmem:[#allocation39_spill] sm:$0xff] }
 0x295   : > { %v1852_v39 = vmul.f32 %v7318_v2, %v9297_v38 }
 0x297   : > { %5301 = vset.pattern.permute.xlu1 %v5690_v31  ;;  %v7427_v54 = vpop.permute.xlu1 %1975  ;;  %v7429_v62 = vpop.permute.xlu0 %2003  ;;  %v5317_v31 = vpack.i.bf16 %v1853_v24, %v1852_v39 }
 0x298   : > { %2323 = vperm.xlu0 %5300, %v6784_v12   ;;  %2267 = vperm.xlu1 %5301, %v6676_v36   ;;  %v1857_v12 = vmul.f32 %v7321_v58, %v9299_v19  ;;  %v9300_v36 = vld [vmem:[#allocation41_spill] sm:$0xff]  ;;  %v9302_v58 = vld [vmem:[#allocation42_spill] sm:$0xff] }
 0x299   : > { %v1856_v9 = vmul.f32 %v7329_v44, %v9300_v36  ;;  %v1861_v44 = vmul.f32 %v7335_v61, %v9302_v58  ;;  %v5562_v61 = vld [vmem:[%s9015_s1 + $0x40] sm:$0xff] }
 0x29b   : > { %v7437_v18 = vpop.permute.xlu1 %1983 }
 0x29c   : > { %5308 = vrot.lane.b32.xlu0 %v5307_v41, %s5680_s9  ;;  %2271 = vperm.xlu1 %5301, %v9263_v40   ;;  %v7441_v49 = vpop.permute.xlu0 %2027  ;;  %v5327_v40 = vpack.i.bf16 %v1857_v12, %v1856_v9  ;;  %v9301_v41 = vld [vmem:[#allocation43_spill] sm:$0xff]  ;;  %v1929_v12 = vmul.f32 %v7358_v37, %v9294_v28  ;;  %v1933_v37 = vmul.f32 %v7369_v10, %v9296_v23  ;;  %v5564_v10 = vld [vmem:[%s9015_s1 + $0x60] sm:$0xff] }
 0x29d   : > { %9298 = vst [vmem:[#allocation6_spill] sm:$0xff] %v7441_v49  ;;  %v1860_v39 = vmul.f32 %v7339_v47, %v9301_v41  ;;  %v1928_v47 = vmul.f32 %v7352_v13, %v9295_v16  ;;  %v5563_v13 = vld [vmem:[%s9015_s1 + $0x50] sm:$0xff] }
 0x29f   : > { %v7447_v46 = vpop.permute.xlu1 %1991 }
 0x2a0   : > { %5318 = vrot.lane.b32.xlu0 %v5317_v31, %s5680_s9  ;;  %2279 = vperm.xlu1 %5301, %v5560_v30   ;;  %v7453_v2 = vpop.permute.xlu0 %2039  ;;  %v5561_v31 = vld [vmem:[%s9015_s1 + $0x30] sm:$0xff]  ;;  %v5337_v30 = vpack.i.bf16 %v1861_v44, %v1860_v39  ;;  %v1932_v39 = vmul.f32 %v7354_v55, %v9297_v38  ;;  %v5347_v44 = vpack.i.bf16 %v1929_v12, %v1928_v47 }
 0x2a1   : > { %v1937_v55 = vmul.f32 %v7381_v34, %v9299_v19  ;;  %v1941_v34 = vmul.f32 %v7393_v35, %v9302_v58 }
 0x2a3   : > { %v7457_v24 = vpop.permute.xlu1 %1999 }
 0x2a4   : > { %5328 = vrot.lane.b32.xlu0 %v5327_v40, %s5680_s9  ;;  %2287 = vperm.xlu1 %5301, %v5561_v31   ;;  %v7465_v49 = vpop.permute.xlu0 %2047 }
 0x2a8   : > { %2295 = vperm.xlu1 %5301, %v5562_v61   ;;  %5338 = vrot.lane.b32.xlu0 %v5337_v30, %s5680_s9  ;;  %v7475_v9 = vpop.permute.xlu1 %2023  ;;  %v7477_v40 = vpop.permute.xlu0 %2055  ;;  %v1936_v61 = vmul.f32 %v7366_v63, %v9300_v36 }
 0x2a9   : > { %9303 = vst [vmem:[#allocation62_spill] sm:$0xff] %v7477_v40  ;;  %v5357_v40 = vpack.i.bf16 %v1933_v37, %v1932_v39  ;;  %v1940_v37 = vmul.f32 %v7377_v32, %v9301_v41  ;;  %v2009_v32 = vmul.f32 %v7389_v0, %v9294_v28  ;;  %v2013_v0 = vmul.f32 %v7399_v50, %v9296_v23 }
 0x2aa   : > { %v5367_v39 = vpack.i.bf16 %v1937_v55, %v1936_v61  ;;  %v9313_v61 = vld [vmem:[#allocation47_spill] sm:$0xff]  ;;  %v2016_v50 = vmul.f32 %v7437_v18, %v9300_v36  ;;  %v2020_v18 = vmul.f32 %v7457_v24, %v9301_v41 }
 0x2ab   : > { %v1850_v35 = vmul.f32 %v7312_v1, %v9313_v61  ;;  %v9315_v1 = vld [vmem:[#allocation49_spill] sm:$0xff] }
 0x2ac   : > { %2303 = vperm.xlu1 %5301, %v5563_v13   ;;  %5348 = vrot.lane.b32.xlu0 %v5347_v44, %s5681_s10  ;;  %v7487_v31 = vpop.permute.xlu1 %2031  ;;  %v7489_v30 = vpop.permute.xlu0 %2063  ;;  %v9308_v44 = vld [vmem:[#allocation44_spill] sm:$0xff] }
 0x2ad   : > { %9304 = vst [vmem:[#allocation25_spill] sm:$0xff] %v7487_v31  ;;  %9305 = vst [vmem:[#allocation35_spill] sm:$0xff] %v7489_v30  ;;  %v1846_v13 = vmul.f32 %v7293_v20, %v9308_v44  ;;  %v9309_v30 = vld [vmem:[#allocation45_spill] sm:$0xff] }
 0x2ae   : > { %v1847_v63 = vmul.f32 %v7300_v7, %v9309_v30 }
 0x2b0   : > { %2311 = vperm.xlu1 %5301, %v5564_v10   ;;  %5358 = vrot.lane.b32.xlu0 %v5357_v40, %s5681_s10  ;;  %v7499_v12 = vpop.permute.xlu1 %2035  ;;  %v7501_v47 = vpop.permute.xlu0 %2071  ;;  %v5565_v40 = vld [vmem:[%s9015_s1 + $0x70] sm:$0xff]  ;;  %v5302_v55 = vpack.i.bf16 %v1847_v63, %v1846_v13  ;;  %v1854_v13 = vmul.f32 %v7323_v45, %v9315_v1 }
 0x2b1   : > { %9306 = vst [vmem:[#allocation7_spill] sm:$0xff] %v7499_v12  ;;  %9307 = vst [vmem:[#allocation8_spill] sm:$0xff] %v7501_v47  ;;  %v9312_v47 = vld [vmem:[#allocation46_spill] sm:$0xff]  ;;  %v5377_v12 = vpack.i.bf16 %v1941_v34, %v1940_v37  ;;  %v9316_v34 = vld [vmem:[#allocation51_spill] sm:$0xff] }
 0x2b2   : > { %v1851_v7 = vmul.f32 %v7303_v15, %v9312_v47  ;;  %v9317_v37 = vld [vmem:[#allocation50_spill] sm:$0xff] }
 0x2b4   : > { %2319 = vperm.xlu1 %5301, %v5565_v40   ;;  %5368 = vrot.lane.b32.xlu0 %v5367_v39, %s5681_s10  ;;  %v7515_v10 = vpop.permute.xlu1 %2043  ;;  %v7517_v20 = vpop.permute.xlu0 %2079  ;;  %v2008_v40 = vmul.f32 %v7408_v5, %v9295_v16  ;;  %v2012_v5 = vmul.f32 %v7420_v6, %v9297_v38  ;;  %v2017_v6 = vmul.f32 %v7411_v33, %v9299_v19 }
 0x2b5   : > { %9310 = vst [vmem:[#allocation28_spill] sm:$0xff] %v7515_v10  ;;  %9311 = vst [vmem:[#allocation67_spill] sm:$0xff] %v7517_v20  ;;  %v5312_v20 = vpack.i.bf16 %v1851_v7, %v1850_v35  ;;  %v9314_v10 = vld [vmem:[#allocation48_spill] sm:$0xff]  ;;  %v1858_v7 = vmul.f32 %v7333_v17, %v9317_v37  ;;  %v1927_v17 = vmul.f32 %v7342_v51, %v9309_v30 }
 0x2b6   : > { %v1855_v15 = vmul.f32 %v7315_v60, %v9314_v10  ;;  %v5387_v63 = vpack.i.bf16 %v2009_v32, %v2008_v40  ;;  %v1859_v60 = vmul.f32 %v7327_v56, %v9316_v34  ;;  %v1926_v40 = vmul.f32 %v7346_v11, %v9308_v44 }
 0x2b7   : > { %v2021_v33 = vmul.f32 %v7429_v62, %v9302_v58  ;;  %v1930_v51 = vmul.f32 %v7348_v29, %v9313_v61  ;;  %v1931_v11 = vmul.f32 %v7364_v8, %v9312_v47 }
 0x2b8   : > { %5303 = vrot.lane.b32.xlu1 %v5302_v55, %s5680_s9  ;;  %5378 = vrot.lane.b32.xlu0 %v5377_v12, %s5681_s10  ;;  %v7529_v39 = vpop.permute.xlu1 %2051  ;;  %v5322_v35 = vpack.i.bf16 %v1855_v15, %v1854_v13  ;;  %v5397_v55 = vpack.i.bf16 %v2013_v0, %v2012_v5  ;;  %v5332_v32 = vpack.i.bf16 %v1859_v60, %v1858_v7 }
 0x2b9   : > { %v7533_v31 = vpop.permute.xlu0 %2103  ;;  %v5407_v15 = vpack.i.bf16 %v2017_v6, %v2016_v50  ;;  %v5417_v5 = vpack.i.bf16 %v2021_v33, %v2020_v18  ;;  %v1934_v60 = vmul.f32 %v7360_v3, %v9315_v1  ;;  %v5352_v7 = vpack.i.bf16 %v1931_v11, %v1930_v51 }
 0x2ba   : > { %v1939_v50 = vmul.f32 %v7387_v48, %v9316_v34  ;;  %v1938_v6 = vmul.f32 %v7371_v22, %v9317_v37  ;;  %v2011_v22 = vmul.f32 %v7395_v4, %v9312_v47 }
 0x2bc   : > { %5313 = vrot.lane.b32.xlu1 %v5312_v20, %s5680_s9  ;;  %5388 = vrot.lane.b32.xlu0 %v5387_v63, %s5683_s11  ;;  %v7543_v12 = vpop.permute.xlu1 %2059  ;;  %v5342_v63 = vpack.i.bf16 %v1927_v17, %v1926_v40  ;;  %v5372_v40 = vpack.i.bf16 %v1939_v50, %v1938_v6  ;;  %v2019_v6 = vmul.f32 %v7417_v21, %v9316_v34 }
 0x2bd   : > { %v2116_v45 = vpop.permute.xlu0 %2115 }
 0x2c0   : > { %5323 = vrot.lane.b32.xlu1 %v5322_v35, %s5680_s9  ;;  %5398 = vrot.lane.b32.xlu0 %v5397_v55, %s5683_s11  ;;  %v7555_v20 = vpop.permute.xlu1 %2067  ;;  %v1935_v35 = vmul.f32 %v7375_v59, %v9314_v10  ;;  %v2006_v59 = vmul.f32 %v7383_v43, %v9308_v44  ;;  %v2015_v43 = vmul.f32 %v7405_v53, %v9314_v10 }
 0x2c1   : > { %v7557_v56 = vpop.permute.xlu0 %2123 }
 0x2c2   : > { %v5362_v55 = vpack.i.bf16 %v1935_v35, %v1934_v60  ;;  %v2171_v21 = vmul.f32 %v7557_v56, %v9312_v47 }
 0x2c4   : > { %5333 = vrot.lane.b32.xlu1 %v5332_v32, %s5680_s9  ;;  %5408 = vrot.lane.b32.xlu0 %v5407_v15, %s5683_s11  ;;  %v7569_v13 = vpop.permute.xlu1 %2075  ;;  %v2169_v32 = vmul.f32 %v2116_v45, %v9294_v28  ;;  %v2007_v15 = vmul.f32 %v7402_v26, %v9309_v30 }
 0x2c5   : > { %v2132_v0 = vpop.permute.xlu0 %2131 }
 0x2c6   : > { %v5382_v45 = vpack.i.bf16 %v2007_v15, %v2006_v59  ;;  %v2173_v60 = vmul.f32 %v2132_v0, %v9296_v23 }
 0x2c8   : > { %5343 = vrot.lane.b32.xlu1 %v5342_v63, %s5681_s10  ;;  %5418 = vrot.lane.b32.xlu0 %v5417_v5, %s5683_s11  ;;  %v7577_v62 = vpop.permute.xlu1 %2083  ;;  %v2010_v63 = vmul.f32 %v7414_v52, %v9313_v61  ;;  %v2014_v5 = vmul.f32 %v7427_v54, %v9315_v1  ;;  %v2018_v52 = vmul.f32 %v7447_v46, %v9317_v37 }
 0x2c9   : > { %v7579_v24 = vpop.permute.xlu0 %2139 }
 0x2ca   : > { %v5392_v11 = vpack.i.bf16 %v2011_v22, %v2010_v63  ;;  %v5402_v50 = vpack.i.bf16 %v2015_v43, %v2014_v5  ;;  %v5412_v54 = vpack.i.bf16 %v2019_v6, %v2018_v52  ;;  %v2175_v56 = vmul.f32 %v7579_v24, %v9314_v10 }
 0x2cc   : > { %5353 = vrot.lane.b32.xlu1 %v5352_v7, %s5681_s10 }
 0x2cd   : > { %v2148_v29 = vpop.permute.xlu0 %2147  ;;  %v2108_v8 = vpop.permute.xlu1 %2107 }
 0x2ce   : > { %v2167_v59 = vmul.f32 %v2108_v8, %v9309_v30 }
 0x2d0   : > { %5363 = vrot.lane.b32.xlu1 %v5362_v55, %s5681_s10 }
 0x2d1   : > { %v2156_v3 = vpop.permute.xlu0 %2155  ;;  %v2112_v17 = vpop.permute.xlu1 %2111 }
 0x2d2   : > { %v2168_v18 = vmul.f32 %v2112_v17, %v9295_v16  ;;  %v2177_v17 = vmul.f32 %v2148_v29, %v9299_v19 }
 0x2d4   : > { %v5427_v33 = vpack.i.bf16 %v2169_v32, %v2168_v18  ;;  %5373 = vrot.lane.b32.xlu1 %v5372_v40, %s5681_s10  ;;  %v2166_v32 = vmul.f32 %v7533_v31, %v9308_v44 }
 0x2d5   : > { %v2120_v48 = vpop.permute.xlu1 %2119  ;;  %v2164_v51 = vpop.permute.xlu0 %2163 }
 0x2d6   : > { %5428 = vrot.lane.b32.xlu0 %v5427_v33, %s5680_s9  ;;  %v5422_v33 = vpack.i.bf16 %v2167_v59, %v2166_v32  ;;  %v2170_v22 = vmul.f32 %v2120_v48, %v9313_v61  ;;  %v2181_v8 = vmul.f32 %v2164_v51, %v9302_v58  ;;  %v2179_v51 = vmul.f32 %v2156_v3, %v9316_v34 }
 0x2d8   : > { %5383 = vrot.lane.b32.xlu1 %v5382_v45, %s5683_s11  ;;  %v5432_v45 = vpack.i.bf16 %v2171_v21, %v2170_v22 }
 0x2d9   : > { %v2128_v26 = vpop.permute.xlu1 %2127 }
 0x2da   : > { %v2172_v4 = vmul.f32 %v2128_v26, %v9297_v38  ;;  %v2188_v7 = vpop.permute.xlu0 %2187 }
 0x2dc   : > { %v5437_v35 = vpack.i.bf16 %v2173_v60, %v2172_v4  ;;  %5393 = vrot.lane.b32.xlu1 %v5392_v11, %s5683_s11 }
 0x2dd   : > { %v2136_v55 = vpop.permute.xlu1 %2135 }
 0x2de   : > { %5438 = vrot.lane.b32.xlu0 %v5437_v35, %s5680_s9  ;;  %v2200_v53 = vpop.permute.xlu0 %2199  ;;  %v2174_v63 = vmul.f32 %v2136_v55, %v9315_v1  ;;  %v2247_v35 = vmul.f32 %v2188_v7, %v9309_v30 }
 0x2df   : > { %v2250_v7 = vmul.f32 %v2200_v53, %v9313_v61 }
 0x2e0   : > { %5403 = vrot.lane.b32.xlu1 %v5402_v50, %s5683_s11  ;;  %v5442_v48 = vpack.i.bf16 %v2175_v56, %v2174_v63 }
 0x2e1   : > { %v2144_v0 = vpop.permute.xlu1 %2143 }
 0x2e2   : > { %v2176_v46 = vmul.f32 %v2144_v0, %v9300_v36  ;;  %v2208_v40 = vpop.permute.xlu0 %2207 }
 0x2e4   : > { %v5447_v15 = vpack.i.bf16 %v2177_v17, %v2176_v46  ;;  %5413 = vrot.lane.b32.xlu1 %v5412_v54, %s5683_s11 }
 0x2e5   : > { %v2152_v18 = vpop.permute.xlu1 %2151 }
 0x2e6   : > { %5448 = vrot.lane.b32.xlu0 %v5447_v15, %s5680_s9  ;;  %v2216_v31 = vpop.permute.xlu0 %2215  ;;  %v2178_v5 = vmul.f32 %v2152_v18, %v9317_v37 }
 0x2e7   : > { %v2254_v63 = vmul.f32 %v2216_v31, %v9315_v1 }
 0x2e8   : > { %5423 = vrot.lane.b32.xlu1 %v5422_v33, %s5680_s9  ;;  %v5452_v52 = vpack.i.bf16 %v2179_v51, %v2178_v5  ;;  %v2252_v33 = vmul.f32 %v2208_v40, %v9297_v38 }
 0x2e9   : > { %v2160_v29 = vpop.permute.xlu1 %2159 }
 0x2ea   : > { %v2180_v43 = vmul.f32 %v2160_v29, %v9301_v41  ;;  %v2224_v26 = vpop.permute.xlu0 %2223 }
 0x2ec   : > { %v5457_v11 = vpack.i.bf16 %v2181_v8, %v2180_v43  ;;  %5433 = vrot.lane.b32.xlu1 %v5432_v45, %s5680_s9 }
 0x2ee   : > { %5458 = vrot.lane.b32.xlu0 %v5457_v11, %s5680_s9  ;;  %v2184_v60 = vpop.permute.xlu1 %2183  ;;  %v2232_v4 = vpop.permute.xlu0 %2231 }
 0x2ef   : > { %v2246_v55 = vmul.f32 %v2184_v60, %v9308_v44 }
 0x2f0   : > { %5443 = vrot.lane.b32.xlu1 %v5442_v48, %s5680_s9  ;;  %v2256_v48 = vmul.f32 %v2224_v26, %v9300_v36 }
 0x2f1   : > { %v5462_v6 = vpack.i.bf16 %v2247_v35, %v2246_v55  ;;  %v2258_v35 = vmul.f32 %v2232_v4, %v9317_v37 }
 0x2f2   : > { %v2192_v24 = vpop.permute.xlu1 %2191  ;;  %v2240_v50 = vpop.permute.xlu0 %2239 }
 0x2f3   : > { %v2248_v0 = vmul.f32 %v2192_v24, %v9295_v16 }
 0x2f4   : > { %5453 = vrot.lane.b32.xlu1 %v5452_v52, %s5680_s9 }
 0x2f6   : > { %v2196_v54 = vpop.permute.xlu1 %2195 }
 0x2f7   : > { %v2249_v32 = vmul.f32 %v2196_v54, %v9294_v28  ;;  %v2264_v17 = vpop.permute.xlu0 %2263 }
 0x2f8   : > { %5463 = vrot.lane.b32.xlu1 %v5462_v6, %s5681_s10  ;;  %v2260_v6 = vmul.f32 %v2240_v50, %v9301_v41 }
 0x2f9   : > { %v5467_v3 = vpack.i.bf16 %v2249_v32, %v2248_v0  ;;  %v2326_v32 = vmul.f32 %v2264_v17, %v9308_v44 }
 0x2fa   : > { %v2204_v59 = vpop.permute.xlu1 %2203 }
 0x2fb   : > { %v2251_v46 = vmul.f32 %v2204_v59, %v9312_v47  ;;  %v2276_v15 = vpop.permute.xlu0 %2275  ;;  %5468 = vrot.lane.b32.xlu0 %v5467_v3, %s5681_s10 }
 0x2fc   : > { %v2329_v50 = vmul.f32 %v2276_v15, %v9294_v28 }
 0x2fd   : > { %v5472_v18 = vpack.i.bf16 %v2251_v46, %v2250_v7 }
 0x2fe   : > { %v2212_v21 = vpop.permute.xlu1 %2211 }
 0x2ff   : > { %v2253_v22 = vmul.f32 %v2212_v21, %v9296_v23  ;;  %v2284_v29 = vpop.permute.xlu0 %2283  ;;  %5473 = vrot.lane.b32.xlu1 %v5472_v18, %s5681_s10 }
 0x301   : > { %v5477_v8 = vpack.i.bf16 %v2253_v22, %v2252_v33 }
 0x302   : > { %v2220_v45 = vpop.permute.xlu1 %2219 }
 0x303   : > { %v2255_v53 = vmul.f32 %v2220_v45, %v9314_v10  ;;  %v2292_v43 = vpop.permute.xlu0 %2291  ;;  %5478 = vrot.lane.b32.xlu0 %v5477_v8, %s5681_s10  ;;  %v2331_v8 = vmul.f32 %v2284_v29, %v9312_v47 }
 0x304   : > { %v2333_v15 = vmul.f32 %v2292_v43, %v9296_v23 }
 0x305   : > { %v5482_v56 = vpack.i.bf16 %v2255_v53, %v2254_v63 }
 0x306   : > { %v2228_v11 = vpop.permute.xlu1 %2227 }
 0x307   : > { %v2257_v40 = vmul.f32 %v2228_v11, %v9299_v19  ;;  %v2300_v5 = vpop.permute.xlu0 %2299  ;;  %5483 = vrot.lane.b32.xlu1 %v5482_v56, %s5681_s10 }
 0x308   : > { %v2335_v29 = vmul.f32 %v2300_v5, %v9314_v10  ;;  %v1772_v5 = vmul.f32 %v7264_v25, %v9297_v38 }
 0x309   : > { %v5487_v60 = vpack.i.bf16 %v2257_v40, %v2256_v48 }
 0x30a   : > { %v2236_v51 = vpop.permute.xlu1 %2235 }
 0x30b   : > { %v2259_v31 = vmul.f32 %v2236_v51, %v9316_v34  ;;  %v2308_v52 = vpop.permute.xlu0 %2307  ;;  %5488 = vrot.lane.b32.xlu0 %v5487_v60, %s5681_s10 }
 0x30c   : > { %v2337_v43 = vmul.f32 %v2308_v52, %v9299_v19 }
 0x30d   : > { %v5492_v55 = vpack.i.bf16 %v2259_v31, %v2258_v35 }
 0x30e   : > { %v2244_v24 = vpop.permute.xlu1 %2243 }
 0x30f   : > { %v2261_v26 = vmul.f32 %v2244_v24, %v9302_v58  ;;  %v2316_v54 = vpop.permute.xlu0 %2315  ;;  %5493 = vrot.lane.b32.xlu1 %v5492_v55, %s5681_s10 }
 0x311   : > { %v5497_v0 = vpack.i.bf16 %v2261_v26, %v2260_v6 }
 0x313   : > { %v7663_v3 = vpop.permute.xlu0 %2323  ;;  %5498 = vrot.lane.b32.xlu0 %v5497_v0, %s5681_s10  ;;  %v2268_v4 = vpop.permute.xlu1 %2267 }
 0x314   : > { %v2327_v59 = vmul.f32 %v2268_v4, %v9309_v30 }
 0x316   : > { %v5502_v7 = vpack.i.bf16 %v2327_v59, %v2326_v32  ;;  %v1773_v32 = vmul.f32 %v7267_v42, %v9296_v23 }
 0x317   : > { %v7667_v46 = vpop.permute.xlu0 %5308  ;;  %v2272_v18 = vpop.permute.xlu1 %2271 }
 0x318   : > { %v2328_v21 = vmul.f32 %v2272_v18, %v9295_v16  ;;  %5503 = vrot.lane.b32.xlu1 %v5502_v7, %s5683_s11  ;;  %v2339_v7 = vmul.f32 %v2316_v54, %v9316_v34 }
 0x31a   : > { %v5507_v33 = vpack.i.bf16 %v2329_v50, %v2328_v21  ;;  %v5691_v21 = vmov 0.0  }
 0x31b   : > { %v7672_v22 = vpop.permute.xlu0 %5318  ;;  %v2280_v17 = vpop.permute.xlu1 %2279  ;;  %2935 = vst [vmem:[#allocation3 + $0xb0] sm:$0xff] %v5691_v21  ;;  %2936 = vst [vmem:[#allocation3] sm:$0xff] %v5691_v21 }
 0x31c   : > { %v2330_v45 = vmul.f32 %v2280_v17, %v9313_v61  ;;  %5508 = vrot.lane.b32.xlu0 %v5507_v33, %s5683_s11  ;;  %v5321_v6 = vunpack.i.h.bf16 %v7672_v22  ;;  %v5320_v26 = vunpack.i.l.bf16 %v7672_v22  ;;  %2937 = vst [vmem:[#allocation3 + $0xd8] sm:$0xff] %v5691_v21  ;;  %2938 = vst [vmem:[#allocation3 + $0x18] sm:$0xff] %v5691_v21 }
 0x31d   : > { %2939 = vst [vmem:[#allocation3 + $0x50] sm:$0xff] %v5691_v21  ;;  %2940 = vst [vmem:[#allocation3 + $0x68] sm:$0xff] %v5691_v21 }
 0x31e   : > { %v5512_v63 = vpack.i.bf16 %v2331_v8, %v2330_v45  ;;  %2941 = vst [vmem:[#allocation3 + $0x30] sm:$0xff] %v5691_v21  ;;  %2942 = vst [vmem:[#allocation3 + $0x48] sm:$0xff] %v5691_v21  ;;  %v2733_v25 = vsel %vm262_vm0, %v1773_v32, %v5321_v6  ;;  %v2732_v42 = vsel %vm262_vm0, %v1772_v5, %v5320_v26 }
 0x31f   : > { %v7677_v53 = vpop.permute.xlu0 %5328  ;;  %v2288_v56 = vpop.permute.xlu1 %2287  ;;  %2943 = vst [vmem:[#allocation3 + $0x80] sm:$0xff] %v5691_v21  ;;  %2944 = vst [vmem:[#allocation3 + $0x88] sm:$0xff] %v5691_v21  ;;  %v1776_v45 = vmul.f32 %v7275_v14, %v9300_v36 }
 0x320   : > { %v2332_v11 = vmul.f32 %v2288_v56, %v9297_v38  ;;  %5513 = vrot.lane.b32.xlu1 %v5512_v63, %s5683_s11  ;;  %2945 = vst [vmem:[#allocation3 + $0xe8] sm:$0xff] %v5691_v21  ;;  %2946 = vst [vmem:[#allocation3 + $0xb8] sm:$0xff] %v5691_v21  ;;  %v5331_v54 = vunpack.i.h.bf16 %v7677_v53  ;;  %v5330_v33 = vunpack.i.l.bf16 %v7677_v53  ;;  %v1777_v63 = vmul.f32 %v7279_v57, %v9299_v19 }
 0x321   : > { %2947 = vst [vmem:[#allocation3 + $0x60] sm:$0xff] %v5691_v21  ;;  %2948 = vst [vmem:[#allocation3 + $0xf0] sm:$0xff] %v5691_v21 }
 0x322   : > { %v5517_v48 = vpack.i.bf16 %v2333_v15, %v2332_v11  ;;  %2949 = vst [vmem:[#allocation3 + $0x8] sm:$0xff] %v5691_v21  ;;  %2950 = vst [vmem:[#allocation3 + $0x78] sm:$0xff] %v5691_v21  ;;  %v2341_v11 = vmul.f32 %v7663_v3, %v9302_v58 }
 0x323   : > { %v7682_v40 = vpop.permute.xlu0 %5338  ;;  %v2296_v60 = vpop.permute.xlu1 %2295  ;;  %2951 = vst [vmem:[#allocation3 + $0x38] sm:$0xff] %v5691_v21  ;;  %2952 = vst [vmem:[#allocation3 + $0x58] sm:$0xff] %v5691_v21 }
 0x324   : > { %v2334_v51 = vmul.f32 %v2296_v60, %v9315_v1  ;;  %5518 = vrot.lane.b32.xlu0 %v5517_v48, %s5683_s11  ;;  %2953 = vst [vmem:[#allocation3 + $0x40] sm:$0xff] %v5691_v21  ;;  %2954 = vst [vmem:[#allocation3 + $0xc8] sm:$0xff] %v5691_v21  ;;  %v5341_v14 = vunpack.i.h.bf16 %v7682_v40 }
 0x325   : > { %2955 = vst [vmem:[#allocation3 + $0xe0] sm:$0xff] %v5691_v21  ;;  %2956 = vst [vmem:[#allocation3 + $0x90] sm:$0xff] %v5691_v21 }
 0x326   : > { %v5522_v35 = vpack.i.bf16 %v2335_v29, %v2334_v51  ;;  %2957 = vst [vmem:[#allocation3 + $0x70] sm:$0xff] %v5691_v21  ;;  %2958 = vst [vmem:[#allocation3 + $0xc0] sm:$0xff] %v5691_v21  ;;  %v2737_v29 = vsel %vm262_vm0, %v1777_v63, %v5331_v54  ;;  %v2736_v51 = vsel %vm262_vm0, %v1776_v45, %v5330_v33  ;;  %v9322_v33 = vld [vmem:[#allocation4_spill] sm:$0xff] }
 0x327   : > { %v7687_v31 = vpop.permute.xlu0 %5348  ;;  %v2304_v55 = vpop.permute.xlu1 %2303  ;;  %2959 = vst [vmem:[#allocation3 + $0xa8] sm:$0xff] %v5691_v21  ;;  %2960 = vst [vmem:[#allocation3 + $0xd0] sm:$0xff] %v5691_v21 }
 0x328   : > { %v2336_v24 = vmul.f32 %v2304_v55, %v9300_v36  ;;  %5523 = vrot.lane.b32.xlu1 %v5522_v35, %s5683_s11  ;;  %2961 = vst [vmem:[#allocation3 + $0x10] sm:$0xff] %v5691_v21  ;;  %2962 = vst [vmem:[#allocation3 + $0x28] sm:$0xff] %v5691_v21  ;;  %v5340_v35 = vunpack.i.l.bf16 %v7682_v40 }
 0x329   : > { %2963 = vst [vmem:[#allocation3 + $0xa0] sm:$0xff] %v5691_v21  ;;  %2964 = vst [vmem:[#allocation3 + $0xf8] sm:$0xff] %v5691_v21 }
 0x32a   : > { %v5527_v0 = vpack.i.bf16 %v2337_v43, %v2336_v24  ;;  %2965 = vst [vmem:[#allocation3 + $0x20] sm:$0xff] %v5691_v21  ;;  %2966 = vst [vmem:[#allocation3 + $0x98] sm:$0xff] %v5691_v21  ;;  %v1780_v43 = vmul.f32 %v7287_v27, %v9301_v41  ;;  %v9318_v24 = vld [vmem:[#allocation5_spill] sm:$0xff] }
 0x32b   : > { %v5359_v4 = vpop.permute.xlu0 %5358  ;;  %v2312_v59 = vpop.permute.xlu1 %2311  ;;  %v1781_v6 = vmul.f32 %v9318_v24, %v9302_v58 }
 0x32c   : > { %v5361_v52 = vunpack.i.h.bf16 %v5359_v4  ;;  %v5360_v18 = vunpack.i.l.bf16 %v5359_v4  ;;  %v2338_v50 = vmul.f32 %v2312_v59, %v9317_v37  ;;  %5528 = vrot.lane.b32.xlu0 %v5527_v0, %s5683_s11  ;;  %v2740_v4 = vsel %vm262_vm0, %v1780_v43, %v5340_v35  ;;  %v9324_v35 = vld [vmem:[#allocation20_spill] sm:$0xff] }
 0x32d   : > { %v2741_v40 = vsel %vm262_vm0, %v1781_v6, %v5341_v14 }
 0x32e   : > { %v7706_v22 = vsel %vm1508_vm1, %v2733_v25, %v5361_v52  ;;  %v7709_v17 = vsel %vm1508_vm1, %v2732_v42, %v5360_v18  ;;  %v5532_v8 = vpack.i.bf16 %v2339_v7, %v2338_v50  ;;  %v9321_v42 = vld [vmem:[#allocation19_spill] sm:$0xff] }
 0x32f   : > { %v5369_v56 = vpop.permute.xlu0 %5368  ;;  %v2320_v15 = vpop.permute.xlu1 %2319  ;;  %v1770_v54 = vmul.f32 %v9321_v42, %v9313_v61 }
 0x330   : > { %v5371_v48 = vunpack.i.h.bf16 %v5369_v56  ;;  %v5370_v53 = vunpack.i.l.bf16 %v5369_v56  ;;  %v2340_v60 = vmul.f32 %v2320_v15, %v9301_v41  ;;  %5533 = vrot.lane.b32.xlu1 %v5532_v8, %s5683_s11  ;;  %v1771_v8 = vmul.f32 %v9322_v33, %v9312_v47 }
 0x332   : > { %v7724_v57 = vsel %vm1508_vm1, %v2737_v29, %v5371_v48  ;;  %v7727_v55 = vsel %vm1508_vm1, %v2736_v51, %v5370_v53  ;;  %v5537_v3 = vpack.i.bf16 %v2341_v11, %v2340_v60  ;;  %v9323_v51 = vld [vmem:[#allocation57_spill] sm:$0xff] }
 0x333   : > { %v5379_v26 = vpop.permute.xlu0 %5378  ;;  %v7733_v0 = vpop.permute.xlu1 %5303  ;;  %v1774_v14 = vmul.f32 %v9323_v51, %v9315_v1 }
 0x334   : > { %v5381_v5 = vunpack.i.h.bf16 %v5379_v26  ;;  %v5380_v32 = vunpack.i.l.bf16 %v5379_v26  ;;  %5538 = vrot.lane.b32.xlu0 %v5537_v3, %s5683_s11  ;;  %v1775_v3 = vmul.f32 %v9324_v35, %v9314_v10 }
 0x336   : > { %v7739_v59 = vsel %vm1508_vm1, %v2741_v40, %v5381_v5  ;;  %v7742_v7 = vsel %vm1508_vm1, %v2740_v4, %v5380_v32 }
 0x337   : > { %9319 = vst [vmem:[#allocation32_spill] sm:$0xff] %v7739_v59  ;;  %9320 = vst [vmem:[#allocation24_spill] sm:$0xff] %v7742_v7  ;;  %v5314_v27 = vpop.permute.xlu1 %5313  ;;  %v9335_v7 = vld [vmem:[#allocation18_spill] sm:$0xff] }
 0x338   : > { %v5316_v21 = vunpack.i.h.bf16 %v5314_v27  ;;  %v5315_v25 = vunpack.i.l.bf16 %v5314_v27  ;;  %v1769_v59 = vmul.f32 %v9335_v7, %v9294_v28  ;;  %v9338_v7 = vld [vmem:[#allocation25_spill] sm:$0xff] }
 0x33a   : > { %v2731_v15 = vsel %vm262_vm0, %v1771_v8, %v5316_v21  ;;  %v2730_v11 = vsel %vm262_vm0, %v1770_v54, %v5315_v25  ;;  %v9326_v25 = vld [vmem:[#allocation22_spill] sm:$0xff] }
 0x33b   : > { %v5324_v52 = vpop.permute.xlu1 %5323  ;;  %v1779_v42 = vmul.f32 %v9326_v25, %v9316_v34  ;;  %v9332_v25 = vld [vmem:[#allocation15_spill] sm:$0xff] }
 0x33c   : > { %v5326_v48 = vunpack.i.h.bf16 %v5324_v52  ;;  %v5325_v53 = vunpack.i.l.bf16 %v5324_v52  ;;  %v9325_v52 = vld [vmem:[#allocation59_spill] sm:$0xff] }
 0x33d   : > { %v1778_v21 = vmul.f32 %v9325_v52, %v9317_v37 }
 0x33e   : > { %v2735_v26 = vsel %vm262_vm0, %v1775_v3, %v5326_v48  ;;  %v2734_v5 = vsel %vm262_vm0, %v1774_v14, %v5325_v53 }
 0x33f   : > { %v5334_v18 = vpop.permute.xlu1 %5333 }
 0x340   : > { %v5336_v32 = vunpack.i.h.bf16 %v5334_v18  ;;  %v5335_v40 = vunpack.i.l.bf16 %v5334_v18 }
 0x343   : > { %v7744_v50 = vpop.permute.xlu1 %5343 }
 0x347   : > { %v5354_v45 = vpop.permute.xlu1 %5353 }
 0x348   : > { %v5356_v63 = vunpack.i.h.bf16 %v5354_v45  ;;  %v5355_v56 = vunpack.i.l.bf16 %v5354_v45  ;;  %v2739_v45 = vsel %vm262_vm0, %v1779_v42, %v5336_v32  ;;  %v1766_v42 = vmul.f32 %v9332_v25, %v9308_v44 }
 0x349   : > { %v7832_v25 = vmul.f32 %v7465_v49, %v9297_v38  ;;  %v9340_v38 = vld [vmem:[#allocation7_spill] sm:$0xff] }
 0x34a   : > { %v7753_v60 = vsel %vm1508_vm1, %v2730_v11, %v5355_v56  ;;  %v7756_v29 = vsel %vm1508_vm1, %v2731_v15, %v5356_v63  ;;  %v2738_v63 = vsel %vm262_vm0, %v1778_v21, %v5335_v40  ;;  %v5389_v11 = vpop.permute.xlu0 %5388  ;;  %v7852_v49 = vmul.f32 %v9340_v38, %v9294_v28 }
 0x34b   : > { %v5364_v43 = vpop.permute.xlu1 %5363  ;;  %v5310_v28 = vunpack.i.l.bf16 %v7667_v46  ;;  %v5306_v38 = vunpack.i.h.bf16 %v7733_v0 }
 0x34c   : > { %v5366_v24 = vunpack.i.h.bf16 %v5364_v43  ;;  %v5365_v6 = vunpack.i.l.bf16 %v5364_v43 }
 0x34e   : > { %v7765_v4 = vsel %vm1508_vm1, %v2734_v5, %v5365_v6  ;;  %v7768_v27 = vsel %vm1508_vm1, %v2735_v26, %v5366_v24  ;;  %v7788_v51 = vpop.permute.xlu0 %5398 }
 0x34f   : > { %v5374_v54 = vpop.permute.xlu1 %5373 }
 0x350   : > { %v5376_v33 = vunpack.i.h.bf16 %v5374_v54  ;;  %v5375_v8 = vunpack.i.l.bf16 %v5374_v54  ;;  %v9333_v54 = vld [vmem:[#allocation16_spill] sm:$0xff] }
 0x352   : > { %v7777_v18 = vsel %vm1508_vm1, %v2738_v63, %v5375_v8  ;;  %v7780_v56 = vsel %vm1508_vm1, %v2739_v45, %v5376_v33  ;;  %v7792_v35 = vpop.permute.xlu0 %5408  ;;  %v1768_v33 = vmul.f32 %v9333_v54, %v9295_v16  ;;  %v9334_v45 = vld [vmem:[#allocation17_spill] sm:$0xff]  ;;  %v2086_v54 = vmul.f32 %v7475_v9, %v9308_v44  ;;  %v9341_v9 = vld [vmem:[#allocation8_spill] sm:$0xff] }
 0x353   : > { %9327 = vst [vmem:[#allocation63_spill] sm:$0xff] %v7777_v18  ;;  %9328 = vst [vmem:[#allocation56_spill] sm:$0xff] %v7780_v56  ;;  %v7782_v15 = vpop.permute.xlu1 %5383  ;;  %v1767_v63 = vmul.f32 %v9334_v45, %v9309_v30  ;;  %v9336_v56 = vld [vmem:[#allocation6_spill] sm:$0xff]  ;;  %v7856_v44 = vmul.f32 %v9341_v9, %v9317_v37  ;;  %v5350_v37 = vunpack.i.l.bf16 %v7687_v31  ;;  %v5390_v9 = vunpack.i.l.bf16 %v5389_v11 }
 0x354   : > { %v2087_v18 = vmul.f32 %v9336_v56, %v9309_v30 }
 0x356   : > { %v7798_v24 = vpop.permute.xlu0 %5418 }
 0x357   : > { %v7784_v48 = vpop.permute.xlu1 %5393 }
 0x35a   : > { %v7802_v26 = vpop.permute.xlu0 %5428 }
 0x35b   : > { %v7786_v53 = vpop.permute.xlu1 %5403 }
 0x35e   : > { %v7806_v32 = vpop.permute.xlu0 %5438 }
 0x35f   : > { %v7790_v14 = vpop.permute.xlu1 %5413 }
 0x360   : > { %9329 = vst [vmem:[#allocation54_spill] sm:$0xff] %v7790_v14  ;;  %v9337_v14 = vld [vmem:[#allocation62_spill] sm:$0xff] }
 0x361   : > { %v7838_v45 = vmul.f32 %v9337_v14, %v9315_v1  ;;  %v9342_v1 = vld [vmem:[#allocation28_spill] sm:$0xff] }
 0x362   : > { %v7808_v40 = vpop.permute.xlu0 %5448  ;;  %v7860_v56 = vmul.f32 %v9342_v1, %v9312_v47  ;;  %v5305_v47 = vunpack.i.l.bf16 %v7733_v0  ;;  %v7894_v0 = vmul.f32 %v7577_v62, %v9302_v58 }
 0x363   : > { %v7794_v3 = vpop.permute.xlu1 %5423 }
 0x364   : > { %v2726_v58 = vsel %vm262_vm0, %v1766_v42, %v5305_v47  ;;  %v5386_v47 = vunpack.i.h.bf16 %v7782_v15 }
 0x366   : > { %v7812_v21 = vpop.permute.xlu0 %5458 }
 0x367   : > { %v7796_v43 = vpop.permute.xlu1 %5433  ;;  %9331 = vst [vmem:[#allocation30_spill] sm:$0xff] %v7812_v21  ;;  %v7828_v21 = vmul.f32 %v7453_v2, %v9313_v61  ;;  %v9339_v2 = vld [vmem:[#allocation35_spill] sm:$0xff] }
 0x368   : > { %v7848_v61 = vmul.f32 %v9339_v2, %v9300_v36  ;;  %v7868_v36 = vmul.f32 %v7529_v39, %v9296_v23  ;;  %v5351_v2 = vunpack.i.h.bf16 %v7687_v31  ;;  %v7882_v23 = vmul.f32 %v7555_v20, %v9299_v19 }
 0x369   : > { %v5391_v39 = vunpack.i.h.bf16 %v5389_v11  ;;  %v7890_v31 = vmul.f32 %v7569_v13, %v9316_v34  ;;  %v2728_v20 = vsel %vm262_vm0, %v1768_v33, %v5310_v28  ;;  %v5411_v11 = vunpack.i.h.bf16 %v7792_v35 }
 0x36a   : > { %v2744_v34 = vsel %vm1508_vm1, %v2728_v20, %v5350_v37  ;;  %v2727_v13 = vsel %vm262_vm0, %v1767_v63, %v5306_v38  ;;  %v5345_v33 = vunpack.i.l.bf16 %v7744_v50  ;;  %v5426_v63 = vunpack.i.h.bf16 %v7794_v3 }
 0x36b   : > { %v7800_v6 = vpop.permute.xlu1 %5443  ;;  %v5421_v38 = vunpack.i.h.bf16 %v7798_v24 }
 0x36d   : > { %v7844_v30 = vpop.permute.xlu0 %5468 }
 0x36f   : > { %v7804_v5 = vpop.permute.xlu1 %5453 }
 0x370   : > { %9330 = vst [vmem:[#allocation26_spill] sm:$0xff] %v7804_v5  ;;  %v7842_v5 = vmul.f32 %v9338_v7, %v9295_v16  ;;  %v9343_v16 = vld [vmem:[#allocation67_spill] sm:$0xff]  ;;  %v5311_v7 = vunpack.i.h.bf16 %v7667_v46 }
 0x371   : > { %v7864_v14 = vmul.f32 %v9343_v16, %v9301_v41  ;;  %v7878_v41 = vmul.f32 %v7543_v12, %v9314_v10  ;;  %v5401_v10 = vunpack.i.h.bf16 %v7788_v51  ;;  %v5400_v12 = vunpack.i.l.bf16 %v7788_v51 }
 0x372   : > { %v2729_v19 = vsel %vm262_vm0, %v1769_v59, %v5311_v7  ;;  %v5410_v16 = vunpack.i.l.bf16 %v7792_v35  ;;  %v7910_v51 = vsel %vm1525_vm2, %v2744_v34, %v5390_v9  ;;  %v5346_v59 = vunpack.i.h.bf16 %v7744_v50 }
 0x373   : > { %v7810_v52 = vpop.permute.xlu1 %5463  ;;  %9344 = vst [vmem:[#allocation65_spill] sm:$0xff] %v7864_v14  ;;  %v2745_v14 = vsel %vm1508_vm1, %v2729_v19, %v5351_v2  ;;  %v7920_v28 = vsel %vm1525_vm2, %v7706_v22, %v5401_v10  ;;  %v7924_v42 = vsel %vm1525_vm2, %v7709_v17, %v5400_v12  ;;  %v7930_v2 = vsel %vm1525_vm2, %v7724_v57, %v5411_v11 }
 0x374   : > { %v7907_v62 = vsel %vm1525_vm2, %v2745_v14, %v5391_v39  ;;  %v5425_v14 = vunpack.i.l.bf16 %v7794_v3  ;;  %v7934_v50 = vsel %vm1525_vm2, %v7727_v55, %v5410_v16  ;;  %v5466_v37 = vunpack.i.h.bf16 %v7810_v52 }
 0x375   : > { %v7884_v1 = vpop.permute.xlu0 %5478  ;;  %v5465_v22 = vunpack.i.l.bf16 %v7810_v52  ;;  %v5420_v17 = vunpack.i.l.bf16 %v7798_v24  ;;  %v5385_v3 = vunpack.i.l.bf16 %v7782_v15  ;;  %v2742_v39 = vsel %vm1508_vm1, %v2726_v58, %v5345_v33 }
 0x376   : > { %v2743_v57 = vsel %vm1508_vm1, %v2727_v13, %v5346_v59  ;;  %v5431_v9 = vunpack.i.h.bf16 %v7802_v26  ;;  %v5430_v55 = vunpack.i.l.bf16 %v7802_v26  ;;  %v2775_v52 = vsel %vm262_vm0, %v2087_v18, %v5426_v63 }
 0x377   : > { %v7818_v8 = vpop.permute.xlu1 %5473  ;;  %v2774_v19 = vsel %vm262_vm0, %v2086_v54, %v5425_v14  ;;  %v5471_v16 = vunpack.i.h.bf16 %v7844_v30  ;;  %v5470_v15 = vunpack.i.l.bf16 %v7844_v30  ;;  %v2791_v13 = vsel %vm1508_vm1, %v2775_v52, %v5466_v37 }
 0x378   : > { %v2790_v34 = vsel %vm1508_vm1, %v2774_v19, %v5465_v22  ;;  %v2758_v58 = vsel %vm1525_vm2, %v2742_v39, %v5385_v3  ;;  %v2759_v26 = vsel %vm1525_vm2, %v2743_v57, %v5386_v47  ;;  %v2777_v54 = vsel %vm262_vm0, %v7852_v49, %v5431_v9 }
 0x379   : > { %v2776_v33 = vsel %vm262_vm0, %v7842_v5, %v5430_v55  ;;  %v5436_v22 = vunpack.i.h.bf16 %v7796_v43  ;;  %v5435_v37 = vunpack.i.l.bf16 %v7796_v43  ;;  %v2793_v47 = vsel %vm1508_vm1, %v2777_v54, %v5471_v16 }
 0x37a   : > { %v2792_v57 = vsel %vm1508_vm1, %v2776_v33, %v5470_v15  ;;  %v5475_v49 = vunpack.i.l.bf16 %v7818_v8  ;;  %v5396_v5 = vunpack.i.h.bf16 %v7784_v48  ;;  %v5395_v9 = vunpack.i.l.bf16 %v7784_v48 }
 0x37b   : > { %v7886_v46 = vpop.permute.xlu1 %5483  ;;  %v5441_v52 = vunpack.i.h.bf16 %v7806_v32  ;;  %v5440_v19 = vunpack.i.l.bf16 %v7806_v32  ;;  %v2778_v15 = vsel %vm262_vm0, %v7828_v21, %v5435_v37 }
 0x37c   : > { %v5486_v37 = vunpack.i.h.bf16 %v7886_v46 }
 0x37d   : > { %v7914_v7 = vpop.permute.xlu0 %5488 }
 0x381   : > { %v7916_v35 = vpop.permute.xlu1 %5493 }
 0x385   : > { %v7946_v10 = vpop.permute.xlu0 %5498 }
 0x38a   : > { %v5504_v12 = vpop.permute.xlu1 %5503 }
 0x38b   : > { %v5506_v20 = vunpack.i.h.bf16 %v5504_v12  ;;  %v5505_v11 = vunpack.i.l.bf16 %v5504_v12  ;;  %v5476_v12 = vunpack.i.h.bf16 %v7818_v8  ;;  %v2779_v8 = vsel %vm262_vm0, %v7860_v56, %v5436_v22 }
 0x38c   : > { %v2763_v56 = vsel %vm1525_vm2, %v7756_v29, %v5396_v5 }
 0x38d   : > { %v2806_v59 = vsel %vm1525_vm2, %v2790_v34, %v5505_v11  ;;  %v2807_v18 = vsel %vm1525_vm2, %v2791_v13, %v5506_v20  ;;  %v5481_v13 = vunpack.i.h.bf16 %v7884_v1  ;;  %v2795_v32 = vsel %vm1508_vm1, %v2779_v8, %v5476_v12 }
 0x38e   : > { %v4926_v63 = vpack.c.bf16 %v2806_v59, %v2758_v58  ;;  %v4927_v30 = vpack.c.bf16 %v2807_v18, %v2759_v26  ;;  %v5509_v14 = vpop.permute.xlu0 %5508  ;;  %v5480_v58 = vunpack.i.l.bf16 %v7884_v1  ;;  %v2794_v26 = vsel %vm1508_vm1, %v2778_v15, %v5475_v49  ;;  %v9345_v15 = vld [vmem:[#allocation26_spill] sm:$0xff] }
 0x38f   : > { %v5511_v3 = vunpack.i.h.bf16 %v5509_v14  ;;  %v5510_v39 = vunpack.i.l.bf16 %v5509_v14  ;;  %v2781_v59 = vsel %vm262_vm0, %v7868_v36, %v5441_v52  ;;  %v2780_v1 = vsel %vm262_vm0, %v7832_v25, %v5440_v19 }
 0x390   : > { %2919 = vst [vmem:[#allocation2 + $0x80] sm:$0xff] %v4926_v63  ;;  %2920 = vst [vmem:[#allocation2 + $0x88] sm:$0xff] %v4927_v30  ;;  %v5446_v63 = vunpack.i.h.bf16 %v7800_v6  ;;  %v2797_v29 = vsel %vm1508_vm1, %v2781_v59, %v5481_v13  ;;  %v2796_v22 = vsel %vm1508_vm1, %v2780_v1, %v5480_v58  ;;  %v5485_v36 = vunpack.i.l.bf16 %v7886_v46 }
 0x391   : > { %v2809_v55 = vsel %vm1525_vm2, %v2793_v47, %v5511_v3  ;;  %v2808_v43 = vsel %vm1525_vm2, %v2792_v57, %v5510_v39  ;;  %v5406_v25 = vunpack.i.h.bf16 %v7786_v53  ;;  %v5405_v3 = vunpack.i.l.bf16 %v7786_v53 }
 0x392   : > { %v4929_v20 = vpack.c.bf16 %v2809_v55, %v7907_v62  ;;  %v4928_v11 = vpack.c.bf16 %v2808_v43, %v7910_v51  ;;  %v5514_v16 = vpop.permute.xlu1 %5513  ;;  %v2762_v62 = vsel %vm1525_vm2, %v7753_v60, %v5395_v9  ;;  %v5445_v60 = vunpack.i.l.bf16 %v7800_v6 }
 0x393   : > { %v5516_v48 = vunpack.i.h.bf16 %v5514_v16  ;;  %v5515_v34 = vunpack.i.l.bf16 %v5514_v16  ;;  %v5451_v47 = vunpack.i.h.bf16 %v7808_v40  ;;  %v5450_v57 = vunpack.i.l.bf16 %v7808_v40 }
 0x394   : > { %2922 = vst [vmem:[#allocation2 + $0x98] sm:$0xff] %v4929_v20  ;;  %2921 = vst [vmem:[#allocation2 + $0x90] sm:$0xff] %v4928_v11  ;;  %v2783_v46 = vsel %vm262_vm0, %v7878_v41, %v5446_v63  ;;  %v2782_v9 = vsel %vm262_vm0, %v7838_v45, %v5445_v60  ;;  %v5491_v19 = vunpack.i.h.bf16 %v7914_v7  ;;  %v5490_v40 = vunpack.i.l.bf16 %v7914_v7 }
 0x395   : > { %v2810_v21 = vsel %vm1525_vm2, %v2794_v26, %v5515_v34  ;;  %v2811_v51 = vsel %vm1525_vm2, %v2795_v32, %v5516_v48  ;;  %v2798_v43 = vsel %vm1508_vm1, %v2782_v9, %v5485_v36  ;;  %v2799_v52 = vsel %vm1508_vm1, %v2783_v46, %v5486_v37  ;;  %v9349_v36 = vld [vmem:[#allocation56_spill] sm:$0xff] }
 0x396   : > { %v4930_v18 = vpack.c.bf16 %v2810_v21, %v2762_v62  ;;  %v4931_v54 = vpack.c.bf16 %v2811_v51, %v2763_v56  ;;  %v5519_v33 = vpop.permute.xlu0 %5518  ;;  %v2767_v41 = vsel %vm1525_vm2, %v7768_v27, %v5406_v25  ;;  %v2785_v20 = vsel %vm262_vm0, %v7882_v23, %v5451_v47  ;;  %v9347_v51 = vld [vmem:[#allocation30_spill] sm:$0xff]  ;;  %v9351_v9 = vld [vmem:[#allocation32_spill] sm:$0xff] }
 0x397   : > { %v5521_v30 = vunpack.i.h.bf16 %v5519_v33  ;;  %v5520_v14 = vunpack.i.l.bf16 %v5519_v33  ;;  %v2784_v11 = vsel %vm262_vm0, %v7848_v61, %v5450_v57  ;;  %v5456_v48 = vunpack.i.h.bf16 %v9345_v15  ;;  %v9346_v61 = vld [vmem:[#allocation54_spill] sm:$0xff]  ;;  %v9350_v57 = vld [vmem:[#allocation65_spill] sm:$0xff] }
 0x398   : > { %2923 = vst [vmem:[#allocation2 + $0xa0] sm:$0xff] %v4930_v18  ;;  %2924 = vst [vmem:[#allocation2 + $0xa8] sm:$0xff] %v4931_v54  ;;  %v2801_v27 = vsel %vm1508_vm1, %v2785_v20, %v5491_v19  ;;  %v2800_v58 = vsel %vm1508_vm1, %v2784_v11, %v5490_v40  ;;  %v5496_v26 = vunpack.i.h.bf16 %v7916_v35  ;;  %v5495_v23 = vunpack.i.l.bf16 %v7916_v35 }
 0x399   : > { %v2813_v39 = vsel %vm1525_vm2, %v2797_v29, %v5521_v30  ;;  %v2812_v6 = vsel %vm1525_vm2, %v2796_v22, %v5520_v14  ;;  %v5416_v32 = vunpack.i.h.bf16 %v9346_v61  ;;  %v5415_v62 = vunpack.i.l.bf16 %v9346_v61 }
 0x39a   : > { %v4933_v12 = vpack.c.bf16 %v2813_v39, %v7920_v28  ;;  %v4932_v49 = vpack.c.bf16 %v2812_v6, %v7924_v42  ;;  %v5524_v5 = vpop.permute.xlu1 %5523  ;;  %v2766_v28 = vsel %vm1525_vm2, %v7765_v4, %v5405_v3  ;;  %v5455_v4 = vunpack.i.l.bf16 %v9345_v15 }
 0x39b   : > { %v5526_v53 = vunpack.i.h.bf16 %v5524_v5  ;;  %v5525_v55 = vunpack.i.l.bf16 %v5524_v5  ;;  %v5461_v59 = vunpack.i.h.bf16 %v9347_v51  ;;  %v5460_v1 = vunpack.i.l.bf16 %v9347_v51 }
 0x39c   : > { %2926 = vst [vmem:[#allocation2 + $0xb8] sm:$0xff] %v4933_v12  ;;  %2925 = vst [vmem:[#allocation2 + $0xb0] sm:$0xff] %v4932_v49  ;;  %v2787_v35 = vsel %vm262_vm0, %v7890_v31, %v5456_v48  ;;  %v2786_v63 = vsel %vm262_vm0, %v7856_v44, %v5455_v4  ;;  %v5501_v22 = vunpack.i.h.bf16 %v7946_v10  ;;  %v5500_v37 = vunpack.i.l.bf16 %v7946_v10 }
 0x39d   : > { %v2814_v45 = vsel %vm1525_vm2, %v2798_v43, %v5525_v55  ;;  %v2815_v42 = vsel %vm1525_vm2, %v2799_v52, %v5526_v53  ;;  %v2802_v14 = vsel %vm1508_vm1, %v2786_v63, %v5495_v23  ;;  %v2803_v29 = vsel %vm1508_vm1, %v2787_v35, %v5496_v26  ;;  %v9352_v55 = vld [vmem:[#allocation24_spill] sm:$0xff] }
 0x39e   : > { %v4934_v16 = vpack.c.bf16 %v2814_v45, %v2766_v28  ;;  %v4935_v7 = vpack.c.bf16 %v2815_v42, %v2767_v41  ;;  %v5529_v8 = vpop.permute.xlu0 %5528  ;;  %v2771_v31 = vsel %vm1525_vm2, %v9349_v36, %v5416_v32  ;;  %v2789_v47 = vsel %vm262_vm0, %v7894_v0, %v5461_v59 }
 0x39f   : > { %v5531_v34 = vunpack.i.h.bf16 %v5529_v8  ;;  %v5530_v13 = vunpack.i.l.bf16 %v5529_v8  ;;  %v2788_v10 = vsel %vm262_vm0, %v9350_v57, %v5460_v1  ;;  %v2805_v5 = vsel %vm1508_vm1, %v2789_v47, %v5501_v22 }
 0x3a0   : > { %2927 = vst [vmem:[#allocation2 + $0xc0] sm:$0xff] %v4934_v16  ;;  %2928 = vst [vmem:[#allocation2 + $0xc8] sm:$0xff] %v4935_v7  ;;  %v2804_v46 = vsel %vm1508_vm1, %v2788_v10, %v5500_v37  ;;  %v2773_v53 = vsel %vm1525_vm2, %v9351_v9, %v5421_v38  ;;  %v2772_v0 = vsel %vm1525_vm2, %v9352_v55, %v5420_v17 }
 0x3a1   : > { %v2817_v56 = vsel %vm1525_vm2, %v2801_v27, %v5531_v34  ;;  %v2816_v21 = vsel %vm1525_vm2, %v2800_v58, %v5530_v13 }
 0x3a2   : > { %v4937_v18 = vpack.c.bf16 %v2817_v56, %v7930_v2  ;;  %v4936_v54 = vpack.c.bf16 %v2816_v21, %v7934_v50  ;;  %v5534_v33 = vpop.permute.xlu1 %5533  ;;  %v9348_v2 = vld [vmem:[#allocation63_spill] sm:$0xff] }
 0x3a3   : > { %v5536_v60 = vunpack.i.h.bf16 %v5534_v33  ;;  %v5535_v30 = vunpack.i.l.bf16 %v5534_v33  ;;  %v2770_v50 = vsel %vm1525_vm2, %v9348_v2, %v5415_v62 }
 0x3a4   : > { %2930 = vst [vmem:[#allocation2 + $0xd8] sm:$0xff] %v4937_v18  ;;  %2929 = vst [vmem:[#allocation2 + $0xd0] sm:$0xff] %v4936_v54 }
 0x3a5   : > { %v2818_v44 = vsel %vm1525_vm2, %v2802_v14, %v5535_v30  ;;  %v2819_v25 = vsel %vm1525_vm2, %v2803_v29, %v5536_v60 }
 0x3a6   : > { %v4938_v3 = vpack.c.bf16 %v2818_v44, %v2770_v50  ;;  %v4939_v39 = vpack.c.bf16 %v2819_v25, %v2771_v31  ;;  %v5539_v6 = vpop.permute.xlu0 %5538 }
 0x3a7   : > { %v5541_v12 = vunpack.i.h.bf16 %v5539_v6  ;;  %v5540_v49 = vunpack.i.l.bf16 %v5539_v6 }
 0x3a8   : > { %2931 = vst [vmem:[#allocation2 + $0xe0] sm:$0xff] %v4938_v3  ;;  %2932 = vst [vmem:[#allocation2 + $0xe8] sm:$0xff] %v4939_v39 }
 0x3a9   : > { %v2821_v43 = vsel %vm1525_vm2, %v2805_v5, %v5541_v12  ;;  %v2820_v52 = vsel %vm1525_vm2, %v2804_v46, %v5540_v49 }
 0x3aa   : > { %v4941_v19 = vpack.c.bf16 %v2821_v43, %v2773_v53  ;;  %v4940_v40 = vpack.c.bf16 %v2820_v52, %v2772_v0 }
 0x3ac   : > { %2934 = vst [vmem:[#allocation2 + $0xf8] sm:$0xff] %v4941_v19  ;;  %2933 = vst [vmem:[#allocation2 + $0xf0] sm:$0xff] %v4940_v40 }
 0x3ad PF: > { %v5566_v38 = vld [vmem:[%s5752_s27 + $0x74] ss:$8 sps:$4 sm:$0xff]   ;;  %v5568_v24 = vld [vmem:[%s5752_s27 + $0x70] ss:$8 sps:$4 sm:$0xff]   ;;  %v5569_v17 = vld [vmem:[%s5752_s27 + $0x64] ss:$8 sps:$4 sm:$0xff]  }
 0x3ae   : > { %3290 = vmatprep.subr.bf16.mxu0 %v5566_v38  ;;  %4959 = vmatprep.subr.bf16.mxu1 %v5566_v38  ;;  %v5571_v28 = vld [vmem:[%s5752_s27 + $0x60] ss:$8 sps:$4 sm:$0xff]   ;;  %v5572_v41 = vld [vmem:[%s5752_s27 + $0x54] ss:$8 sps:$4 sm:$0xff]   ;;  %v5574_v45 = vld [vmem:[%s5752_s27 + $0x50] ss:$8 sps:$4 sm:$0xff]  }
 0x3af   : > { %3291 = vmatpush1.bf16.msra.mxu0 %v5568_v24  ;;  %4975 = vmatpush1.bf16.msra.mxu1 %v5568_v24  ;;  %v5575_v42 = vld [vmem:[%s5752_s27 + $0x44] ss:$8 sps:$4 sm:$0xff]   ;;  %v5577_v20 = vld [vmem:[%s5752_s27 + $0x40] ss:$8 sps:$4 sm:$0xff]   ;;  %v5578_v11 = vld [vmem:[%s5752_s27 + $0x34] ss:$8 sps:$4 sm:$0xff]  }
 0x3b0   : > { %3292 = vmatprep.subr.bf16.mxu0 %v5569_v17  ;;  %4960 = vmatprep.subr.bf16.mxu1 %v5569_v17  ;;  %v5580_v16 = vld [vmem:[%s5752_s27 + $0x30] ss:$8 sps:$4 sm:$0xff]   ;;  %v5581_v7 = vld [vmem:[%s5752_s27 + $0x24] ss:$8 sps:$4 sm:$0xff]   ;;  %s4942_s9 = sshll.u32 %s5744_s22, 7  ;;  %p4890_p5 = scmp.ne.s32.totalorder %s5744_s22, 1 }
 0x3b1   : > { %v5583_v8 = vld [vmem:[%s5752_s27 + $0x20] ss:$8 sps:$4 sm:$0xff]   ;;  %v5584_v15 = vld [vmem:[%s5752_s27 + $0x14] ss:$8 sps:$4 sm:$0xff]   ;;  %s8084_s10 = scalar_lea.vmem [#allocation2], %s4942_s9 }
 0x3b2   : > { %v5586_v4 = vld [vmem:[%s5752_s27 + $0x10] ss:$8 sps:$4 sm:$0xff]   ;;  %v5587_v13 = vld [vmem:[%s5752_s27 + $0x4] ss:$8 sps:$4 sm:$0xff]   ;;  %v5589_v27 = vld [vmem:[%s5752_s27] ss:$8 sps:$4 sm:$0xff]  }
 0x3b3   : > { %3293 = vmatpush1.bf16.msra.mxu0 %v5571_v28  ;;  %4976 = vmatpush1.bf16.msra.mxu1 %v5571_v28  ;;  %v5616_v48 = vld [vmem:[%s8084_s10 + $0x4] ss:$8 sps:$4 sm:$0xff]   ;;  %v5590_v58 = vld [vmem:[%s5752_s27 + $0xf4] ss:$8 sps:$4 sm:$0xff]   ;;  %v5592_v26 = vld [vmem:[%s5752_s27 + $0xf0] ss:$8 sps:$4 sm:$0xff]  }
 0x3b4   : > { %3294 = vmatprep.subr.bf16.mxu0 %v5572_v41  ;;  %4961 = vmatprep.subr.bf16.mxu1 %v5572_v41  ;;  %v5619_v34 = vld [vmem:[%s8084_s10 + $0x44] ss:$8 sps:$4 sm:$0xff]   ;;  %v5595_v61 = vld [vmem:[%s5752_s27 + $0xe0] ss:$8 sps:$4 sm:$0xff]   ;;  %v5596_v32 = vld [vmem:[%s5752_s27 + $0xd4] ss:$8 sps:$4 sm:$0xff]  }
 0x3b5   : > { %3322 = vmatprep.mubr.bf16.mxu0 %v5616_v48  ;;  %3362 = vmatprep.mubr.bf16.mxu1 %v5619_v34  ;;  %v5593_v23 = vld [vmem:[%s5752_s27 + $0xe4] ss:$8 sps:$4 sm:$0xff]   ;;  %v5598_v62 = vld [vmem:[%s5752_s27 + $0xd0] ss:$8 sps:$4 sm:$0xff]   ;;  %v5601_v21 = vld [vmem:[%s5752_s27 + $0xc0] ss:$8 sps:$4 sm:$0xff]  }
 0x3b6   : > { %v5599_v56 = vld [vmem:[%s5752_s27 + $0xc4] ss:$8 sps:$4 sm:$0xff]   ;;  %v5602_v51 = vld [vmem:[%s5752_s27 + $0xb4] ss:$8 sps:$4 sm:$0xff]   ;;  %v5604_v59 = vld [vmem:[%s5752_s27 + $0xb0] ss:$8 sps:$4 sm:$0xff]  }
 0x3b7   : > { %3295 = vmatpush1.bf16.msra.mxu0 %v5574_v45  ;;  %4977 = vmatpush1.bf16.msra.mxu1 %v5574_v45  ;;  %v5605_v1 = vld [vmem:[%s5752_s27 + $0xa4] ss:$8 sps:$4 sm:$0xff]   ;;  %v5607_v18 = vld [vmem:[%s5752_s27 + $0xa0] ss:$8 sps:$4 sm:$0xff]   ;;  %v5608_v54 = vld [vmem:[%s5752_s27 + $0x94] ss:$8 sps:$4 sm:$0xff]  }
 0x3b8   : > { %3296 = vmatprep.subr.bf16.mxu0 %v5575_v42  ;;  %4962 = vmatprep.subr.bf16.mxu1 %v5575_v42  ;;  %v5610_v33 = vld [vmem:[%s5752_s27 + $0x90] ss:$8 sps:$4 sm:$0xff]   ;;  %v5611_v35 = vld [vmem:[%s5752_s27 + $0x84] ss:$8 sps:$4 sm:$0xff]   ;;  %v5613_v63 = vld [vmem:[%s5752_s27 + $0x80] ss:$8 sps:$4 sm:$0xff]  }
 0x3b9   : > { %v5614_v60 = vld [vmem:[%s8084_s10] ss:$8 sps:$4 sm:$0xff]   ;;  %v5620_v14 = vld [vmem:[%s8084_s10 + $0x14] ss:$8 sps:$4 sm:$0xff]   ;;  %v5624_v22 = vld [vmem:[%s8084_s10 + $0x10] ss:$8 sps:$4 sm:$0xff]  }
 0x3ba   : > { %v5617_v30 = vld [vmem:[%s8084_s10 + $0x40] ss:$8 sps:$4 sm:$0xff]   ;;  %v5622_v29 = vld [vmem:[%s8084_s10 + $0x54] ss:$8 sps:$4 sm:$0xff]   ;;  %v5625_v37 = vld [vmem:[%s8084_s10 + $0x50] ss:$8 sps:$4 sm:$0xff]  }
 0x3bb   : > { %3297 = vmatpush1.bf16.msra.mxu0 %v5577_v20  ;;  %4978 = vmatpush1.bf16.msra.mxu1 %v5577_v20  ;;  %v5626_v2 = vld [vmem:[%s8084_s10 + $0x24] ss:$8 sps:$4 sm:$0xff]   ;;  %v5630_v36 = vld [vmem:[%s8084_s10 + $0x20] ss:$8 sps:$4 sm:$0xff]   ;;  %v5632_v44 = vld [vmem:[%s8084_s10 + $0x34] ss:$8 sps:$4 sm:$0xff]  }
 0x3bc   : > { %3298 = vmatprep.subr.bf16.mxu0 %v5578_v11  ;;  %4963 = vmatprep.subr.bf16.mxu1 %v5578_v11  ;;  %v5628_v50 = vld [vmem:[%s8084_s10 + $0x64] ss:$8 sps:$4 sm:$0xff]   ;;  %v5631_v31 = vld [vmem:[%s8084_s10 + $0x60] ss:$8 sps:$4 sm:$0xff]   ;;  %v5634_v25 = vld [vmem:[%s8084_s10 + $0x74] ss:$8 sps:$4 sm:$0xff]  }
 0x3bd   : > { %v5636_v3 = vld [vmem:[%s8084_s10 + $0x30] ss:$8 sps:$4 sm:$0xff]   ;;  %v2968_v12 = vld [vmem:[#allocation3] sm:$0xff]  ;;  %v2986_v24 = vld [vmem:[#allocation3 + $0xc8] sm:$0xff] }
 0x3be   : > { %v5637_v39 = vld [vmem:[%s8084_s10 + $0x70] ss:$8 sps:$4 sm:$0xff]   ;;  %v2985_v0 = vld [vmem:[#allocation3 + $0x40] sm:$0xff] }
 0x3bf   : > { %3299 = vmatpush1.bf16.msra.mxu0 %v5580_v16  ;;  %4979 = vmatpush1.bf16.msra.mxu1 %v5580_v16  ;;  %v2967_v6 = vld [vmem:[#allocation3 + $0xb0] sm:$0xff]  ;;  %v2983_v47 = vld [vmem:[#allocation3 + $0x38] sm:$0xff]  ;;  %v2987_v20 = vld [vmem:[#allocation3 + $0xe0] sm:$0xff] }
 0x3c0   : > { %3300 = vmatprep.subr.bf16.mxu0 %v5581_v7  ;;  %4964 = vmatprep.subr.bf16.mxu1 %v5581_v7  ;;  %v2984_v49 = vld [vmem:[#allocation3 + $0x58] sm:$0xff]  ;;  %v2971_v42 = vld [vmem:[#allocation3 + $0x50] sm:$0xff] }
 0x3c1   : > { %v2969_v55 = vld [vmem:[#allocation3 + $0xd8] sm:$0xff]  ;;  %v2988_v48 = vld [vmem:[#allocation3 + $0x90] sm:$0xff] }
 0x3c2   : > { %v2970_v38 = vld [vmem:[#allocation3 + $0x18] sm:$0xff] }
 0x3c3   : > { %3301 = vmatpush1.bf16.msra.mxu0 %v5583_v8  ;;  %4980 = vmatpush1.bf16.msra.mxu1 %v5583_v8 }
 0x3c4   : > { %3302 = vmatprep.subr.bf16.mxu0 %v5584_v15  ;;  %4965 = vmatprep.subr.bf16.mxu1 %v5584_v15  ;;  %v2972_v15 = vld [vmem:[#allocation3 + $0x68] sm:$0xff] }
 0x3c7   : > { %3303 = vmatpush1.bf16.msra.mxu0 %v5586_v4  ;;  %4981 = vmatpush1.bf16.msra.mxu1 %v5586_v4 }
 0x3c8   : > { %3304 = vmatprep.subr.bf16.mxu0 %v5587_v13  ;;  %4966 = vmatprep.subr.bf16.mxu1 %v5587_v13 }
 0x3cb   : > { %3305 = vmatpush1.bf16.msra.mxu0 %v5589_v27  ;;  %4982 = vmatpush1.bf16.msra.mxu1 %v5589_v27 }
 0x3cc   : > { %3306 = vmatprep.subr.bf16.mxu0 %v5590_v58  ;;  %4967 = vmatprep.subr.bf16.mxu1 %v5590_v58  ;;  %v2973_v58 = vld [vmem:[#allocation3 + $0x30] sm:$0xff] }
 0x3cf   : > { %3307 = vmatpush2.bf16.msra.mxu0 %v5592_v26  ;;  %4983 = vmatpush2.bf16.msra.mxu1 %v5592_v26  ;;  %v2989_v26 = vld [vmem:[#allocation3 + $0x70] sm:$0xff] }
 0x3d0   : > { %3308 = vmatprep.subr.bf16.mxu0 %v5593_v23  ;;  %4968 = vmatprep.subr.bf16.mxu1 %v5593_v23 }
 0x3d3   : > { %3309 = vmatpush2.bf16.msra.mxu0 %v5595_v61  ;;  %4984 = vmatpush2.bf16.msra.mxu1 %v5595_v61 }
 0x3d4   : > { %3310 = vmatprep.subr.bf16.mxu0 %v5596_v32  ;;  %4969 = vmatprep.subr.bf16.mxu1 %v5596_v32 }
 0x3d7   : > { %3311 = vmatpush2.bf16.msra.mxu0 %v5598_v62  ;;  %4985 = vmatpush2.bf16.msra.mxu1 %v5598_v62 }
 0x3d8   : > { %3312 = vmatprep.subr.bf16.mxu0 %v5599_v56  ;;  %4970 = vmatprep.subr.bf16.mxu1 %v5599_v56  ;;  %v2974_v56 = vld [vmem:[#allocation3 + $0x48] sm:$0xff] }
 0x3db   : > { %3313 = vmatpush2.bf16.msra.mxu0 %v5601_v21  ;;  %4986 = vmatpush2.bf16.msra.mxu1 %v5601_v21  ;;  %v2990_v21 = vld [vmem:[#allocation3 + $0xc0] sm:$0xff] }
 0x3dc   : > { %3314 = vmatprep.subr.bf16.mxu0 %v5602_v51  ;;  %4971 = vmatprep.subr.bf16.mxu1 %v5602_v51 }
 0x3df   : > { %3315 = vmatpush2.bf16.msra.mxu0 %v5604_v59  ;;  %4987 = vmatpush2.bf16.msra.mxu1 %v5604_v59 }
 0x3e0   : > { %3316 = vmatprep.subr.bf16.mxu0 %v5605_v1  ;;  %4972 = vmatprep.subr.bf16.mxu1 %v5605_v1 }
 0x3e3   : > { %3317 = vmatpush2.bf16.msra.mxu0 %v5607_v18  ;;  %4988 = vmatpush2.bf16.msra.mxu1 %v5607_v18 }
 0x3e4   : > { %3318 = vmatprep.subr.bf16.mxu0 %v5608_v54  ;;  %4973 = vmatprep.subr.bf16.mxu1 %v5608_v54  ;;  %v2975_v54 = vld [vmem:[#allocation3 + $0x80] sm:$0xff] }
 0x3e7   : > { %3319 = vmatpush2.bf16.msra.mxu0 %v5610_v33  ;;  %4989 = vmatpush2.bf16.msra.mxu1 %v5610_v33  ;;  %v2991_v33 = vld [vmem:[#allocation3 + $0xa8] sm:$0xff] }
 0x3e8   : > { %3320 = vmatprep.subr.bf16.mxu0 %v5611_v35  ;;  %4974 = vmatprep.subr.bf16.mxu1 %v5611_v35 }
 0x3eb   : > { %3321 = vmatpush2.bf16.msra.mxu0 %v5613_v63  ;;  %4990 = vmatpush2.bf16.msra.mxu1 %v5613_v63 }
 0x3ee   : > { %3323 = vmatmul.mubr.bf16.vlgmr.msra.gmra.mxu0 %v5614_v60  ;;  %3363 = vmatmul.mubr.bf16.vlgmr.msra.gmra.mxu1 %v5617_v30 }
 0x3ef   : > { %3332 = vmatprep.mubr.bf16.mxu0 %v5620_v14  ;;  %3372 = vmatprep.mubr.bf16.mxu1 %v5622_v29  ;;  %v2976_v14 = vld [vmem:[#allocation3 + $0x88] sm:$0xff]  ;;  %v2992_v29 = vld [vmem:[#allocation3 + $0xd0] sm:$0xff] }
 0x3f6   : > { %3333 = vmatmul.mubr.bf16.gmra.mxu0 %v5624_v22  ;;  %3373 = vmatmul.mubr.bf16.gmra.mxu1 %v5625_v37 }
 0x3f7   : > { %3342 = vmatprep.mubr.bf16.mxu0 %v5626_v2  ;;  %3382 = vmatprep.mubr.bf16.mxu1 %v5628_v50 }
 0x3fe   : > { %3343 = vmatmul.mubr.bf16.gmra.mxu0 %v5630_v36  ;;  %3383 = vmatmul.mubr.bf16.gmra.mxu1 %v5631_v31  ;;  %v2977_v36 = vld [vmem:[#allocation3 + $0xe8] sm:$0xff]  ;;  %v2993_v31 = vld [vmem:[#allocation3 + $0x10] sm:$0xff] }
 0x3ff   : > { %3352 = vmatprep.mubr.bf16.mxu0 %v5632_v44  ;;  %3392 = vmatprep.mubr.bf16.mxu1 %v5634_v25 }
 0x406   : > { %3353 = vmatmul.mubr.bf16.gmra.mxu0 %v5636_v3  ;;  %3393 = vmatmul.mubr.bf16.gmra.mxu1 %v5637_v39 }
 0x4ae   : > { %v3324_v57 = vpop.f32.mrf.mxu0  ;;  %v3364_v10 = vpop.f32.mrf.mxu1 }
 0x4af   : > { %v3403_v5 = vadd.f32 %v3324_v57, %v2967_v6  ;;  %v3419_v46 = vadd.f32 %v3364_v10, %v2983_v47  ;;  %v2978_v6 = vld [vmem:[#allocation3 + $0xb8] sm:$0xff]  ;;  %v2994_v47 = vld [vmem:[#allocation3 + $0x28] sm:$0xff] }
 0x4b0   : > { %v3326_v9 = vpop.f32.mrf.mxu0  ;;  %v3366_v53 = vpop.f32.mrf.mxu1 }
 0x4b1   : > { %3435 = vst [vmem:[#allocation3 + $0xb0] sm:$0xff] %v3403_v5  ;;  %3451 = vst [vmem:[#allocation3 + $0x38] sm:$0xff] %v3419_v46  ;;  %v3404_v43 = vadd.f32 %v3326_v9, %v2968_v12  ;;  %v3420_v52 = vadd.f32 %v3366_v53, %v2984_v49  ;;  %v2979_v5 = vld [vmem:[#allocation3 + $0x60] sm:$0xff] }
 0x4b2   : > { %v3328_v19 = vpop.f32.mrf.mxu0  ;;  %v3368_v40 = vpop.f32.mrf.mxu1  ;;  %v2995_v46 = vld [vmem:[#allocation3 + $0xa0] sm:$0xff] }
 0x4b3   : > { %3436 = vst [vmem:[#allocation3] sm:$0xff] %v3404_v43  ;;  %3452 = vst [vmem:[#allocation3 + $0x58] sm:$0xff] %v3420_v52  ;;  %v3405_v17 = vadd.f32 %v3328_v19, %v2969_v55  ;;  %v3421_v28 = vadd.f32 %v3368_v40, %v2985_v0  ;;  %v2980_v43 = vld [vmem:[#allocation3 + $0xf0] sm:$0xff]  ;;  %v2996_v52 = vld [vmem:[#allocation3 + $0xf8] sm:$0xff] }
 0x4b4   : > { %v3330_v41 = vpop.f32.mrf.mxu0  ;;  %v3370_v45 = vpop.f32.mrf.mxu1 }
 0x4b5   : > { %3437 = vst [vmem:[#allocation3 + $0xd8] sm:$0xff] %v3405_v17  ;;  %3453 = vst [vmem:[#allocation3 + $0x40] sm:$0xff] %v3421_v28  ;;  %v3406_v11 = vadd.f32 %v3330_v41, %v2970_v38  ;;  %v3422_v16 = vadd.f32 %v3370_v45, %v2986_v24  ;;  %v2981_v17 = vld [vmem:[#allocation3 + $0x8] sm:$0xff]  ;;  %v2997_v28 = vld [vmem:[#allocation3 + $0x20] sm:$0xff] }
 0x4b6   : > { %v3334_v7 = vpop.f32.mrf.mxu0  ;;  %v3374_v8 = vpop.f32.mrf.mxu1 }
 0x4b7   : > { %3438 = vst [vmem:[#allocation3 + $0x18] sm:$0xff] %v3406_v11  ;;  %3454 = vst [vmem:[#allocation3 + $0xc8] sm:$0xff] %v3422_v16  ;;  %v3407_v4 = vadd.f32 %v3334_v7, %v2971_v42  ;;  %v3423_v34 = vadd.f32 %v3374_v8, %v2987_v20  ;;  %v2982_v11 = vld [vmem:[#allocation3 + $0x78] sm:$0xff] }
 0x4b8   : > { %v3336_v13 = vpop.f32.mrf.mxu0  ;;  %v3376_v27 = vpop.f32.mrf.mxu1  ;;  %v2998_v16 = vld [vmem:[#allocation3 + $0x98] sm:$0xff] }
 0x4b9   : > { %3439 = vst [vmem:[#allocation3 + $0x50] sm:$0xff] %v3407_v4  ;;  %3455 = vst [vmem:[#allocation3 + $0xe0] sm:$0xff] %v3423_v34  ;;  %v3408_v23 = vadd.f32 %v3336_v13, %v2972_v15  ;;  %v3424_v61 = vadd.f32 %v3376_v27, %v2988_v48 }
 0x4ba   : > { %v3338_v32 = vpop.f32.mrf.mxu0  ;;  %v3378_v62 = vpop.f32.mrf.mxu1 }
 0x4bb   : > { %3440 = vst [vmem:[#allocation3 + $0x68] sm:$0xff] %v3408_v23  ;;  %3456 = vst [vmem:[#allocation3 + $0x90] sm:$0xff] %v3424_v61  ;;  %v3409_v51 = vadd.f32 %v3338_v32, %v2973_v58  ;;  %v3425_v59 = vadd.f32 %v3378_v62, %v2989_v26 }
 0x4bc   : > { %v3340_v1 = vpop.f32.mrf.mxu0  ;;  %v3380_v18 = vpop.f32.mrf.mxu1 }
 0x4bd   : > { %3441 = vst [vmem:[#allocation3 + $0x30] sm:$0xff] %v3409_v51  ;;  %3457 = vst [vmem:[#allocation3 + $0x70] sm:$0xff] %v3425_v59  ;;  %v3410_v35 = vadd.f32 %v3340_v1, %v2974_v56  ;;  %v3426_v63 = vadd.f32 %v3380_v18, %v2990_v21 }
 0x4be   : > { %v3344_v60 = vpop.f32.mrf.mxu0  ;;  %v3384_v30 = vpop.f32.mrf.mxu1 }
 0x4bf   : > { %3442 = vst [vmem:[#allocation3 + $0x48] sm:$0xff] %v3410_v35  ;;  %3458 = vst [vmem:[#allocation3 + $0xc0] sm:$0xff] %v3426_v63  ;;  %v3411_v22 = vadd.f32 %v3344_v60, %v2975_v54  ;;  %v3427_v37 = vadd.f32 %v3384_v30, %v2991_v33 }
 0x4c0   : > { %v3346_v2 = vpop.f32.mrf.mxu0  ;;  %v3386_v50 = vpop.f32.mrf.mxu1 }
 0x4c1   : > { %3443 = vst [vmem:[#allocation3 + $0x80] sm:$0xff] %v3411_v22  ;;  %3459 = vst [vmem:[#allocation3 + $0xa8] sm:$0xff] %v3427_v37  ;;  %v3412_v44 = vadd.f32 %v3346_v2, %v2976_v14  ;;  %v3428_v25 = vadd.f32 %v3386_v50, %v2992_v29 }
 0x4c2   : > { %v3348_v3 = vpop.f32.mrf.mxu0  ;;  %v3388_v39 = vpop.f32.mrf.mxu1 }
 0x4c3   : > { %3444 = vst [vmem:[#allocation3 + $0x88] sm:$0xff] %v3412_v44  ;;  %3460 = vst [vmem:[#allocation3 + $0xd0] sm:$0xff] %v3428_v25  ;;  %v3413_v57 = vadd.f32 %v3348_v3, %v2977_v36  ;;  %v3429_v10 = vadd.f32 %v3388_v39, %v2993_v31 }
 0x4c4   : > { %v3350_v12 = vpop.f32.mrf.mxu0  ;;  %v3390_v49 = vpop.f32.mrf.mxu1 }
 0x4c5   : > { %3445 = vst [vmem:[#allocation3 + $0xe8] sm:$0xff] %v3413_v57  ;;  %3461 = vst [vmem:[#allocation3 + $0x10] sm:$0xff] %v3429_v10  ;;  %v3414_v9 = vadd.f32 %v3350_v12, %v2978_v6  ;;  %v3430_v53 = vadd.f32 %v3390_v49, %v2994_v47 }
 0x4c6   : > { %v3354_v55 = vpop.f32.mrf.mxu0  ;;  %v3394_v0 = vpop.f32.mrf.mxu1 }
 0x4c7   : > { %3446 = vst [vmem:[#allocation3 + $0xb8] sm:$0xff] %v3414_v9  ;;  %3462 = vst [vmem:[#allocation3 + $0x28] sm:$0xff] %v3430_v53  ;;  %v3415_v19 = vadd.f32 %v3354_v55, %v2979_v5  ;;  %v3431_v40 = vadd.f32 %v3394_v0, %v2995_v46 }
 0x4c8   : > { %v3356_v38 = vpop.f32.mrf.mxu0  ;;  %v3396_v24 = vpop.f32.mrf.mxu1 }
 0x4c9   : > { %3447 = vst [vmem:[#allocation3 + $0x60] sm:$0xff] %v3415_v19  ;;  %3463 = vst [vmem:[#allocation3 + $0xa0] sm:$0xff] %v3431_v40  ;;  %v3416_v41 = vadd.f32 %v3356_v38, %v2980_v43  ;;  %v3432_v45 = vadd.f32 %v3396_v24, %v2996_v52 }
 0x4ca   : > { %v3358_v42 = vpop.f32.mrf.mxu0  ;;  %v3398_v20 = vpop.f32.mrf.mxu1 }
 0x4cb   : > { %3448 = vst [vmem:[#allocation3 + $0xf0] sm:$0xff] %v3416_v41  ;;  %3464 = vst [vmem:[#allocation3 + $0xf8] sm:$0xff] %v3432_v45  ;;  %v3417_v7 = vadd.f32 %v3358_v42, %v2981_v17  ;;  %v3433_v8 = vadd.f32 %v3398_v20, %v2997_v28  ;;  %3470 = sbr.rel (%p4890_p5) target bundleno = 2219 (0x8ab), region = 52 }
 0x4cc   : > { %v3360_v15 = vpop.f32.mrf.mxu0  ;;  %v3400_v48 = vpop.f32.mrf.mxu1 }
 0x4cd   : > { %3449 = vst [vmem:[#allocation3 + $0x8] sm:$0xff] %v3417_v7  ;;  %3465 = vst [vmem:[#allocation3 + $0x20] sm:$0xff] %v3433_v8  ;;  %v3418_v4 = vadd.f32 %v3360_v15, %v2982_v11  ;;  %v3434_v34 = vadd.f32 %v3400_v48, %v2998_v16 }
 0x4cf   : > { %3450 = vst [vmem:[#allocation3 + $0x78] sm:$0xff] %v3418_v4  ;;  %3466 = vst [vmem:[#allocation3 + $0x98] sm:$0xff] %v3434_v34 }
 0x4d0   : > { %v8125_v13 = vld [vmem:[%s9016_s2 + $0x10] sm:$0xff]  ;;  %v8130_v27 = vld [vmem:[%s9016_s2] sm:$0xff]  ;;  %v5692_v58 = vmov 0   ;;  %v8137_v26 = vld [vmem:[%s9016_s2 + $0x18] sm:$0xff]  ;;  %v5693_v63 = vmov 1   ;;  %v5694_v60 = vmov 2  }
 0x4d1   : > { %5639 = vset.pattern.permute.xlu1 %v5692_v58  ;;  %5638 = vset.pattern.permute.xlu0 %v5692_v58  ;;  %v8142_v23 = vld [vmem:[%s9016_s2 + $0x8] sm:$0xff]  ;;  %v8154_v32 = vld [vmem:[%s9016_s2 + $0x20] sm:$0xff]  ;;  %v8161_v62 = vld [vmem:[%s9016_s2 + $0x38] sm:$0xff]  ;;  %v5695_v30 = vmov 3   ;;  %s5696_s29 = smov 96   ;;  %s5697_s30 = smov 64  }
 0x4d2   : > { %3531 = vperm.xlu1 %5639, %v8125_v13   ;;  %3521 = vperm.xlu0 %5638, %v8130_v27   ;;  %v8149_v61 = vld [vmem:[%s9016_s2 + $0x28] sm:$0xff]  ;;  %v8166_v56 = vld [vmem:[%s9016_s2 + $0x30] sm:$0xff]  ;;  %v8178_v51 = vld [vmem:[%s9016_s2 + $0x40] sm:$0xff]  ;;  %s5699_s7 = smov 32   ;;  %vm4751_vm3 = vcmask 257024  }
 0x4d3   : > { %v8173_v21 = vld [vmem:[%s9016_s2 + $0x48] sm:$0xff]  ;;  %v8185_v59 = vld [vmem:[%s9016_s2 + $0x58] sm:$0xff]  ;;  %v8190_v1 = vld [vmem:[%s9016_s2 + $0x50] sm:$0xff] }
 0x4d4   : > { %v8197_v18 = vld [vmem:[%s9016_s2 + $0x68] sm:$0xff]  ;;  %v8202_v54 = vld [vmem:[%s9016_s2 + $0x60] sm:$0xff]  ;;  %v8209_v33 = vld [vmem:[%s9016_s2 + $0x78] sm:$0xff] }
 0x4d5   : > { %v8214_v35 = vld [vmem:[%s9016_s2 + $0x70] sm:$0xff]  ;;  %v8284_v49 = vld [vmem:[#allocation3 + $0xd8] sm:$0xff]  ;;  %v8298_v38 = vld [vmem:[#allocation3 + $0xe8] sm:$0xff] }
 0x4d6   : > { %3536 = vperm.xlu1 %5639, %v8137_v26   ;;  %3526 = vperm.xlu0 %5638, %v8142_v23   ;;  %v8282_v12 = vld [vmem:[#allocation3 + $0xb0] sm:$0xff]  ;;  %v8300_v24 = vld [vmem:[#allocation3 + $0x80] sm:$0xff]  ;;  %v8306_v42 = vld [vmem:[#allocation3 + $0x8] sm:$0xff] }
 0x4d7   : > { %v8290_v55 = vld [vmem:[#allocation3 + $0x50] sm:$0xff]  ;;  %v8308_v20 = vld [vmem:[#allocation3 + $0x60] sm:$0xff]  ;;  %v8316_v48 = vld [vmem:[#allocation3 + $0x38] sm:$0xff] }
 0x4d8   : > { %v8292_v0 = vld [vmem:[#allocation3 + $0x30] sm:$0xff]  ;;  %v8314_v15 = vld [vmem:[#allocation3 + $0x40] sm:$0xff] }
 0x4da   : > { %3546 = vperm.xlu1 %5639, %v8149_v61   ;;  %3541 = vperm.xlu0 %5638, %v8154_v32  }
 0x4de   : > { %3556 = vperm.xlu1 %5639, %v8161_v62   ;;  %3551 = vperm.xlu0 %5638, %v8166_v56  }
 0x4e2   : > { %3566 = vperm.xlu1 %5639, %v8173_v21   ;;  %3561 = vperm.xlu0 %5638, %v8178_v51  }
 0x4e6   : > { %3576 = vperm.xlu1 %5639, %v8185_v59   ;;  %3571 = vperm.xlu0 %5638, %v8190_v1  }
 0x4ea   : > { %3586 = vperm.xlu1 %5639, %v8197_v18   ;;  %3581 = vperm.xlu0 %5638, %v8202_v54  }
 0x4ee   : > { %3596 = vperm.xlu1 %5639, %v8209_v33   ;;  %3591 = vperm.xlu0 %5638, %v8214_v35  }
 0x4f2   : > { %5641 = vset.pattern.permute.xlu1 %v5693_v63  ;;  %5640 = vset.pattern.permute.xlu0 %v5693_v63 }
 0x4f3   : > { %3636 = vperm.xlu1 %5641, %v8142_v23   ;;  %3632 = vperm.xlu0 %5640, %v8130_v27  }
 0x4f7   : > { %3640 = vperm.xlu1 %5641, %v8125_v13   ;;  %3644 = vperm.xlu0 %5640, %v8137_v26  }
 0x4fb   : > { %3648 = vperm.xlu1 %5641, %v8154_v32   ;;  %3652 = vperm.xlu0 %5640, %v8149_v61  }
 0x4ff   : > { %3656 = vperm.xlu1 %5641, %v8166_v56   ;;  %3660 = vperm.xlu0 %5640, %v8161_v62  }
 0x503   : > { %3664 = vperm.xlu1 %5641, %v8178_v51   ;;  %3668 = vperm.xlu0 %5640, %v8173_v21  }
 0x507   : > { %3672 = vperm.xlu1 %5641, %v8190_v1   ;;  %3676 = vperm.xlu0 %5640, %v8185_v59  }
 0x50b   : > { %3680 = vperm.xlu1 %5641, %v8202_v54   ;;  %3684 = vperm.xlu0 %5640, %v8197_v18  }
 0x50f   : > { %3688 = vperm.xlu1 %5641, %v8214_v35   ;;  %3692 = vperm.xlu0 %5640, %v8209_v33  }
 0x513   : > { %5642 = vset.pattern.permute.xlu1 %v5694_v60  ;;  %5643 = vset.pattern.permute.xlu0 %v5694_v60  ;;  %v8322_v60 = vld [vmem:[#allocation3 + $0x70] sm:$0xff] }
 0x514   : > { %3792 = vperm.xlu1 %5642, %v8130_v27   ;;  %3796 = vperm.xlu0 %5643, %v8142_v23  }
 0x518   : > { %3800 = vperm.xlu1 %5642, %v8125_v13   ;;  %3808 = vperm.xlu0 %5643, %v8154_v32  }
 0x51c   : > { %3804 = vperm.xlu1 %5642, %v8137_v26   ;;  %3816 = vperm.xlu0 %5643, %v8166_v56  }
 0x520   : > { %3812 = vperm.xlu1 %5642, %v8149_v61   ;;  %3824 = vperm.xlu0 %5643, %v8178_v51  }
 0x524   : > { %3820 = vperm.xlu1 %5642, %v8161_v62   ;;  %3832 = vperm.xlu0 %5643, %v8190_v1  }
 0x528   : > { %3828 = vperm.xlu1 %5642, %v8173_v21   ;;  %3840 = vperm.xlu0 %5643, %v8202_v54  }
 0x52c   : > { %3836 = vperm.xlu1 %5642, %v8185_v59   ;;  %3848 = vperm.xlu0 %5643, %v8214_v35  }
 0x530   : > { %3844 = vperm.xlu1 %5642, %v8197_v18   ;;  %5644 = vset.pattern.permute.xlu0 %v5695_v30 }
 0x534   : > { %3852 = vperm.xlu1 %5642, %v8209_v33  }
 0x538   : > { %5645 = vset.pattern.permute.xlu1 %v5695_v30  ;;  %v8324_v30 = vld [vmem:[#allocation3 + $0xe0] sm:$0xff] }
 0x539   : > { %9364 = vst [vmem:[#allocation79_spill] sm:$0xff] %v8324_v30 }
 0x54d   : > { %v8250_v14 = vpop.permute.xlu1 %3531  ;;  %v8252_v29 = vpop.permute.xlu0 %3521 }
 0x54e   : > { %9353 = vst [vmem:[#allocation68_spill] sm:$0xff] %v8250_v14  ;;  %9354 = vst [vmem:[#allocation69_spill] sm:$0xff] %v8252_v29 }
 0x551   : > { %v8254_v22 = vpop.permute.xlu1 %3536  ;;  %v8256_v37 = vpop.permute.xlu0 %3526 }
 0x552   : > { %9355 = vst [vmem:[#allocation70_spill] sm:$0xff] %v8254_v22  ;;  %9356 = vst [vmem:[#allocation71_spill] sm:$0xff] %v8256_v37 }
 0x555   : > { %v8258_v2 = vpop.permute.xlu1 %3546  ;;  %v8260_v50 = vpop.permute.xlu0 %3541 }
 0x556   : > { %9357 = vst [vmem:[#allocation72_spill] sm:$0xff] %v8258_v2 }
 0x559   : > { %v8262_v36 = vpop.permute.xlu1 %3556  ;;  %v8264_v31 = vpop.permute.xlu0 %3551 }
 0x55a   : > { %9358 = vst [vmem:[#allocation73_spill] sm:$0xff] %v8262_v36 }
 0x55d   : > { %v8266_v44 = vpop.permute.xlu1 %3566  ;;  %v8268_v25 = vpop.permute.xlu0 %3561 }
 0x55e   : > { %9359 = vst [vmem:[#allocation74_spill] sm:$0xff] %v8266_v44 }
 0x561   : > { %v8270_v3 = vpop.permute.xlu1 %3576  ;;  %v8272_v39 = vpop.permute.xlu0 %3571 }
 0x562   : > { %9360 = vst [vmem:[#allocation75_spill] sm:$0xff] %v8270_v3  ;;  %9361 = vst [vmem:[#allocation76_spill] sm:$0xff] %v8272_v39 }
 0x565   : > { %v8274_v6 = vpop.permute.xlu1 %3586  ;;  %v8276_v47 = vpop.permute.xlu0 %3581 }
 0x566   : > { %9362 = vst [vmem:[#allocation77_spill] sm:$0xff] %v8274_v6 }
 0x569   : > { %v8278_v57 = vpop.permute.xlu1 %3596  ;;  %v8280_v10 = vpop.permute.xlu0 %3591 }
 0x56a   : > { %9363 = vst [vmem:[#allocation78_spill] sm:$0xff] %v8278_v57 }
 0x56e   : > { %v3637_v5 = vpop.permute.xlu1 %3636  ;;  %v3633_v46 = vpop.permute.xlu0 %3632 }
 0x56f   : > { %v3696_v9 = vmul.f32 %v3637_v5, %v8284_v49  ;;  %v3695_v53 = vmul.f32 %v3633_v46, %v8282_v12 }
 0x571   : > { %3729 = vrot.lane.b32.xlu0 %v3696_v9, %s5696_s29  ;;  %3727 = vrot.lane.b32.xlu1 %v3695_v53, %s5696_s29 }
 0x572   : > { %v3641_v43 = vpop.permute.xlu1 %3640  ;;  %v3645_v52 = vpop.permute.xlu0 %3644 }
 0x573   : > { %v3697_v19 = vmul.f32 %v3641_v43, %v8290_v55  ;;  %v3698_v40 = vmul.f32 %v3645_v52, %v8292_v0  ;;  %v8330_v43 = vld [vmem:[#allocation3 + $0x10] sm:$0xff]  ;;  %v8332_v52 = vld [vmem:[#allocation3 + $0xa8] sm:$0xff] }
 0x575   : > { %3731 = vrot.lane.b32.xlu1 %v3697_v19, %s5696_s29  ;;  %3733 = vrot.lane.b32.xlu0 %v3698_v40, %s5696_s29 }
 0x576   : > { %v3649_v17 = vpop.permute.xlu1 %3648  ;;  %v3653_v28 = vpop.permute.xlu0 %3652 }
 0x577   : > { %v3699_v41 = vmul.f32 %v3649_v17, %v8300_v24  ;;  %v3700_v45 = vmul.f32 %v3653_v28, %v8298_v38 }
 0x579   : > { %3735 = vrot.lane.b32.xlu1 %v3699_v41, %s5696_s29  ;;  %3737 = vrot.lane.b32.xlu0 %v3700_v45, %s5696_s29  ;;  %v8338_v41 = vld [vmem:[#allocation3 + $0x20] sm:$0xff] }
 0x57a   : > { %v3657_v11 = vpop.permute.xlu1 %3656  ;;  %v3661_v16 = vpop.permute.xlu0 %3660  ;;  %v8340_v45 = vld [vmem:[#allocation3 + $0xa0] sm:$0xff] }
 0x57b   : > { %v3701_v7 = vmul.f32 %v3657_v11, %v8308_v20  ;;  %v3702_v8 = vmul.f32 %v3661_v16, %v8306_v42 }
 0x57d   : > { %3739 = vrot.lane.b32.xlu1 %v3701_v7, %s5696_s29  ;;  %3741 = vrot.lane.b32.xlu0 %v3702_v8, %s5696_s29 }
 0x57e   : > { %v3665_v4 = vpop.permute.xlu1 %3664  ;;  %v3669_v34 = vpop.permute.xlu0 %3668 }
 0x57f   : > { %v3703_v58 = vmul.f32 %v3665_v4, %v8316_v48  ;;  %v3704_v63 = vmul.f32 %v3669_v34, %v8314_v15 }
 0x581   : > { %3743 = vrot.lane.b32.xlu1 %v3703_v58, %s5696_s29  ;;  %3745 = vrot.lane.b32.xlu0 %v3704_v63, %s5696_s29 }
 0x582   : > { %v3673_v5 = vpop.permute.xlu1 %3672  ;;  %v3677_v46 = vpop.permute.xlu0 %3676 }
 0x583   : > { %v3705_v9 = vmul.f32 %v3673_v5, %v8324_v30  ;;  %v3706_v53 = vmul.f32 %v3677_v46, %v8322_v60 }
 0x585   : > { %3747 = vrot.lane.b32.xlu1 %v3705_v9, %s5696_s29  ;;  %3749 = vrot.lane.b32.xlu0 %v3706_v53, %s5696_s29 }
 0x586   : > { %v3681_v19 = vpop.permute.xlu1 %3680  ;;  %v3685_v40 = vpop.permute.xlu0 %3684 }
 0x587   : > { %v3707_v17 = vmul.f32 %v3681_v19, %v8332_v52  ;;  %v3708_v28 = vmul.f32 %v3685_v40, %v8330_v43 }
 0x589   : > { %3751 = vrot.lane.b32.xlu1 %v3707_v17, %s5696_s29  ;;  %3753 = vrot.lane.b32.xlu0 %v3708_v28, %s5696_s29 }
 0x58a   : > { %v3689_v11 = vpop.permute.xlu1 %3688  ;;  %v3693_v16 = vpop.permute.xlu0 %3692 }
 0x58b   : > { %v3709_v7 = vmul.f32 %v3689_v11, %v8340_v45  ;;  %v3710_v8 = vmul.f32 %v3693_v16, %v8338_v41 }
 0x58d   : > { %3755 = vrot.lane.b32.xlu1 %v3709_v7, %s5696_s29  ;;  %3757 = vrot.lane.b32.xlu0 %v3710_v8, %s5696_s29 }
 0x58f   : > { %v3793_v4 = vpop.permute.xlu1 %3792  ;;  %v3797_v34 = vpop.permute.xlu0 %3796 }
 0x590   : > { %v3855_v58 = vmul.f32 %v3793_v4, %v8282_v12  ;;  %v3856_v63 = vmul.f32 %v3797_v34, %v8284_v49 }
 0x592   : > { %3887 = vrot.lane.b32.xlu0 %v3855_v58, %s5697_s30  ;;  %3889 = vrot.lane.b32.xlu1 %v3856_v63, %s5697_s30 }
 0x593   : > { %v3801_v5 = vpop.permute.xlu1 %3800  ;;  %v3809_v46 = vpop.permute.xlu0 %3808 }
 0x594   : > { %v3857_v9 = vmul.f32 %v3801_v5, %v8290_v55  ;;  %v3859_v40 = vmul.f32 %v3809_v46, %v8300_v24 }
 0x596   : > { %3891 = vrot.lane.b32.xlu0 %v3857_v9, %s5697_s30 }
 0x597   : > { %v3805_v53 = vpop.permute.xlu1 %3804  ;;  %v3817_v19 = vpop.permute.xlu0 %3816 }
 0x598   : > { %v3858_v17 = vmul.f32 %v3805_v53, %v8292_v0  ;;  %v3861_v16 = vmul.f32 %v3817_v19, %v8308_v20 }
 0x59a   : > { %3893 = vrot.lane.b32.xlu1 %v3858_v17, %s5697_s30  ;;  %3895 = vrot.lane.b32.xlu0 %v3859_v40, %s5697_s30 }
 0x59b   : > { %v3813_v28 = vpop.permute.xlu1 %3812  ;;  %v3825_v11 = vpop.permute.xlu0 %3824 }
 0x59c   : > { %v3860_v7 = vmul.f32 %v3813_v28, %v8298_v38  ;;  %v3863_v34 = vmul.f32 %v3825_v11, %v8316_v48 }
 0x59e   : > { %3897 = vrot.lane.b32.xlu1 %v3860_v7, %s5697_s30  ;;  %3899 = vrot.lane.b32.xlu0 %v3861_v16, %s5697_s30 }
 0x59f   : > { %v3821_v8 = vpop.permute.xlu1 %3820  ;;  %v3833_v4 = vpop.permute.xlu0 %3832 }
 0x5a0   : > { %v3862_v58 = vmul.f32 %v3821_v8, %v8306_v42  ;;  %v3865_v46 = vmul.f32 %v3833_v4, %v8324_v30  ;;  %v5698_v4 = vmov 4  }
 0x5a2   : > { %3901 = vrot.lane.b32.xlu1 %v3862_v58, %s5697_s30  ;;  %3903 = vrot.lane.b32.xlu0 %v3863_v34, %s5697_s30 }
 0x5a3   : > { %v3829_v63 = vpop.permute.xlu1 %3828  ;;  %v3841_v5 = vpop.permute.xlu0 %3840 }
 0x5a4   : > { %v3864_v9 = vmul.f32 %v3829_v63, %v8314_v15  ;;  %v3867_v19 = vmul.f32 %v3841_v5, %v8332_v52 }
 0x5a6   : > { %3905 = vrot.lane.b32.xlu1 %v3864_v9, %s5697_s30  ;;  %3907 = vrot.lane.b32.xlu0 %v3865_v46, %s5697_s30 }
 0x5a7   : > { %v3837_v53 = vpop.permute.xlu1 %3836  ;;  %v3849_v17 = vpop.permute.xlu0 %3848 }
 0x5a8   : > { %v3866_v40 = vmul.f32 %v3837_v53, %v8322_v60  ;;  %v3869_v11 = vmul.f32 %v3849_v17, %v8340_v45 }
 0x5aa   : > { %3909 = vrot.lane.b32.xlu1 %v3866_v40, %s5697_s30  ;;  %3911 = vrot.lane.b32.xlu0 %v3867_v19, %s5697_s30 }
 0x5ab   : > { %v3845_v28 = vpop.permute.xlu1 %3844 }
 0x5ac   : > { %v3868_v16 = vmul.f32 %v3845_v28, %v8330_v43 }
 0x5ae   : > { %3913 = vrot.lane.b32.xlu1 %v3868_v16, %s5697_s30  ;;  %3915 = vrot.lane.b32.xlu0 %v3869_v11, %s5697_s30 }
 0x5af   : > { %v3853_v7 = vpop.permute.xlu1 %3852 }
 0x5b0   : > { %v3870_v8 = vmul.f32 %v3853_v7, %v8338_v41 }
 0x5b2   : > { %3917 = vrot.lane.b32.xlu1 %v3870_v8, %s5697_s30  ;;  %3952 = vperm.xlu0 %5644, %v8130_v27  }
 0x5b6   : > { %3956 = vperm.xlu1 %5645, %v8142_v23   ;;  %3964 = vperm.xlu0 %5644, %v8137_v26  }
 0x5ba   : > { %3960 = vperm.xlu1 %5645, %v8125_v13   ;;  %3972 = vperm.xlu0 %5644, %v8149_v61  }
 0x5be   : > { %3968 = vperm.xlu1 %5645, %v8154_v32   ;;  %3980 = vperm.xlu0 %5644, %v8161_v62  }
 0x5c2   : > { %3976 = vperm.xlu1 %5645, %v8166_v56   ;;  %3988 = vperm.xlu0 %5644, %v8173_v21  }
 0x5c6   : > { %3984 = vperm.xlu1 %5645, %v8178_v51   ;;  %3996 = vperm.xlu0 %5644, %v8185_v59  }
 0x5ca   : > { %3992 = vperm.xlu1 %5645, %v8190_v1   ;;  %4004 = vperm.xlu0 %5644, %v8197_v18  }
 0x5ce   : > { %4000 = vperm.xlu1 %5645, %v8202_v54   ;;  %4012 = vperm.xlu0 %5644, %v8209_v33  }
 0x5d2   : > { %4008 = vperm.xlu1 %5645, %v8214_v35   ;;  %5647 = vset.pattern.permute.xlu0 %v5698_v4 }
 0x5d6   : > { %5646 = vset.pattern.permute.xlu1 %v5698_v4 }
 0x5e3   : > { %v8394_v34 = vpop.permute.xlu1 %3727  ;;  %v8396_v58 = vpop.permute.xlu0 %3729 }
 0x5e4   : > { %9365 = vst [vmem:[#allocation80_spill] sm:$0xff] %v8394_v34  ;;  %9366 = vst [vmem:[#allocation81_spill] sm:$0xff] %v8396_v58  ;;  %v8594_v34 = vld [vmem:[#allocation3 + $0x68] sm:$0xff] }
 0x5e7   : > { %v8398_v63 = vpop.permute.xlu1 %3731  ;;  %v8400_v5 = vpop.permute.xlu0 %3733 }
 0x5e8   : > { %9367 = vst [vmem:[#allocation82_spill] sm:$0xff] %v8398_v63  ;;  %9368 = vst [vmem:[#allocation83_spill] sm:$0xff] %v8400_v5 }
 0x5eb   : > { %v8402_v46 = vpop.permute.xlu1 %3735  ;;  %v8404_v9 = vpop.permute.xlu0 %3737 }
 0x5ec   : > { %9369 = vst [vmem:[#allocation84_spill] sm:$0xff] %v8404_v9 }
 0x5ef   : > { %v8406_v53 = vpop.permute.xlu1 %3739  ;;  %v8408_v19 = vpop.permute.xlu0 %3741 }
 0x5f0   : > { %9370 = vst [vmem:[#allocation85_spill] sm:$0xff] %v8408_v19 }
 0x5f3   : > { %v8410_v40 = vpop.permute.xlu1 %3743  ;;  %v8412_v17 = vpop.permute.xlu0 %3745 }
 0x5f4   : > { %9371 = vst [vmem:[#allocation86_spill] sm:$0xff] %v8410_v40  ;;  %9372 = vst [vmem:[#allocation87_spill] sm:$0xff] %v8412_v17 }
 0x5f7   : > { %v8414_v28 = vpop.permute.xlu1 %3747  ;;  %v8416_v11 = vpop.permute.xlu0 %3749 }
 0x5f8   : > { %9373 = vst [vmem:[#allocation88_spill] sm:$0xff] %v8414_v28  ;;  %9374 = vst [vmem:[#allocation89_spill] sm:$0xff] %v8416_v11 }
 0x5fb   : > { %v8418_v16 = vpop.permute.xlu0 %3753  ;;  %v8420_v7 = vpop.permute.xlu1 %3751 }
 0x5fc   : > { %9375 = vst [vmem:[#allocation90_spill] sm:$0xff] %v8418_v16 }
 0x5ff   : > { %v8422_v8 = vpop.permute.xlu0 %3757  ;;  %v8424_v4 = vpop.permute.xlu1 %3755 }
 0x600   : > { %9376 = vst [vmem:[#allocation91_spill] sm:$0xff] %v8422_v8 }
 0x604   : > { %v8426_v57 = vpop.permute.xlu0 %3887  ;;  %v8428_v6 = vpop.permute.xlu1 %3889 }
 0x605   : > { %9377 = vst [vmem:[#allocation92_spill] sm:$0xff] %v8426_v57  ;;  %9378 = vst [vmem:[#allocation93_spill] sm:$0xff] %v8428_v6  ;;  %v8590_v57 = vld [vmem:[#allocation3 + $0x18] sm:$0xff] }
 0x608   : > { %v8430_v3 = vpop.permute.xlu0 %3891 }
 0x609   : > { %9379 = vst [vmem:[#allocation94_spill] sm:$0xff] %v8430_v3 }
 0x60c   : > { %v8432_v44 = vpop.permute.xlu1 %3893  ;;  %v8434_v17 = vpop.permute.xlu0 %3895 }
 0x60d   : > { %9380 = vst [vmem:[#allocation95_spill] sm:$0xff] %v8432_v44 }
 0x610   : > { %v8436_v19 = vpop.permute.xlu1 %3897  ;;  %v8438_v11 = vpop.permute.xlu0 %3899 }
 0x611   : > { %9381 = vst [vmem:[#allocation96_spill] sm:$0xff] %v8436_v19 }
 0x614   : > { %v8440_v16 = vpop.permute.xlu1 %3901  ;;  %v8442_v36 = vpop.permute.xlu0 %3903 }
 0x615   : > { %9382 = vst [vmem:[#allocation97_spill] sm:$0xff] %v8440_v16  ;;  %9383 = vst [vmem:[#allocation98_spill] sm:$0xff] %v8442_v36 }
 0x618   : > { %v8444_v8 = vpop.permute.xlu1 %3905  ;;  %v8446_v9 = vpop.permute.xlu0 %3907 }
 0x619   : > { %9384 = vst [vmem:[#allocation99_spill] sm:$0xff] %v8444_v8  ;;  %9385 = vst [vmem:[#allocation100_spill] sm:$0xff] %v8446_v9 }
 0x61c   : > { %v8448_v2 = vpop.permute.xlu1 %3909  ;;  %v8450_v5 = vpop.permute.xlu0 %3911 }
 0x61d   : > { %9386 = vst [vmem:[#allocation101_spill] sm:$0xff] %v8448_v2 }
 0x620   : > { %v8452_v6 = vpop.permute.xlu1 %3913  ;;  %v8454_v44 = vpop.permute.xlu0 %3915 }
 0x621   : > { %9387 = vst [vmem:[#allocation102_spill] sm:$0xff] %v8452_v6 }
 0x624   : > { %v8456_v22 = vpop.permute.xlu1 %3917 }
 0x625   : > { %9388 = vst [vmem:[#allocation103_spill] sm:$0xff] %v8456_v22 }
 0x62d   : > { %v3953_v19 = vpop.permute.xlu0 %3952 }
 0x62e   : > { %v4015_v58 = vmul.f32 %v3953_v19, %v8282_v12 }
 0x630   : > { %4047 = vrot.lane.b32.xlu1 %v4015_v58, %s5699_s7 }
 0x631   : > { %v3957_v16 = vpop.permute.xlu1 %3956  ;;  %v3965_v8 = vpop.permute.xlu0 %3964 }
 0x632   : > { %v4016_v37 = vmul.f32 %v3957_v16, %v8284_v49  ;;  %v4018_v6 = vmul.f32 %v3965_v8, %v8292_v0 }
 0x634   : > { %4049 = vrot.lane.b32.xlu0 %v4016_v37, %s5699_s7 }
 0x635   : > { %v3961_v2 = vpop.permute.xlu1 %3960  ;;  %v3973_v3 = vpop.permute.xlu0 %3972 }
 0x636   : > { %v4017_v63 = vmul.f32 %v3961_v2, %v8290_v55  ;;  %v4020_v58 = vmul.f32 %v3973_v3, %v8298_v38 }
 0x638   : > { %4051 = vrot.lane.b32.xlu1 %v4017_v63, %s5699_s7  ;;  %4053 = vrot.lane.b32.xlu0 %v4018_v6, %s5699_s7 }
 0x639   : > { %v3969_v12 = vpop.permute.xlu1 %3968  ;;  %v3981_v19 = vpop.permute.xlu0 %3980 }
 0x63a   : > { %v4019_v22 = vmul.f32 %v3969_v12, %v8300_v24  ;;  %v4022_v0 = vmul.f32 %v3981_v19, %v8306_v42 }
 0x63c   : > { %4055 = vrot.lane.b32.xlu1 %v4019_v22, %s5699_s7  ;;  %4057 = vrot.lane.b32.xlu0 %v4020_v58, %s5699_s7 }
 0x63d   : > { %v3977_v37 = vpop.permute.xlu1 %3976  ;;  %v3989_v49 = vpop.permute.xlu0 %3988 }
 0x63e   : > { %v4021_v2 = vmul.f32 %v3977_v37, %v8308_v20  ;;  %v4024_v3 = vmul.f32 %v3989_v49, %v8314_v15 }
 0x640   : > { %4059 = vrot.lane.b32.xlu1 %v4021_v2, %s5699_s7  ;;  %4061 = vrot.lane.b32.xlu0 %v4022_v0, %s5699_s7 }
 0x641   : > { %v3985_v6 = vpop.permute.xlu1 %3984  ;;  %v3997_v55 = vpop.permute.xlu0 %3996 }
 0x642   : > { %v4023_v38 = vmul.f32 %v3985_v6, %v8316_v48  ;;  %v4026_v42 = vmul.f32 %v3997_v55, %v8322_v60 }
 0x644   : > { %4063 = vrot.lane.b32.xlu1 %v4023_v38, %s5699_s7  ;;  %4065 = vrot.lane.b32.xlu0 %v4024_v3, %s5699_s7 }
 0x645   : > { %v3993_v22 = vpop.permute.xlu1 %3992  ;;  %v4005_v63 = vpop.permute.xlu0 %4004 }
 0x646   : > { %v4025_v16 = vmul.f32 %v3993_v22, %v8324_v30  ;;  %v4028_v12 = vmul.f32 %v4005_v63, %v8330_v43  ;;  %v5700_v43 = vmov 5  }
 0x648   : > { %4067 = vrot.lane.b32.xlu1 %v4025_v16, %s5699_s7  ;;  %4069 = vrot.lane.b32.xlu0 %v4026_v42, %s5699_s7 }
 0x649   : > { %v4001_v8 = vpop.permute.xlu1 %4000  ;;  %v4013_v19 = vpop.permute.xlu0 %4012 }
 0x64a   : > { %v4027_v15 = vmul.f32 %v4001_v8, %v8332_v52  ;;  %v4030_v37 = vmul.f32 %v4013_v19, %v8338_v41  ;;  %v5701_v41 = vmov 6  }
 0x64c   : > { %4071 = vrot.lane.b32.xlu1 %v4027_v15, %s5699_s7  ;;  %4073 = vrot.lane.b32.xlu0 %v4028_v12, %s5699_s7 }
 0x64d   : > { %v4009_v58 = vpop.permute.xlu1 %4008 }
 0x64e   : > { %v4029_v60 = vmul.f32 %v4009_v58, %v8340_v45 }
 0x650   : > { %4075 = vrot.lane.b32.xlu1 %v4029_v60, %s5699_s7  ;;  %4077 = vrot.lane.b32.xlu0 %v4030_v37, %s5699_s7 }
 0x654   : > { %4112 = vperm.xlu1 %5646, %v8130_v27   ;;  %4116 = vperm.xlu0 %5647, %v8142_v23  }
 0x658   : > { %4120 = vperm.xlu1 %5646, %v8125_v13   ;;  %4128 = vperm.xlu0 %5647, %v8154_v32  }
 0x65c   : > { %4124 = vperm.xlu1 %5646, %v8137_v26   ;;  %4136 = vperm.xlu0 %5647, %v8166_v56  }
 0x660   : > { %4132 = vperm.xlu1 %5646, %v8149_v61   ;;  %4144 = vperm.xlu0 %5647, %v8178_v51  }
 0x664   : > { %4140 = vperm.xlu1 %5646, %v8161_v62   ;;  %4152 = vperm.xlu0 %5647, %v8190_v1  }
 0x668   : > { %4148 = vperm.xlu1 %5646, %v8173_v21   ;;  %4160 = vperm.xlu0 %5647, %v8202_v54  }
 0x66c   : > { %4156 = vperm.xlu1 %5646, %v8185_v59   ;;  %4168 = vperm.xlu0 %5647, %v8214_v35  }
 0x670   : > { %4164 = vperm.xlu1 %5646, %v8197_v18   ;;  %5648 = vset.pattern.permute.xlu0 %v5700_v43 }
 0x671   : > { %4208 = vperm.xlu0 %5648, %v8130_v27  }
 0x674   : > { %4172 = vperm.xlu1 %5646, %v8209_v33  }
 0x675   : > { %4220 = vperm.xlu0 %5648, %v8137_v26  }
 0x678   : > { %5649 = vset.pattern.permute.xlu1 %v5700_v43 }
 0x679   : > { %4212 = vperm.xlu1 %5649, %v8142_v23   ;;  %4228 = vperm.xlu0 %5648, %v8149_v61  }
 0x67d   : > { %4216 = vperm.xlu1 %5649, %v8125_v13   ;;  %4236 = vperm.xlu0 %5648, %v8161_v62  }
 0x681   : > { %4224 = vperm.xlu1 %5649, %v8154_v32   ;;  %4244 = vperm.xlu0 %5648, %v8173_v21  }
 0x685   : > { %4232 = vperm.xlu1 %5649, %v8166_v56   ;;  %4252 = vperm.xlu0 %5648, %v8185_v59  }
 0x689   : > { %4240 = vperm.xlu1 %5649, %v8178_v51   ;;  %4260 = vperm.xlu0 %5648, %v8197_v18  }
 0x68d   : > { %4248 = vperm.xlu1 %5649, %v8190_v1   ;;  %4268 = vperm.xlu0 %5648, %v8209_v33  }
 0x691   : > { %4256 = vperm.xlu1 %5649, %v8202_v54   ;;  %5651 = vset.pattern.permute.xlu0 %v5701_v41 }
 0x695   : > { %4264 = vperm.xlu1 %5649, %v8214_v35  }
 0x699   : > { %5650 = vset.pattern.permute.xlu1 %v5701_v41 }
 0x6a2   : > { %v8522_v49 = vpop.permute.xlu1 %4047 }
 0x6a3   : > { %9389 = vst [vmem:[#allocation104_spill] sm:$0xff] %v8522_v49 }
 0x6a6   : > { %v8524_v0 = vpop.permute.xlu0 %4049 }
 0x6a7   : > { %9390 = vst [vmem:[#allocation105_spill] sm:$0xff] %v8524_v0 }
 0x6aa   : > { %v8526_v2 = vpop.permute.xlu1 %4051  ;;  %v8528_v6 = vpop.permute.xlu0 %4053 }
 0x6ab   : > { %9391 = vst [vmem:[#allocation106_spill] sm:$0xff] %v8526_v2  ;;  %9392 = vst [vmem:[#allocation107_spill] sm:$0xff] %v8528_v6 }
 0x6ae   : > { %v8530_v55 = vpop.permute.xlu1 %4055  ;;  %v8532_v3 = vpop.permute.xlu0 %4057 }
 0x6af   : > { %9393 = vst [vmem:[#allocation108_spill] sm:$0xff] %v8532_v3 }
 0x6b2   : > { %v8534_v38 = vpop.permute.xlu1 %4059  ;;  %v8536_v22 = vpop.permute.xlu0 %4061 }
 0x6b3   : > { %9394 = vst [vmem:[#allocation109_spill] sm:$0xff] %v8534_v38  ;;  %9395 = vst [vmem:[#allocation110_spill] sm:$0xff] %v8536_v22 }
 0x6b6   : > { %v8538_v63 = vpop.permute.xlu1 %4063  ;;  %v8540_v42 = vpop.permute.xlu0 %4065 }
 0x6b7   : > { %9396 = vst [vmem:[#allocation111_spill] sm:$0xff] %v8538_v63  ;;  %9397 = vst [vmem:[#allocation112_spill] sm:$0xff] %v8540_v42 }
 0x6ba   : > { %v8542_v16 = vpop.permute.xlu1 %4067  ;;  %v8544_v8 = vpop.permute.xlu0 %4069 }
 0x6bb   : > { %9398 = vst [vmem:[#allocation113_spill] sm:$0xff] %v8542_v16  ;;  %9399 = vst [vmem:[#allocation114_spill] sm:$0xff] %v8544_v8 }
 0x6be   : > { %v8546_v12 = vpop.permute.xlu1 %4071  ;;  %v8548_v15 = vpop.permute.xlu0 %4073 }
 0x6bf   : > { %9400 = vst [vmem:[#allocation115_spill] sm:$0xff] %v8548_v15 }
 0x6c2   : > { %v8550_v19 = vpop.permute.xlu1 %4075  ;;  %v8552_v58 = vpop.permute.xlu0 %4077 }
 0x6c3   : > { %9401 = vst [vmem:[#allocation116_spill] sm:$0xff] %v8552_v58 }
 0x6cf   : > { %v8554_v37 = vpop.permute.xlu1 %4112  ;;  %v8556_v60 = vpop.permute.xlu0 %4116 }
 0x6d0   : > { %9402 = vst [vmem:[#allocation117_spill] sm:$0xff] %v8554_v37  ;;  %9403 = vst [vmem:[#allocation118_spill] sm:$0xff] %v8556_v60 }
 0x6d3   : > { %v8558_v43 = vpop.permute.xlu1 %4120  ;;  %v8560_v41 = vpop.permute.xlu0 %4128 }
 0x6d4   : > { %9404 = vst [vmem:[#allocation119_spill] sm:$0xff] %v8558_v43 }
 0x6d7   : > { %v8562_v42 = vpop.permute.xlu1 %4124  ;;  %v8564_v22 = vpop.permute.xlu0 %4136 }
 0x6d8   : > { %9405 = vst [vmem:[#allocation120_spill] sm:$0xff] %v8562_v42  ;;  %9406 = vst [vmem:[#allocation121_spill] sm:$0xff] %v8564_v22  ;;  %v8584_v42 = vld [vmem:[#allocation3] sm:$0xff] }
 0x6db   : > { %v8566_v8 = vpop.permute.xlu1 %4132  ;;  %v8568_v3 = vpop.permute.xlu0 %4144 }
 0x6dc   : > { %9407 = vst [vmem:[#allocation122_spill] sm:$0xff] %v8566_v8  ;;  %9408 = vst [vmem:[#allocation123_spill] sm:$0xff] %v8568_v3 }
 0x6df   : > { %v8570_v15 = vpop.permute.xlu1 %4140  ;;  %v8572_v6 = vpop.permute.xlu0 %4152 }
 0x6e0   : > { %9409 = vst [vmem:[#allocation124_spill] sm:$0xff] %v8570_v15  ;;  %9410 = vst [vmem:[#allocation125_spill] sm:$0xff] %v8572_v6  ;;  %v8604_v6 = vld [vmem:[#allocation3 + $0xb8] sm:$0xff] }
 0x6e3   : > { %v8574_v58 = vpop.permute.xlu1 %4148  ;;  %v8576_v0 = vpop.permute.xlu0 %4160 }
 0x6e4   : > { %9411 = vst [vmem:[#allocation126_spill] sm:$0xff] %v8574_v58 }
 0x6e7   : > { %v8578_v60 = vpop.permute.xlu1 %4156  ;;  %v8580_v2 = vpop.permute.xlu0 %4168 }
 0x6e8   : > { %9412 = vst [vmem:[#allocation127_spill] sm:$0xff] %v8578_v60 }
 0x6eb   : > { %v8582_v43 = vpop.permute.xlu1 %4164 }
 0x6ec   : > { %9413 = vst [vmem:[#allocation128_spill] sm:$0xff] %v8582_v43  ;;  %v4209_v49 = vpop.permute.xlu0 %4208  ;;  %v8596_v43 = vld [vmem:[#allocation3 + $0x48] sm:$0xff] }
 0x6ed   : > { %v4271_v8 = vmul.f32 %v4209_v49, %v8584_v42 }
 0x6ef   : > { %v8587_v37 = vpop.permute.xlu1 %4172  ;;  %4303 = vrot.lane.b32.xlu1 %v4271_v8, %s5696_s29  ;;  %v8602_v8 = vld [vmem:[#allocation3 + $0x88] sm:$0xff] }
 0x6f0   : > { %9414 = vst [vmem:[#allocation129_spill] sm:$0xff] %v8587_v37  ;;  %v4221_v15 = vpop.permute.xlu0 %4220 }
 0x6f1   : > { %v4274_v49 = vmul.f32 %v4221_v15, %v8596_v43  ;;  %v8610_v15 = vld [vmem:[#allocation3 + $0xf0] sm:$0xff] }
 0x6f4   : > { %v4213_v58 = vpop.permute.xlu1 %4212  ;;  %v4229_v14 = vpop.permute.xlu0 %4228 }
 0x6f5   : > { %v4272_v60 = vmul.f32 %v4213_v58, %v8590_v57  ;;  %v4276_v9 = vmul.f32 %v4229_v14, %v8604_v6  ;;  %v8618_v14 = vld [vmem:[#allocation3 + $0x58] sm:$0xff] }
 0x6f7   : > { %4305 = vrot.lane.b32.xlu0 %v4272_v60, %s5696_s29 }
 0x6f8   : > { %v4217_v29 = vpop.permute.xlu1 %4216  ;;  %v4237_v16 = vpop.permute.xlu0 %4236 }
 0x6f9   : > { %v4273_v37 = vmul.f32 %v4217_v29, %v8594_v34  ;;  %v8612_v29 = vld [vmem:[#allocation3 + $0x78] sm:$0xff] }
 0x6fb   : > { %4307 = vrot.lane.b32.xlu1 %v4273_v37, %s5696_s29  ;;  %4309 = vrot.lane.b32.xlu0 %v4274_v49, %s5696_s29  ;;  %v4278_v49 = vmul.f32 %v4237_v16, %v8612_v29  ;;  %v8626_v16 = vld [vmem:[#allocation3 + $0x90] sm:$0xff] }
 0x6fc   : > { %v4225_v58 = vpop.permute.xlu1 %4224  ;;  %v4245_v60 = vpop.permute.xlu0 %4244 }
 0x6fd   : > { %v4275_v63 = vmul.f32 %v4225_v58, %v8602_v8  ;;  %v8620_v58 = vld [vmem:[#allocation3 + $0xc8] sm:$0xff] }
 0x6ff   : > { %4311 = vrot.lane.b32.xlu1 %v4275_v63, %s5696_s29  ;;  %4313 = vrot.lane.b32.xlu0 %v4276_v9, %s5696_s29  ;;  %v4280_v9 = vmul.f32 %v4245_v60, %v8620_v58  ;;  %v8634_v60 = vld [vmem:[#allocation3 + $0xd0] sm:$0xff] }
 0x700   : > { %v4233_v37 = vpop.permute.xlu1 %4232  ;;  %v4253_v3 = vpop.permute.xlu0 %4252 }
 0x701   : > { %v4277_v28 = vmul.f32 %v4233_v37, %v8610_v15  ;;  %v8628_v37 = vld [vmem:[#allocation3 + $0xc0] sm:$0xff] }
 0x703   : > { %4315 = vrot.lane.b32.xlu1 %v4277_v28, %s5696_s29  ;;  %4317 = vrot.lane.b32.xlu0 %v4278_v49, %s5696_s29  ;;  %v4282_v49 = vmul.f32 %v4253_v3, %v8628_v37  ;;  %v8642_v3 = vld [vmem:[#allocation3 + $0xf8] sm:$0xff] }
 0x704   : > { %v4241_v63 = vpop.permute.xlu1 %4240  ;;  %v4261_v28 = vpop.permute.xlu0 %4260 }
 0x705   : > { %v4279_v36 = vmul.f32 %v4241_v63, %v8618_v14  ;;  %v8636_v63 = vld [vmem:[#allocation3 + $0x28] sm:$0xff] }
 0x707   : > { %4319 = vrot.lane.b32.xlu1 %v4279_v36, %s5696_s29  ;;  %4321 = vrot.lane.b32.xlu0 %v4280_v9, %s5696_s29  ;;  %v4284_v9 = vmul.f32 %v4261_v28, %v8636_v63  ;;  %v3613_v28 = vmul.f32 %v8280_v10, %v8340_v45 }
 0x708   : > { %v4249_v39 = vpop.permute.xlu1 %4248  ;;  %v4269_v40 = vpop.permute.xlu0 %4268 }
 0x709   : > { %v4281_v30 = vmul.f32 %v4249_v39, %v8626_v16  ;;  %v8644_v39 = vld [vmem:[#allocation3 + $0x98] sm:$0xff] }
 0x70b   : > { %4323 = vrot.lane.b32.xlu1 %v4281_v30, %s5696_s29  ;;  %4325 = vrot.lane.b32.xlu0 %v4282_v49, %s5696_s29  ;;  %v4286_v49 = vmul.f32 %v4269_v40, %v8644_v39  ;;  %v5702_v40 = vmov 7  }
 0x70c   : > { %v4257_v36 = vpop.permute.xlu1 %4256 }
 0x70d   : > { %v4283_v38 = vmul.f32 %v4257_v36, %v8634_v60 }
 0x70f   : > { %4327 = vrot.lane.b32.xlu1 %v4283_v38, %s5696_s29  ;;  %4329 = vrot.lane.b32.xlu0 %v4284_v9, %s5696_s29  ;;  %v4187_v9 = vmul.f32 %v8576_v0, %v8634_v60 }
 0x710   : > { %v4265_v30 = vpop.permute.xlu1 %4264 }
 0x711   : > { %v4285_v22 = vmul.f32 %v4265_v30, %v8642_v3 }
 0x713   : > { %4331 = vrot.lane.b32.xlu1 %v4285_v22, %s5696_s29  ;;  %4333 = vrot.lane.b32.xlu0 %v4286_v49, %s5696_s29 }
 0x717   : > { %4368 = vperm.xlu1 %5650, %v8130_v27   ;;  %4372 = vperm.xlu0 %5651, %v8142_v23  }
 0x71b   : > { %4376 = vperm.xlu1 %5650, %v8125_v13   ;;  %4384 = vperm.xlu0 %5651, %v8154_v32  }
 0x71f   : > { %4380 = vperm.xlu1 %5650, %v8137_v26   ;;  %4392 = vperm.xlu0 %5651, %v8166_v56  }
 0x723   : > { %4388 = vperm.xlu1 %5650, %v8149_v61   ;;  %4400 = vperm.xlu0 %5651, %v8178_v51  }
 0x727   : > { %4396 = vperm.xlu1 %5650, %v8161_v62   ;;  %4408 = vperm.xlu0 %5651, %v8190_v1  }
 0x72b   : > { %4404 = vperm.xlu1 %5650, %v8173_v21   ;;  %4416 = vperm.xlu0 %5651, %v8202_v54  }
 0x72f   : > { %4412 = vperm.xlu1 %5650, %v8185_v59   ;;  %4424 = vperm.xlu0 %5651, %v8214_v35  }
 0x733   : > { %4420 = vperm.xlu1 %5650, %v8197_v18   ;;  %5653 = vset.pattern.permute.xlu0 %v5702_v40 }
 0x737   : > { %4428 = vperm.xlu1 %5650, %v8209_v33  }
 0x73b   : > { %5652 = vset.pattern.permute.xlu1 %v5702_v40  ;;  %v3789_v40 = vadd.f32 %v8424_v4, %v3613_v28 }
 0x73c   : > { %4528 = vperm.xlu1 %5652, %v8130_v27  }
 0x740   : > { %4536 = vperm.xlu1 %5652, %v8125_v13  }
 0x744   : > { %4540 = vperm.xlu1 %5652, %v8137_v26  }
 0x748   : > { %4548 = vperm.xlu1 %5652, %v8149_v61  }
 0x74c   : > { %4556 = vperm.xlu1 %5652, %v8161_v62  }
 0x750   : > { %4564 = vperm.xlu1 %5652, %v8173_v21  }
 0x754   : > { %4572 = vperm.xlu1 %5652, %v8185_v59   ;;  %v3611_v59 = vmul.f32 %v8276_v47, %v8332_v52  ;;  %v3949_v52 = vadd.f32 %v8454_v44, %v3789_v40 }
 0x756   : > { %v4109_v45 = vadd.f32 %v8550_v19, %v3949_v52 }
 0x758   : > { %4580 = vperm.xlu1 %5652, %v8197_v18  }
 0x75c   : > { %4588 = vperm.xlu1 %5652, %v8209_v33   ;;  %v3787_v33 = vadd.f32 %v8420_v7, %v3611_v59  ;;  %v4189_v7 = vmul.f32 %v8580_v2, %v8642_v3 }
 0x75e   : > { %v3947_v36 = vadd.f32 %v8450_v5, %v3787_v33  ;;  %v4205_v33 = vadd.f32 %v4189_v7, %v4109_v45 }
 0x760   : > { %v4107_v47 = vadd.f32 %v8546_v12, %v3947_v36 }
 0x761   : > { %v8675_v38 = vpop.permute.xlu1 %4303 }
 0x762   : > { %v4203_v59 = vadd.f32 %v4187_v9, %v4107_v47 }
 0x769   : > { %v8677_v22 = vpop.permute.xlu0 %4305 }
 0x76d   : > { %v8679_v27 = vpop.permute.xlu1 %4307  ;;  %v8681_v13 = vpop.permute.xlu0 %4309 }
 0x771   : > { %v8683_v26 = vpop.permute.xlu1 %4311  ;;  %v8685_v61 = vpop.permute.xlu0 %4313 }
 0x775   : > { %v8687_v62 = vpop.permute.xlu1 %4315  ;;  %v8689_v21 = vpop.permute.xlu0 %4317 }
 0x776   : > { %9415 = vst [vmem:[#allocation130_spill] sm:$0xff] %v8689_v21 }
 0x779   : > { %v8693_v18 = vpop.permute.xlu1 %4319  ;;  %v8701_v30 = vpop.permute.xlu0 %4321 }
 0x77a   : > { %9416 = vst [vmem:[#allocation131_spill] sm:$0xff] %v8701_v30 }
 0x77d   : > { %v8703_v49 = vpop.permute.xlu1 %4323  ;;  %v8711_v5 = vpop.permute.xlu0 %4325 }
 0x781   : > { %v4328_v10 = vpop.permute.xlu1 %4327  ;;  %v8717_v4 = vpop.permute.xlu0 %4329 }
 0x782   : > { %v8713_v0 = vadd.f32 %v4328_v10, %v4203_v59 }
 0x785   : > { %v4332_v30 = vpop.permute.xlu1 %4331  ;;  %v8719_v12 = vpop.permute.xlu0 %4333 }
 0x786   : > { %v8715_v21 = vadd.f32 %v4332_v30, %v4205_v33 }
 0x792   : > { %v4369_v44 = vpop.permute.xlu1 %4368  ;;  %v4373_v28 = vpop.permute.xlu0 %4372 }
 0x793   : > { %v4431_v2 = vmul.f32 %v4369_v44, %v8584_v42 }
 0x795   : > { %4463 = vrot.lane.b32.xlu0 %v4431_v2, %s5697_s30 }
 0x796   : > { %v4377_v36 = vpop.permute.xlu1 %4376  ;;  %v4385_v19 = vpop.permute.xlu0 %4384 }
 0x797   : > { %v4433_v9 = vmul.f32 %v4377_v36, %v8594_v34  ;;  %v4435_v30 = vmul.f32 %v4385_v19, %v8602_v8 }
 0x799   : > { %4467 = vrot.lane.b32.xlu1 %v4433_v9, %s5697_s30  ;;  %4532 = vperm.xlu0 %5653, %v8142_v23   ;;  %v4432_v9 = vmul.f32 %v4373_v28, %v8590_v57 }
 0x79a   : > { %v4381_v40 = vpop.permute.xlu1 %4380  ;;  %v4393_v47 = vpop.permute.xlu0 %4392 }
 0x79b   : > { %v4437_v52 = vmul.f32 %v4393_v47, %v8610_v15 }
 0x79d   : > { %4544 = vperm.xlu0 %5653, %v8154_v32   ;;  %4471 = vrot.lane.b32.xlu1 %v4435_v30, %s5697_s30  ;;  %v4434_v30 = vmul.f32 %v4381_v40, %v8596_v43 }
 0x79e   : > { %v4389_v7 = vpop.permute.xlu1 %4388  ;;  %v4401_v59 = vpop.permute.xlu0 %4400 }
 0x79f   : > { %v4439_v10 = vmul.f32 %v4401_v59, %v8618_v14 }
 0x7a1   : > { %4552 = vperm.xlu0 %5653, %v8166_v56   ;;  %4475 = vrot.lane.b32.xlu1 %v4437_v52, %s5697_s30 }
 0x7a2   : > { %v4397_v45 = vpop.permute.xlu1 %4396  ;;  %v4409_v23 = vpop.permute.xlu0 %4408 }
 0x7a3   : > { %v4441_v32 = vmul.f32 %v4409_v23, %v8626_v16 }
 0x7a5   : > { %4560 = vperm.xlu0 %5653, %v8178_v51   ;;  %4479 = vrot.lane.b32.xlu1 %v4439_v10, %s5697_s30 }
 0x7a6   : > { %v4405_v33 = vpop.permute.xlu1 %4404  ;;  %v4417_v44 = vpop.permute.xlu0 %4416 }
 0x7a7   : > { %v4443_v56 = vmul.f32 %v4417_v44, %v8634_v60  ;;  %v4440_v40 = vmul.f32 %v4405_v33, %v8620_v58 }
 0x7a9   : > { %4568 = vperm.xlu0 %5653, %v8190_v1   ;;  %4483 = vrot.lane.b32.xlu1 %v4441_v32, %s5697_s30 }
 0x7aa   : > { %v4413_v2 = vpop.permute.xlu1 %4412  ;;  %v4425_v36 = vpop.permute.xlu0 %4424 }
 0x7ab   : > { %v4445_v51 = vmul.f32 %v4425_v36, %v8642_v3  ;;  %v4442_v10 = vmul.f32 %v4413_v2, %v8628_v37  ;;  %v3603_v2 = vmul.f32 %v8260_v50, %v8300_v24  ;;  %v3607_v50 = vmul.f32 %v8268_v25, %v8316_v48  ;;  %v9423_v25 = vld [vmem:[#allocation123_spill] sm:$0xff] }
 0x7ac   : > { %v4183_v48 = vmul.f32 %v9423_v25, %v8618_v14 }
 0x7ad   : > { %4576 = vperm.xlu0 %5653, %v8202_v54   ;;  %4487 = vrot.lane.b32.xlu1 %v4443_v56, %s5697_s30  ;;  %v4436_v54 = vmul.f32 %v4389_v7, %v8604_v6 }
 0x7ae   : > { %v4421_v19 = vpop.permute.xlu1 %4420 }
 0x7af   : > { %v4444_v7 = vmul.f32 %v4421_v19, %v8636_v63  ;;  %v3779_v19 = vadd.f32 %v8402_v46, %v3603_v2  ;;  %v9417_v46 = vld [vmem:[#allocation121_spill] sm:$0xff] }
 0x7b1   : > { %4584 = vperm.xlu0 %5653, %v8214_v35   ;;  %4491 = vrot.lane.b32.xlu1 %v4445_v51, %s5697_s30  ;;  %v4438_v35 = vmul.f32 %v4397_v45, %v8612_v29 }
 0x7b2   : > { %v4429_v1 = vpop.permute.xlu1 %4428 }
 0x7b3   : > { %v4446_v23 = vmul.f32 %v4429_v1, %v8644_v39  ;;  %v3939_v1 = vadd.f32 %v8434_v17, %v3779_v19 }
 0x7b5   : > { %4465 = vrot.lane.b32.xlu0 %v4432_v9, %s5697_s30  ;;  %v3605_v9 = vmul.f32 %v8264_v31, %v8308_v20  ;;  %v9418_v20 = vld [vmem:[#allocation86_spill] sm:$0xff] }
 0x7b6   : > { %v3783_v17 = vadd.f32 %v9418_v20, %v3607_v50  ;;  %v9426_v50 = vld [vmem:[#allocation100_spill] sm:$0xff] }
 0x7b7   : > { %v4529_v47 = vpop.permute.xlu1 %4528 }
 0x7b8   : > { %v4591_v52 = vmul.f32 %v4529_v47, %v8584_v42  ;;  %v3781_v47 = vadd.f32 %v8406_v53, %v3605_v9  ;;  %v9420_v53 = vld [vmem:[#allocation79_spill] sm:$0xff]  ;;  %v9424_v9 = vld [vmem:[#allocation88_spill] sm:$0xff] }
 0x7b9   : > { %4469 = vrot.lane.b32.xlu0 %v4434_v30, %s5697_s30  ;;  %v4179_v30 = vmul.f32 %v8560_v41, %v8602_v8 }
 0x7ba   : > { %4623 = vrot.lane.b32.xlu1 %v4591_v52, %s5699_s7  ;;  %v4099_v52 = vadd.f32 %v8530_v55, %v3939_v1  ;;  %v3941_v24 = vadd.f32 %v8438_v11, %v3781_v47 }
 0x7bb   : > { %v4537_v59 = vpop.permute.xlu1 %4536 }
 0x7bc   : > { %v4593_v28 = vmul.f32 %v4537_v59, %v8594_v34  ;;  %v4181_v59 = vmul.f32 %v9417_v46, %v8610_v15  ;;  %v4195_v31 = vadd.f32 %v4179_v30, %v4099_v52  ;;  %v9425_v30 = vld [vmem:[#allocation111_spill] sm:$0xff]  ;;  %v9427_v46 = vld [vmem:[#allocation125_spill] sm:$0xff] }
 0x7bd   : > { %4473 = vrot.lane.b32.xlu0 %v4436_v54, %s5697_s30 }
 0x7be   : > { %4627 = vrot.lane.b32.xlu1 %v4593_v28, %s5699_s7  ;;  %v9419_v28 = vld [vmem:[#allocation109_spill] sm:$0xff]  ;;  %v4355_v41 = vadd.f32 %v8683_v26, %v4195_v31  ;;  %v4185_v31 = vmul.f32 %v9427_v46, %v8626_v16  ;;  %v5655_v46 = vld [vmem:[#allocation3 + $0x50] sm:$0xff] }
 0x7bf   : > { %v4541_v32 = vpop.permute.xlu1 %4540 }
 0x7c1   : > { %4477 = vrot.lane.b32.xlu0 %v4438_v35, %s5697_s30  ;;  %v4101_v35 = vadd.f32 %v9419_v28, %v3941_v24 }
 0x7c3   : > { %v4549_v45 = vpop.permute.xlu1 %4548  ;;  %v4197_v11 = vadd.f32 %v4181_v59, %v4101_v35  ;;  %v9428_v35 = vld [vmem:[#allocation113_spill] sm:$0xff] }
 0x7c5   : > { %4481 = vrot.lane.b32.xlu0 %v4440_v40, %s5697_s30  ;;  %v9421_v40 = vld [vmem:[#allocation76_spill] sm:$0xff]  ;;  %v4357_v26 = vadd.f32 %v8687_v62, %v4197_v11 }
 0x7c6   : > { %v3609_v55 = vmul.f32 %v9421_v40, %v9420_v53 }
 0x7c7   : > { %v4557_v44 = vpop.permute.xlu1 %4556 }
 0x7c8   : > { %v3785_v1 = vadd.f32 %v9424_v9, %v3609_v55  ;;  %v4596_v9 = vmul.f32 %v4549_v45, %v8604_v6 }
 0x7c9   : > { %4485 = vrot.lane.b32.xlu0 %v4442_v10, %s5697_s30 }
 0x7ca   : > { %v3945_v24 = vadd.f32 %v9426_v50, %v3785_v1 }
 0x7cb   : > { %v8764_v56 = vpop.permute.xlu1 %4564 }
 0x7cd   : > { %4489 = vrot.lane.b32.xlu0 %v4444_v7, %s5697_s30  ;;  %v9422_v7 = vld [vmem:[#allocation98_spill] sm:$0xff] }
 0x7cf   : > { %v8766_v33 = vpop.permute.xlu1 %4572 }
 0x7d1   : > { %4493 = vrot.lane.b32.xlu0 %v4446_v23, %s5697_s30  ;;  %v3943_v23 = vadd.f32 %v9422_v7, %v3783_v17  ;;  %v4594_v7 = vmul.f32 %v4541_v32, %v8596_v43 }
 0x7d3   : > { %v8768_v36 = vpop.permute.xlu1 %4580  ;;  %v4103_v47 = vadd.f32 %v9425_v30, %v3943_v23  ;;  %v5654_v30 = vld [vmem:[#allocation3 + $0xb0] sm:$0xff] }
 0x7d5   : > { %v4199_v20 = vadd.f32 %v4183_v48, %v4103_v47  ;;  %v9429_v47 = vld [vmem:[#allocation69_spill] sm:$0xff] }
 0x7d7   : > { %v8772_v51 = vpop.permute.xlu1 %4588  ;;  %v4359_v53 = vadd.f32 %v8693_v18, %v4199_v20  ;;  %v9432_v20 = vld [vmem:[#allocation92_spill] sm:$0xff] }
 0x807   : > { %v8797_v2 = vpop.permute.xlu0 %4463 }
 0x80b   : > { %v8782_v54 = vpop.permute.xlu1 %4467 }
 0x80f   : > { %v4472_v10 = vpop.permute.xlu1 %4471 }
 0x810   : > { %v8799_v19 = vadd.f32 %v4472_v10, %v4355_v41  ;;  %v4105_v41 = vadd.f32 %v9428_v35, %v3945_v24  ;;  %v4598_v24 = vmul.f32 %v4557_v44, %v8612_v29  ;;  %v9434_v44 = vld [vmem:[#allocation82_spill] sm:$0xff] }
 0x812   : > { %v4201_v62 = vadd.f32 %v4185_v31, %v4105_v41 }
 0x813   : > { %v4476_v52 = vpop.permute.xlu1 %4475 }
 0x814   : > { %v8807_v17 = vadd.f32 %v4476_v52, %v4357_v26  ;;  %v4533_v59 = vpop.permute.xlu0 %4532  ;;  %v4361_v25 = vadd.f32 %v8703_v49, %v4201_v62  ;;  %v3599_v26 = vmul.f32 %v5654_v30, %v9429_v47  ;;  %v9430_v52 = vld [vmem:[#allocation80_spill] sm:$0xff] }
 0x815   : > { %v4592_v28 = vmul.f32 %v4533_v59, %v8590_v57 }
 0x816   : > { %v3775_v50 = vadd.f32 %v9430_v52, %v3599_v26  ;;  %v4604_v52 = vmul.f32 %v8768_v36, %v8636_v63 }
 0x817   : > { %v4480_v40 = vpop.permute.xlu1 %4479  ;;  %4625 = vrot.lane.b32.xlu0 %v4592_v28, %s5699_s7  ;;  %v9433_v28 = vld [vmem:[#allocation117_spill] sm:$0xff] }
 0x818   : > { %v8813_v55 = vadd.f32 %v4480_v40, %v4359_v53  ;;  %v4545_v10 = vpop.permute.xlu0 %4544  ;;  %v3935_v59 = vadd.f32 %v9432_v20, %v3775_v50  ;;  %v4175_v35 = vmul.f32 %v9433_v28, %v8584_v42  ;;  %v9439_v20 = vld [vmem:[#allocation71_spill] sm:$0xff]  ;;  %v9440_v28 = vld [vmem:[#allocation81_spill] sm:$0xff] }
 0x819   : > { %v4595_v23 = vmul.f32 %v4545_v10, %v8602_v8  ;;  %v4600_v10 = vmul.f32 %v8764_v56, %v8620_v58  ;;  %v4602_v56 = vmul.f32 %v8766_v33, %v8628_v37 }
 0x81b   : > { %v4484_v48 = vpop.permute.xlu1 %4483  ;;  %4629 = vrot.lane.b32.xlu0 %v4594_v7, %s5699_s7  ;;  %4631 = vrot.lane.b32.xlu1 %v4595_v23, %s5699_s7  ;;  %v9436_v23 = vld [vmem:[#allocation94_spill] sm:$0xff] }
 0x81c   : > { %v8820_v11 = vadd.f32 %v4484_v48, %v4361_v25  ;;  %v4553_v18 = vpop.permute.xlu0 %4552  ;;  %v9437_v25 = vld [vmem:[#allocation119_spill] sm:$0xff] }
 0x81d   : > { %v4597_v1 = vmul.f32 %v4553_v18, %v8610_v15  ;;  %v9431_v15 = vld [vmem:[#allocation68_spill] sm:$0xff]  ;;  %v4177_v48 = vmul.f32 %v9437_v25, %v8594_v34  ;;  %v9445_v25 = vld [vmem:[#allocation105_spill] sm:$0xff] }
 0x81e   : > { %v3601_v31 = vmul.f32 %v5655_v46, %v9431_v15 }
 0x81f   : > { %v4488_v32 = vpop.permute.xlu1 %4487  ;;  %4633 = vrot.lane.b32.xlu0 %v4596_v9, %s5699_s7  ;;  %4635 = vrot.lane.b32.xlu1 %v4597_v1, %s5699_s7  ;;  %v9438_v9 = vld [vmem:[#allocation106_spill] sm:$0xff] }
 0x820   : > { %v8828_v8 = vadd.f32 %v4488_v32, %v8713_v0  ;;  %v4561_v49 = vpop.permute.xlu0 %4560  ;;  %v3777_v40 = vadd.f32 %v9434_v44, %v3601_v31  ;;  %v5656_v31 = vld [vmem:[#allocation3 + $0xd8] sm:$0xff]  ;;  %v9441_v44 = vld [vmem:[#allocation70_spill] sm:$0xff] }
 0x821   : > { %v4599_v45 = vmul.f32 %v4561_v49, %v8618_v14  ;;  %v9435_v14 = vld [vmem:[#allocation104_spill] sm:$0xff] }
 0x822   : > { %v4095_v62 = vadd.f32 %v9435_v14, %v3935_v59  ;;  %v3937_v42 = vadd.f32 %v9436_v23, %v3777_v40  ;;  %v3600_v59 = vmul.f32 %v5656_v31, %v9439_v20  ;;  %v9442_v14 = vld [vmem:[#allocation93_spill] sm:$0xff]  ;;  %v9444_v23 = vld [vmem:[#allocation83_spill] sm:$0xff] }
 0x823   : > { %v4492_v41 = vpop.permute.xlu1 %4491  ;;  %4637 = vrot.lane.b32.xlu0 %v4598_v24, %s5699_s7  ;;  %4639 = vrot.lane.b32.xlu1 %v4599_v45, %s5699_s7  ;;  %v4606_v24 = vmul.f32 %v8772_v51, %v8644_v39 }
 0x824   : > { %v8840_v0 = vadd.f32 %v4492_v41, %v8715_v21  ;;  %v4569_v53 = vpop.permute.xlu0 %4568  ;;  %v4191_v18 = vadd.f32 %v4175_v35, %v4095_v62  ;;  %v4097_v1 = vadd.f32 %v9438_v9, %v3937_v42  ;;  %v3776_v35 = vadd.f32 %v9440_v28, %v3600_v59  ;;  %v9455_v28 = vld [vmem:[#allocation108_spill] sm:$0xff] }
 0x825   : > { %v4601_v7 = vmul.f32 %v4569_v53, %v8626_v16  ;;  %v5657_v53 = vld [vmem:[#allocation3 + $0x30] sm:$0xff] }
 0x826   : > { %v4351_v30 = vadd.f32 %v8675_v38, %v4191_v18  ;;  %v4193_v47 = vadd.f32 %v4177_v48, %v4097_v1  ;;  %v3602_v40 = vmul.f32 %v5657_v53, %v9441_v44  ;;  %v3936_v62 = vadd.f32 %v9442_v14, %v3776_v35  ;;  %v5658_v18 = vld [vmem:[#allocation3 + $0xe8] sm:$0xff]  ;;  %v9447_v1 = vld [vmem:[#allocation95_spill] sm:$0xff] }
 0x827   : > { %4641 = vrot.lane.b32.xlu0 %v4600_v10, %s5699_s7  ;;  %4643 = vrot.lane.b32.xlu1 %v4601_v7, %s5699_s7  ;;  %v9443_v10 = vld [vmem:[#allocation118_spill] sm:$0xff] }
 0x828   : > { %v4577_v21 = vpop.permute.xlu0 %4576  ;;  %v4511_v26 = vadd.f32 %v8797_v2, %v4351_v30  ;;  %v4353_v49 = vadd.f32 %v8679_v27, %v4193_v47  ;;  %v4176_v7 = vmul.f32 %v9443_v10, %v8590_v57  ;;  %v3778_v42 = vadd.f32 %v9444_v23, %v3602_v40  ;;  %v5660_v40 = vld [vmem:[#allocation3 + $0x40] sm:$0xff] }
 0x829   : > { %v4603_v16 = vmul.f32 %v4577_v21, %v8634_v60  ;;  %v4096_v48 = vadd.f32 %v9445_v25, %v3936_v62  ;;  %v9446_v21 = vld [vmem:[#allocation72_spill] sm:$0xff]  ;;  %v9457_v62 = vld [vmem:[#allocation97_spill] sm:$0xff] }
 0x82a   : > { %v4513_v60 = vadd.f32 %v8782_v54, %v4353_v49  ;;  %v3604_v9 = vmul.f32 %v5658_v18, %v9446_v21  ;;  %v3938_v30 = vadd.f32 %v9447_v1, %v3778_v42  ;;  %v9450_v49 = vld [vmem:[#allocation107_spill] sm:$0xff] }
 0x82b   : > { %4645 = vrot.lane.b32.xlu0 %v4602_v56, %s5699_s7  ;;  %4647 = vrot.lane.b32.xlu1 %v4603_v16, %s5699_s7  ;;  %v9448_v56 = vld [vmem:[#allocation120_spill] sm:$0xff]  ;;  %v4192_v47 = vadd.f32 %v4176_v7, %v4096_v48 }
 0x82c   : > { %v4624_v34 = vpop.permute.xlu1 %4623  ;;  %v4585_v32 = vpop.permute.xlu0 %4584  ;;  %v4178_v16 = vmul.f32 %v9448_v56, %v8596_v43  ;;  %v9454_v43 = vld [vmem:[#allocation85_spill] sm:$0xff]  ;;  %v9458_v7 = vld [vmem:[#allocation124_spill] sm:$0xff] }
 0x82d   : > { %v4671_v38 = vadd.f32 %v4624_v34, %v4511_v26  ;;  %v4605_v50 = vmul.f32 %v4585_v32, %v8642_v3  ;;  %v9449_v34 = vld [vmem:[#allocation84_spill] sm:$0xff]  ;;  %v4352_v57 = vadd.f32 %v8677_v22, %v4192_v47  ;;  %v9456_v22 = vld [vmem:[#allocation74_spill] sm:$0xff]  ;;  %v4182_v23 = vmul.f32 %v9458_v7, %v8612_v29  ;;  %v9462_v47 = vld [vmem:[#allocation99_spill] sm:$0xff] }
 0x82e   : > { %v3780_v32 = vadd.f32 %v9449_v34, %v3604_v9  ;;  %v3608_v14 = vmul.f32 %v5660_v40, %v9456_v22  ;;  %v9460_v9 = vld [vmem:[#allocation110_spill] sm:$0xff] }
 0x82f   : > { %v4943_v33 = vpack.c.bf16 %v4671_v38, %v4671_v38  ;;  %4649 = vrot.lane.b32.xlu0 %v4604_v52, %s5699_s7  ;;  %4651 = vrot.lane.b32.xlu1 %v4605_v50, %s5699_s7  ;;  %v4098_v52 = vadd.f32 %v9450_v49, %v3938_v30  ;;  %v5659_v38 = vld [vmem:[#allocation3 + $0x8] sm:$0xff]  ;;  %v5661_v29 = vld [vmem:[#allocation3 + $0x70] sm:$0xff] }
 0x830   : > { %v4628_v2 = vpop.permute.xlu1 %4627  ;;  %v4466_v3 = vpop.permute.xlu0 %4465  ;;  %v9451_v50 = vld [vmem:[#allocation73_spill] sm:$0xff] }
 0x831   : > { %4752 = vst.msk [vmem:[%s9020_s6] sm:$0xf] %vm4751_vm3, %v4943_v33  ;;  %v4673_v27 = vadd.f32 %v4628_v2, %v4513_v60  ;;  %v3606_v60 = vmul.f32 %v5659_v38, %v9451_v50  ;;  %v9452_v33 = vld [vmem:[#allocation96_spill] sm:$0xff]  ;;  %v4512_v31 = vadd.f32 %v4466_v3, %v4352_v57  ;;  %v9459_v3 = vld [vmem:[#allocation87_spill] sm:$0xff]  ;;  %v9464_v50 = vld [vmem:[#allocation89_spill] sm:$0xff] }
 0x832   : > { %v3940_v2 = vadd.f32 %v9452_v33, %v3780_v32  ;;  %v3784_v48 = vadd.f32 %v9459_v3, %v3608_v14  ;;  %v9463_v32 = vld [vmem:[#allocation126_spill] sm:$0xff]  ;;  %v9465_v33 = vld [vmem:[#allocation112_spill] sm:$0xff] }
 0x833   : > { %v4945_v36 = vpack.c.bf16 %v4673_v27, %v4673_v27  ;;  %4653 = vrot.lane.b32.xlu0 %v4606_v24, %s5699_s7  ;;  %v9453_v24 = vld [vmem:[#allocation122_spill] sm:$0xff]  ;;  %v3782_v20 = vadd.f32 %v9454_v43, %v3606_v60  ;;  %v4184_v49 = vmul.f32 %v9463_v32, %v8620_v58  ;;  %v9467_v43 = vld [vmem:[#allocation77_spill] sm:$0xff]  ;;  %v5663_v3 = vld [vmem:[#allocation3 + $0x20] sm:$0xff] }
 0x834   : > { %v4470_v54 = vpop.permute.xlu0 %4469  ;;  %v4180_v27 = vmul.f32 %v9453_v24, %v8604_v6  ;;  %v4100_v35 = vadd.f32 %v9455_v28, %v3940_v2  ;;  %v3944_v34 = vadd.f32 %v9462_v47, %v3784_v48  ;;  %v9473_v48 = vld [vmem:[#allocation78_spill] sm:$0xff] }
 0x835   : > { %4754 = vst.msk [vmem:[%s9020_s6 + $0x8] sm:$0xf] %vm4751_vm3, %v4945_v36  ;;  %v4194_v36 = vadd.f32 %v4178_v16, %v4098_v52  ;;  %v3942_v10 = vadd.f32 %v9457_v62, %v3782_v20  ;;  %v9461_v16 = vld [vmem:[#allocation75_spill] sm:$0xff]  ;;  %v9470_v62 = vld [vmem:[#allocation90_spill] sm:$0xff] }
 0x836   : > { %v4196_v42 = vadd.f32 %v4180_v27, %v4100_v35  ;;  %v4104_v2 = vadd.f32 %v9465_v33, %v3944_v34  ;;  %v9477_v34 = vld [vmem:[#allocation115_spill] sm:$0xff] }
 0x837   : > { %v4354_v53 = vadd.f32 %v8681_v13, %v4194_v36  ;;  %v4102_v1 = vadd.f32 %v9460_v9, %v3942_v10 }
 0x838   : > { %v4474_v45 = vpop.permute.xlu0 %4473  ;;  %v4356_v13 = vadd.f32 %v8685_v61, %v4196_v42  ;;  %v4200_v35 = vadd.f32 %v4184_v49, %v4104_v2  ;;  %v9471_v42 = vld [vmem:[#allocation114_spill] sm:$0xff] }
 0x839   : > { %v4514_v6 = vadd.f32 %v4470_v54, %v4354_v53  ;;  %v3610_v54 = vmul.f32 %v5661_v29, %v9461_v16  ;;  %v4198_v52 = vadd.f32 %v4182_v23, %v4102_v1  ;;  %v9469_v53 = vld [vmem:[#allocation127_spill] sm:$0xff]  ;;  %v9475_v1 = vld [vmem:[#allocation128_spill] sm:$0xff] }
 0x83a   : > { %v4516_v57 = vadd.f32 %v4474_v45, %v4356_v13  ;;  %v4188_v13 = vmul.f32 %v9475_v1, %v8636_v63 }
 0x83b   : > { %v3786_v60 = vadd.f32 %v9464_v50, %v3610_v54  ;;  %v9476_v54 = vld [vmem:[#allocation91_spill] sm:$0xff]  ;;  %v9479_v50 = vld [vmem:[#allocation129_spill] sm:$0xff] }
 0x83c   : > { %v8878_v46 = vpop.permute.xlu0 %4477 }
 0x840   : > { %v8880_v51 = vpop.permute.xlu0 %4481 }
 0x844   : > { %v8882_v15 = vpop.permute.xlu0 %4485 }
 0x848   : > { %v8886_v41 = vpop.permute.xlu0 %4489 }
 0x84c   : > { %v8898_v26 = vpop.permute.xlu0 %4493 }
 0x889   : > { %v4626_v59 = vpop.permute.xlu0 %4625 }
 0x88a   : > { %v4672_v44 = vadd.f32 %v4626_v59, %v4512_v31  ;;  %v5662_v31 = vld [vmem:[#allocation3 + $0x10] sm:$0xff]  ;;  %v9468_v59 = vld [vmem:[#allocation101_spill] sm:$0xff] }
 0x88b   : > { %v3612_v20 = vmul.f32 %v5662_v31, %v9467_v43  ;;  %v3946_v28 = vadd.f32 %v9468_v59, %v3786_v60  ;;  %v4190_v60 = vmul.f32 %v9479_v50, %v8644_v39 }
 0x88c   : > { %v4944_v25 = vpack.c.bf16 %v4672_v44, %v4672_v44  ;;  %v4186_v44 = vmul.f32 %v9469_v53, %v8628_v37 }
 0x88d   : > { %v4632_v18 = vpop.permute.xlu1 %4631  ;;  %v4630_v21 = vpop.permute.xlu0 %4629  ;;  %v3788_v10 = vadd.f32 %v9470_v62, %v3612_v20 }
 0x88e   : > { %4753 = vst.msk [vmem:[%s9020_s6 + $0x4] sm:$0xf] %vm4751_vm3, %v4944_v25  ;;  %v4675_v30 = vadd.f32 %v4632_v18, %v8799_v19  ;;  %v4674_v56 = vadd.f32 %v4630_v21, %v4514_v6  ;;  %v9466_v19 = vld [vmem:[#allocation130_spill] sm:$0xff]  ;;  %v9472_v6 = vld [vmem:[#allocation131_spill] sm:$0xff]  ;;  %v3614_v18 = vmul.f32 %v5663_v3, %v9473_v48 }
 0x88f   : > { %v4358_v36 = vadd.f32 %v9466_v19, %v4198_v52  ;;  %v4360_v25 = vadd.f32 %v9472_v6, %v4200_v35  ;;  %v9474_v21 = vld [vmem:[#allocation102_spill] sm:$0xff]  ;;  %v9480_v19 = vld [vmem:[#allocation116_spill] sm:$0xff] }
 0x890   : > { %v4947_v38 = vpack.c.bf16 %v4675_v30, %v4675_v30  ;;  %v4946_v61 = vpack.c.bf16 %v4674_v56, %v4674_v56  ;;  %v3948_v9 = vadd.f32 %v9474_v21, %v3788_v10  ;;  %v3790_v47 = vadd.f32 %v9476_v54, %v3614_v18 }
 0x891   : > { %v4636_v24 = vpop.permute.xlu1 %4635  ;;  %v4634_v27 = vpop.permute.xlu0 %4633  ;;  %v4518_v40 = vadd.f32 %v8878_v46, %v4358_v36  ;;  %v4520_v56 = vadd.f32 %v8880_v51, %v4360_v25 }
 0x892   : > { %4756 = vst.msk [vmem:[%s9020_s6 + $0x10] sm:$0xf] %vm4751_vm3, %v4947_v38  ;;  %4755 = vst.msk [vmem:[%s9020_s6 + $0xc] sm:$0xf] %vm4751_vm3, %v4946_v61  ;;  %v4677_v58 = vadd.f32 %v4636_v24, %v8807_v17  ;;  %v4676_v45 = vadd.f32 %v4634_v27, %v4516_v57  ;;  %v4106_v17 = vadd.f32 %v9471_v42, %v3946_v28  ;;  %v9478_v57 = vld [vmem:[#allocation103_spill] sm:$0xff] }
 0x893   : > { %v4108_v32 = vadd.f32 %v9477_v34, %v3948_v9  ;;  %v3950_v38 = vadd.f32 %v9478_v57, %v3790_v47 }
 0x894   : > { %v4949_v22 = vpack.c.bf16 %v4677_v58, %v4677_v58  ;;  %v4948_v14 = vpack.c.bf16 %v4676_v45, %v4676_v45  ;;  %v4202_v30 = vadd.f32 %v4186_v44, %v4106_v17 }
 0x895   : > { %v4640_v7 = vpop.permute.xlu1 %4639  ;;  %v4638_v23 = vpop.permute.xlu0 %4637  ;;  %v4204_v61 = vadd.f32 %v4188_v13, %v4108_v32  ;;  %v4110_v36 = vadd.f32 %v9480_v19, %v3950_v38 }
 0x896   : > { %4758 = vst.msk [vmem:[%s9020_s6 + $0x18] sm:$0xf] %vm4751_vm3, %v4949_v22  ;;  %4757 = vst.msk [vmem:[%s9020_s6 + $0x14] sm:$0xf] %vm4751_vm3, %v4948_v14  ;;  %v4679_v37 = vadd.f32 %v4640_v7, %v8813_v55  ;;  %v4678_v46 = vadd.f32 %v4638_v23, %v4518_v40  ;;  %v4362_v52 = vadd.f32 %v8711_v5, %v4202_v30 }
 0x897   : > { %v4364_v58 = vadd.f32 %v8717_v4, %v4204_v61 }
 0x898   : > { %v4951_v29 = vpack.c.bf16 %v4679_v37, %v4679_v37  ;;  %v4950_v16 = vpack.c.bf16 %v4678_v46, %v4678_v46  ;;  %v4522_v5 = vadd.f32 %v8882_v15, %v4362_v52  ;;  %v4206_v15 = vadd.f32 %v4190_v60, %v4110_v36 }
 0x899   : > { %v4644_v49 = vpop.permute.xlu1 %4643  ;;  %v4642_v55 = vpop.permute.xlu0 %4641  ;;  %v4524_v45 = vadd.f32 %v8886_v41, %v4364_v58 }
 0x89a   : > { %4760 = vst.msk [vmem:[%s9020_s6 + $0x20] sm:$0xf] %vm4751_vm3, %v4951_v29  ;;  %4759 = vst.msk [vmem:[%s9020_s6 + $0x1c] sm:$0xf] %vm4751_vm3, %v4950_v16  ;;  %v4681_v63 = vadd.f32 %v4644_v49, %v8820_v11  ;;  %v4680_v51 = vadd.f32 %v4642_v55, %v4520_v56  ;;  %v4366_v59 = vadd.f32 %v8719_v12, %v4206_v15 }
 0x89c   : > { %v4953_v33 = vpack.c.bf16 %v4681_v63, %v4681_v63  ;;  %v4952_v2 = vpack.c.bf16 %v4680_v51, %v4680_v51  ;;  %v4526_v41 = vadd.f32 %v8898_v26, %v4366_v59 }
 0x89d   : > { %v4648_v24 = vpop.permute.xlu1 %4647  ;;  %v4646_v27 = vpop.permute.xlu0 %4645 }
 0x89e   : > { %4762 = vst.msk [vmem:[%s9020_s6 + $0x28] sm:$0xf] %vm4751_vm3, %v4953_v33  ;;  %4761 = vst.msk [vmem:[%s9020_s6 + $0x24] sm:$0xf] %vm4751_vm3, %v4952_v2  ;;  %v4683_v39 = vadd.f32 %v4648_v24, %v8828_v8  ;;  %v4682_v11 = vadd.f32 %v4646_v27, %v4522_v5 }
 0x8a0   : > { %v4955_v31 = vpack.c.bf16 %v4683_v39, %v4683_v39  ;;  %v4954_v43 = vpack.c.bf16 %v4682_v11, %v4682_v11 }
 0x8a1   : > { %v4652_v20 = vpop.permute.xlu1 %4651  ;;  %v4650_v4 = vpop.permute.xlu0 %4649 }
 0x8a2   : > { %4764 = vst.msk [vmem:[%s9020_s6 + $0x30] sm:$0xf] %vm4751_vm3, %v4955_v31  ;;  %4763 = vst.msk [vmem:[%s9020_s6 + $0x2c] sm:$0xf] %vm4751_vm3, %v4954_v43  ;;  %v4685_v8 = vadd.f32 %v4652_v20, %v8840_v0  ;;  %v4684_v28 = vadd.f32 %v4650_v4, %v4524_v45 }
 0x8a4   : > { %v4957_v35 = vpack.c.bf16 %v4685_v8, %v4685_v8  ;;  %v4956_v53 = vpack.c.bf16 %v4684_v28, %v4684_v28 }
 0x8a5   : > { %v4654_v44 = vpop.permute.xlu0 %4653 }
 0x8a6   : > { %4766 = vst.msk [vmem:[%s9020_s6 + $0x38] sm:$0xf] %vm4751_vm3, %v4957_v35  ;;  %4765 = vst.msk [vmem:[%s9020_s6 + $0x34] sm:$0xf] %vm4751_vm3, %v4956_v53  ;;  %v4686_v12 = vadd.f32 %v4654_v44, %v4526_v41 }
 0x8a8   : > { %v4958_v40 = vpack.c.bf16 %v4686_v12, %v4686_v12 }
 0x8aa   : > { %4767 = vst.msk [vmem:[%s9020_s6 + $0x3c] sm:$0xf] %vm4751_vm3, %v4958_v40 }
 0x8ab PF: > { %s16_s21 = sadd.s32 1, %s5670_s21  }
 0x8ac   : > { %p13_p6 = scmp.ge.s32.totalorder %s16_s21, 4  }
 0x8ae   :  { %15 = sbr.rel (!%p13_p6) target bundleno = 1 (0x1), region = 80 }

</bundles_post_ra>
